<compile_context>
chip_gen: v6e
topology: v6e:2x2x1
jax: 0.10.0
libtpu: 0.0.40
codegen_flags: <defaults>
</compile_context>

<pallas_src>
from functools import partial

import jax
import jax.numpy as jnp
from jax.experimental import pallas as pl
from jax.experimental.pallas import tpu as pltpu


def _round_up(x, m):
    return ((x + m - 1) // m) * m


def _pick_hw_chunk(hw):
    """Largest spatial chunk <=128 that divides HW (keeps sublane alignment)."""
    for c in (128, 64, 32, 16, 8):
        if hw % c == 0:
            return c
    return hw


# -----------------------------------------------------------------------------
# Fused kernel.  Grid = (batch tiles [parallel], spatial chunks [arbitrary]).
#   per spatial chunk : (im2col patch chunk) @ Wc + bc -> ReLU -> partial GAP
#                       sum accumulated into a (TB, 128) f32 VMEM scratch
#   last chunk        : pooled @ Wp(+1/HW folded) + bp               (512-d)
#                       feats @ Wfe + bfe(folded BN) -> ReLU         (128-d)
#                       cat([cnn, h]) @ W1 (split matmul) + b1(folded BN)
#                       -> ReLU -> Dropout(eval = identity) -> @ W2 + b2
# -----------------------------------------------------------------------------
def hybrid_fused_kernel(patches_ref, feat_ref,
                        wc_ref, bc_ref, wp_ref, bp_ref,
                        wfe_ref, bfe_ref,
                        w1a_ref, w1b_ref, b1_ref,
                        w2_ref, b2_ref,
                        o_ref, pooled_ref):
    f32 = jnp.float32
    s = pl.program_id(1)
    tb, hwc, kp = patches_ref.shape
    coutp = wc_ref.shape[1]

    @pl.when(s == 0)
    def _():
        pooled_ref[...] = jnp.zeros_like(pooled_ref)

    # ---- conv chunk: single im2col matmul + bias + ReLU, partial GAP sum ----
    x = patches_ref[...].reshape(tb * hwc, kp)                  # bf16
    conv = jnp.dot(x, wc_ref[...], preferred_element_type=f32)  # (tb*hwc, 128)
    conv = jnp.maximum(conv + bc_ref[...], 0.0)
    pooled_ref[...] += conv.reshape(tb, hwc, coutp).sum(axis=1)  # (tb, 128)

    @pl.when(s == pl.num_programs(1) - 1)
    def _():
        # 1/(H*W) GAP scale is folded into wp at make_params time.
        cnn = jnp.dot(pooled_ref[...].astype(wp_ref.dtype), wp_ref[...],
                      preferred_element_type=f32) + bp_ref[...]   # (tb, 512)

        # feature encoder: Linear(F,128) + folded BatchNorm1d(eval) + ReLU
        h = jnp.dot(feat_ref[...], wfe_ref[...],
                    preferred_element_type=f32) + bfe_ref[...]
        h = jnp.maximum(h, 0.0)                                   # (tb, 128)

        # fusion: cat([cnn, h]) @ W1 == cnn @ W1[:512] + h @ W1[512:]
        z = (jnp.dot(cnn.astype(w1a_ref.dtype), w1a_ref[...],
                     preferred_element_type=f32)
             + jnp.dot(h.astype(w1b_ref.dtype), w1b_ref[...],
                       preferred_element_type=f32)
             + b1_ref[...])
        z = jnp.maximum(z, 0.0)                                   # (tb, 256)
        # Dropout(0.3): identity in eval mode.

        o_ref[...] = jnp.dot(z.astype(w2_ref.dtype), w2_ref[...],
                             preferred_element_type=f32) + b2_ref[...]


# -----------------------------------------------------------------------------
# Wrapper: layout plumbing (NCHW -> NHWC, im2col, zero-padding, bf16 casts)
# done by XLA, then one fused pallas_call with a parallel batch grid axis and
# an arbitrary spatial-reduction axis.
# -----------------------------------------------------------------------------
def _im2col_3x3(x_nhwc):
    """(B,H,W,C) -> (B*H*W, 9*C) 'same' 3x3 patches in (kh, kw, c) order."""
    B, H, W, C = x_nhwc.shape
    xp = jnp.pad(x_nhwc, ((0, 0), (1, 1), (1, 1), (0, 0)))
    cols = [xp[:, kh:kh + H, kw:kw + W, :]
            for kh in range(3) for kw in range(3)]
    return jnp.concatenate(cols, axis=-1).reshape(B * H * W, 9 * C)


@partial(jax.jit, static_argnames=("num_classes",))
def hybrid_model_forward(image_nchw, features, params, num_classes=3):
    B, _, H, W = image_nchw.shape
    HW = H * W
    F = features.shape[1]
    Kp = params["wc"].shape[0]          # padded im2col contraction depth
    COUTP = params["wc"].shape[1]       # padded conv channels (128)
    Fp = params["wfe"].shape[0]         # padded feature dim (128)
    NCP = params["b2"].shape[1]         # padded class count (128)

    # Batch tile: multiple of 16 (bf16 sublane pack); capped so >=2 tiles once
    # B >= 32, letting the 'parallel' axis shard across v7x's 2 TensorCores.
    TB = max(16, min(64, _round_up(-(-B // 2), 16)))
    Bp = _round_up(B, TB)
    HWC = _pick_hw_chunk(HW)

    # NCHW -> NHWC, im2col, zero-pad K / batch, cast MXU operands to bf16.
    x = jnp.transpose(image_nchw, (0, 2, 3, 1)).astype(jnp.float32)
    patches = _im2col_3x3(x)                                     # (B*HW, 9*Cin)
    patches = jnp.pad(patches, ((0, 0), (0, Kp - patches.shape[1])))
    patches = patches.reshape(B, HW, Kp)
    patches = jnp.pad(patches,
                      ((0, Bp - B), (0, 0), (0, 0))).astype(jnp.bfloat16)
    feats = jnp.pad(features.astype(jnp.float32),
                    ((0, Bp - B), (0, Fp - F))).astype(jnp.bfloat16)

    row_map = lambda i, s: (i, 0)
    const_map = lambda i, s: (0, 0)

    def wspec(p):
        return pl.BlockSpec(p.shape, const_map)

    # Advisory cost estimate so XLA overlaps the wrapper-side im2col/transpose.
    flops = (2 * Bp * HW * Kp * COUTP
             + 2 * Bp * (COUTP * 512 + Fp * 128 + 512 * 256 + 128 * 256
                         + 256 * NCP))
    param_bytes = sum(int(p.size) * p.dtype.itemsize for p in params.values())
    cost = pl.CostEstimate(
        flops=flops, transcendentals=0,
        bytes_accessed=int(patches.size) * 2 + int(feats.size) * 2
                       + param_bytes + Bp * NCP * 4)

    out = pl.pallas_call(
        hybrid_fused_kernel,
        out_shape=jax.ShapeDtypeStruct((Bp, NCP), jnp.float32),
        grid=(Bp // TB, HW // HWC),
        in_specs=[
            pl.BlockSpec((TB, HWC, Kp), lambda i, s: (i, s, 0)),  # patch chunk
            pl.BlockSpec((TB, Fp), row_map),                      # features
            wspec(params["wc"]), wspec(params["bc"]),
            wspec(params["wp"]), wspec(params["bp"]),
            wspec(params["wfe"]), wspec(params["bfe"]),
            wspec(params["w1a"]), wspec(params["w1b"]), wspec(params["b1"]),
            wspec(params["w2"]), wspec(params["b2"]),
        ],
        out_specs=pl.BlockSpec((TB, NCP), row_map),
        scratch_shapes=[pltpu.VMEM((TB, COUTP), jnp.float32)],    # GAP accum
        compiler_params=pltpu.CompilerParams(
            dimension_semantics=("parallel", "arbitrary"),
            vmem_limit_bytes=32 * 1024 * 1024),
        cost_estimate=cost,
    )(patches, feats,
      params["wc"], params["bc"], params["wp"], params["bp"],
      params["wfe"], params["bfe"],
      params["w1a"], params["w1b"], params["b1"],
      params["w2"], params["b2"])
    return out[:B, :num_classes]


# -----------------------------------------------------------------------------
# Parameter construction (kernel-ready: BN folded, conv weight flattened to
# im2col order, 1/(H*W) GAP scale folded into the projection, everything
# zero-padded to lane-dense shapes, matmul weights bf16, biases f32).
# -----------------------------------------------------------------------------
def _linear_init(key, fan_in, fan_out):
    kw, kb = jax.random.split(key)
    bound = 1.0 / jnp.sqrt(fan_in)
    w = jax.random.uniform(kw, (fan_in, fan_out), jnp.float32, -bound, bound)
    b = jax.random.uniform(kb, (1, fan_out), jnp.float32, -bound, bound)
    return w, b


def _bn_fold(key, n, eps=1e-5):
    k1, k2, k3, k4 = jax.random.split(key, 4)
    gamma = 1.0 + 0.1 * jax.random.normal(k1, (1, n), jnp.float32)
    beta = 0.1 * jax.random.normal(k2, (1, n), jnp.float32)
    running_mean = 0.1 * jax.random.normal(k3, (1, n), jnp.float32)
    running_var = jax.random.uniform(k4, (1, n), jnp.float32, 0.5, 1.5)
    scale = gamma / jnp.sqrt(running_var + eps)
    shift = beta - running_mean * scale
    return scale, shift


def make_params(key, feature_size=52, num_classes=3, cin=3, cout=16,
                image_hw=(16, 16)):
    keys = jax.random.split(key, 8)
    bf16 = jnp.bfloat16
    COUTP, NCP = 128, 128
    Fp = _round_up(feature_size, 128)
    hw = image_hw[0] * image_hw[1]

    # synthetic CNN backbone (stand-in for the injected pretrained cnn_model)
    wc = 0.1 * jax.random.normal(keys[0], (3, 3, cin, cout), jnp.float32)
    bc = 0.01 * jax.random.normal(keys[1], (1, cout), jnp.float32)
    wp, bp = _linear_init(keys[2], cout, 512)

    # feature encoder: Linear(F,128) with BatchNorm1d(128) (eval) folded in
    wfe, bfe = _linear_init(keys[3], feature_size, 128)
    sfe, tfe = _bn_fold(keys[4], 128)
    wfe = wfe * sfe
    bfe = bfe * sfe + tfe

    # fusion: Linear(640,256) with BatchNorm1d(256) (eval) folded in
    w1, b1 = _linear_init(keys[5], 512 + 128, 256)
    s1, t1 = _bn_fold(keys[6], 256)
    w1 = w1 * s1
    b1 = b1 * s1 + t1
    w2, b2 = _linear_init(keys[7], 256, num_classes)

    # ---- lane-density / alignment zero-padding (exact) ----
    k = 9 * cin
    kp = _round_up(k, 32)
    # conv weight flattened to (9*cin, cout) in (kh, kw, cin) order — must
    # match _im2col_3x3 — padded to (Kp, 128).
    wcf = jnp.zeros((kp, COUTP), jnp.float32).at[:k, :cout].set(
        wc.reshape(k, cout))
    bcp = jnp.zeros((1, COUTP), jnp.float32).at[:, :cout].set(bc)
    # fold the 1/(H*W) global-average-pool scale into wp; pad rows to 128.
    wpp = jnp.zeros((COUTP, 512), jnp.float32).at[:cout, :].set(wp * (1.0 / hw))
    # pad encoder contraction dim to 128.
    wfep = jnp.zeros((Fp, 128), jnp.float32).at[:feature_size, :].set(wfe)
    # pad classifier width to 128 lanes (sliced back in the wrapper).
    w2p = jnp.zeros((256, NCP), jnp.float32).at[:, :num_classes].set(w2)
    b2p = jnp.zeros((1, NCP), jnp.float32).at[:, :num_classes].set(b2)

    return dict(
        wc=wcf.astype(bf16), bc=bcp,
        wp=wpp.astype(bf16), bp=bp,
        wfe=wfep.astype(bf16), bfe=bfe,
        w1a=w1[:512].astype(bf16), w1b=w1[512:].astype(bf16), b1=b1,
        w2=w2p.astype(bf16), b2=b2p)


# -----------------------------------------------------------------------------
# Pure-JAX f32 reference (same algorithm, same padded params) for a tolerance
# check of the bf16/f32 kernel.
# -----------------------------------------------------------------------------
def _reference_forward(image_nchw, features, params, num_classes):
    x = jnp.transpose(image_nchw, (0, 2, 3, 1)).astype(jnp.float32)
    B, H, W, _ = x.shape
    Kp = params["wc"].shape[0]
    patches = _im2col_3x3(x)
    patches = jnp.pad(patches, ((0, 0), (0, Kp - patches.shape[1])))
    conv = jnp.maximum(
        patches @ params["wc"].astype(jnp.float32) + params["bc"], 0.0)
    pooled = conv.reshape(B, H * W, -1).sum(axis=1)
    cnn = pooled @ params["wp"].astype(jnp.float32) + params["bp"]
    Fp = params["wfe"].shape[0]
    f = jnp.pad(features.astype(jnp.float32),
                ((0, 0), (0, Fp - features.shape[1])))
    h = jnp.maximum(f @ params["wfe"].astype(jnp.float32) + params["bfe"], 0.0)
    z = jnp.maximum(cnn @ params["w1a"].astype(jnp.float32)
                    + h @ params["w1b"].astype(jnp.float32) + params["b1"], 0.0)
    out = z @ params["w2"].astype(jnp.float32) + params["b2"]
    return out[:, :num_classes]


if __name__ == "__main__":
    key = jax.random.PRNGKey(0)
    k_img, k_feat, k_par = jax.random.split(key, 3)

    B, C, H, W = 4, 3, 16, 16
    feature_size, num_classes = 52, 3

    image = jax.random.normal(k_img, (B, C, H, W), jnp.float32)       # NCHW
    features = jax.random.normal(k_feat, (B, feature_size), jnp.float32)
    params = make_params(k_par, feature_size=feature_size,
                         num_classes=num_classes, cin=C, image_hw=(H, W))

    out = hybrid_model_forward(image, features, params,
                               num_classes=num_classes)
    out = jax.block_until_ready(out)
    assert out.shape == (B, num_classes), out.shape

    ref = _reference_forward(image, features, params, num_classes)
    err = float(jnp.max(jnp.abs(out - ref)))
    assert err < 5e-2, f"max abs err vs f32 reference: {err}"

    print("KERNEL_OK")
</pallas_src>

<mosaic_0001>
module attributes {stable_mosaic.version = 11 : i64} {
  func.func @hybrid_fused_kernel(%arg0: i32, %arg1: i32, %arg2: memref<16x128x32xbf16, #tpu.memory_space<vmem>>, %arg3: memref<16x128xbf16, #tpu.memory_space<vmem>>, %arg4: memref<32x128xbf16, #tpu.memory_space<vmem>>, %arg5: memref<1x128xf32, #tpu.memory_space<vmem>>, %arg6: memref<128x512xbf16, #tpu.memory_space<vmem>>, %arg7: memref<1x512xf32, #tpu.memory_space<vmem>>, %arg8: memref<128x128xbf16, #tpu.memory_space<vmem>>, %arg9: memref<1x128xf32, #tpu.memory_space<vmem>>, %arg10: memref<512x256xbf16, #tpu.memory_space<vmem>>, %arg11: memref<128x256xbf16, #tpu.memory_space<vmem>>, %arg12: memref<1x256xf32, #tpu.memory_space<vmem>>, %arg13: memref<256x128xbf16, #tpu.memory_space<vmem>>, %arg14: memref<1x128xf32, #tpu.memory_space<vmem>>, %arg15: memref<16x128xf32, #tpu.memory_space<vmem>>, %arg16: memref<16x128xf32, #tpu.memory_space<vmem>>) attributes {dimension_semantics = [#tpu.dimension_semantics<parallel>, #tpu.dimension_semantics<arbitrary>], iteration_bounds = array<i64: 1, 2>, scalar_prefetch = 0 : i64, scratch_operands = 1 : i64, tpu.core_type = #tpu.core_type<tc>, window_params = [{transform_indices = @transform_0, window_bounds = array<i64: 16, 128, 32>}, {transform_indices = @transform_1, window_bounds = array<i64: 16, 128>}, {pipeline_mode = #tpu.pipeline_mode<synchronous>, transform_indices = @transform_2, window_bounds = array<i64: 32, 128>}, {pipeline_mode = #tpu.pipeline_mode<synchronous>, transform_indices = @transform_3, window_bounds = array<i64: 1, 128>}, {pipeline_mode = #tpu.pipeline_mode<synchronous>, transform_indices = @transform_4, window_bounds = array<i64: 128, 512>}, {pipeline_mode = #tpu.pipeline_mode<synchronous>, transform_indices = @transform_5, window_bounds = array<i64: 1, 512>}, {pipeline_mode = #tpu.pipeline_mode<synchronous>, transform_indices = @transform_6, window_bounds = array<i64: 128, 128>}, {pipeline_mode = #tpu.pipeline_mode<synchronous>, transform_indices = @transform_7, window_bounds = array<i64: 1, 128>}, {pipeline_mode = #tpu.pipeline_mode<synchronous>, transform_indices = @transform_8, window_bounds = array<i64: 512, 256>}, {pipeline_mode = #tpu.pipeline_mode<synchronous>, transform_indices = @transform_9, window_bounds = array<i64: 128, 256>}, {pipeline_mode = #tpu.pipeline_mode<synchronous>, transform_indices = @transform_10, window_bounds = array<i64: 1, 256>}, {pipeline_mode = #tpu.pipeline_mode<synchronous>, transform_indices = @transform_11, window_bounds = array<i64: 256, 128>}, {pipeline_mode = #tpu.pipeline_mode<synchronous>, transform_indices = @transform_12, window_bounds = array<i64: 1, 128>}, {transform_indices = @transform_13, window_bounds = array<i64: 16, 128>}]} {
    %c0_i32 = arith.constant 0 : i32
    %0 = arith.cmpi eq, %arg1, %c0_i32 : i32
    %1 = arith.extui %0 : i1 to i32
    %c0_i32_0 = arith.constant 0 : i32
    %2 = arith.cmpi ne, %1, %c0_i32_0 : i32
    scf.if %2 {
      %cst_14 = arith.constant 0.000000e+00 : f32
      %20 = vector.broadcast %cst_14 : f32 to vector<16x128xf32>
      %c0_15 = arith.constant 0 : index
      %c0_16 = arith.constant 0 : index
      %21 = vector.load %arg16[%c0_15, %c0_16] : memref<16x128xf32, #tpu.memory_space<vmem>>, vector<16x128xf32>
      tpu.vector_store %arg16[%c0_15, %c0_16], %20 {strides = array<i32>} : memref<16x128xf32, #tpu.memory_space<vmem>>, vector<16x128xf32>,
    } else {
    }
    %c0 = arith.constant 0 : index
    %c0_1 = arith.constant 0 : index
    %c0_2 = arith.constant 0 : index
    %3 = vector.load %arg2[%c0, %c0_1, %c0_2] : memref<16x128x32xbf16, #tpu.memory_space<vmem>>, vector<16x128x32xbf16>
    %4 = vector.shape_cast %3 : vector<16x128x32xbf16> to vector<2048x32xbf16>
    %c0_3 = arith.constant 0 : index
    %c0_4 = arith.constant 0 : index
    %5 = vector.load %arg4[%c0_3, %c0_4] : memref<32x128xbf16, #tpu.memory_space<vmem>>, vector<32x128xbf16>
    %cst = arith.constant dense<0.000000e+00> : vector<2048x128xf32>
    %6 = tpu.matmul %4, %5, %cst {dimension_numbers = #tpu.dot_dimension_numbers<[1], [0], [0], [1], [0, 0, 1, 1], [], []>} : vector<2048x32xbf16>, vector<32x128xbf16>, vector<2048x128xf32> -> vector<2048x128xf32>
    %c0_5 = arith.constant 0 : index
    %c0_6 = arith.constant 0 : index
    %7 = vector.load %arg5[%c0_5, %c0_6] : memref<1x128xf32, #tpu.memory_space<vmem>>, vector<1x128xf32>
    %8 = vector.broadcast %7 : vector<1x128xf32> to vector<2048x128xf32>
    %9 = arith.addf %6, %8 : vector<2048x128xf32>
    %cst_7 = arith.constant 0.000000e+00 : f32
    %10 = vector.broadcast %cst_7 : f32 to vector<2048x128xf32>
    %11 = arith.maximumf %9, %10 : vector<2048x128xf32>
    %c0_8 = arith.constant 0 : index
    %c0_9 = arith.constant 0 : index
    %12 = vector.load %arg16[%c0_8, %c0_9] : memref<16x128xf32, #tpu.memory_space<vmem>>, vector<16x128xf32>
    %13 = vector.shape_cast %11 : vector<2048x128xf32> to vector<16x128x128xf32>
    %cst_10 = arith.constant dense<0.000000e+00> : vector<16x128xf32>
    %14 = vector.multi_reduction <add>, %13, %cst_10 [1] : vector<16x128x128xf32> to vector<16x128xf32>
    %15 = arith.addf %12, %14 : vector<16x128xf32>
    %c0_11 = arith.constant 0 : index
    %c0_12 = arith.constant 0 : index
    %16 = vector.load %arg16[%c0_11, %c0_12] : memref<16x128xf32, #tpu.memory_space<vmem>>, vector<16x128xf32>
    tpu.vector_store %arg16[%c0_11, %c0_12], %15 {strides = array<i32>} : memref<16x128xf32, #tpu.memory_space<vmem>>, vector<16x128xf32>,
    %c1_i32 = arith.constant 1 : i32
    %17 = arith.cmpi eq, %arg1, %c1_i32 : i32
    %18 = arith.extui %17 : i1 to i32
    %c0_i32_13 = arith.constant 0 : i32
    %19 = arith.cmpi ne, %18, %c0_i32_13 : i32
    scf.if %19 {
      %c0_14 = arith.constant 0 : index
      %c0_15 = arith.constant 0 : index
      %20 = vector.load %arg16[%c0_14, %c0_15] : memref<16x128xf32, #tpu.memory_space<vmem>>, vector<16x128xf32>
      %21 = arith.truncf %20 : vector<16x128xf32> to vector<16x128xbf16>
      %c0_16 = arith.constant 0 : index
      %c0_17 = arith.constant 0 : index
      %22 = vector.load %arg6[%c0_16, %c0_17] : memref<128x512xbf16, #tpu.memory_space<vmem>>, vector<128x512xbf16>
      %cst_18 = arith.constant dense<0.000000e+00> : vector<16x512xf32>
      %23 = tpu.matmul %21, %22, %cst_18 {dimension_numbers = #tpu.dot_dimension_numbers<[1], [0], [0], [1], [0, 0, 1, 1], [], []>} : vector<16x128xbf16>, vector<128x512xbf16>, vector<16x512xf32> -> vector<16x512xf32>
      %c0_19 = arith.constant 0 : index
      %c0_20 = arith.constant 0 : index
      %24 = vector.load %arg7[%c0_19, %c0_20] : memref<1x512xf32, #tpu.memory_space<vmem>>, vector<1x512xf32>
      %25 = vector.broadcast %24 : vector<1x512xf32> to vector<16x512xf32>
      %26 = arith.addf %23, %25 : vector<16x512xf32>
      %c0_21 = arith.constant 0 : index
      %c0_22 = arith.constant 0 : index
      %27 = vector.load %arg3[%c0_21, %c0_22] : memref<16x128xbf16, #tpu.memory_space<vmem>>, vector<16x128xbf16>
      %c0_23 = arith.constant 0 : index
      %c0_24 = arith.constant 0 : index
      %28 = vector.load %arg8[%c0_23, %c0_24] : memref<128x128xbf16, #tpu.memory_space<vmem>>, vector<128x128xbf16>
      %cst_25 = arith.constant dense<0.000000e+00> : vector<16x128xf32>
      %29 = tpu.matmul %27, %28, %cst_25 {dimension_numbers = #tpu.dot_dimension_numbers<[1], [0], [0], [1], [0, 0, 1, 1], [], []>} : vector<16x128xbf16>, vector<128x128xbf16>, vector<16x128xf32> -> vector<16x128xf32>
      %c0_26 = arith.constant 0 : index
      %c0_27 = arith.constant 0 : index
      %30 = vector.load %arg9[%c0_26, %c0_27] : memref<1x128xf32, #tpu.memory_space<vmem>>, vector<1x128xf32>
      %31 = vector.broadcast %30 : vector<1x128xf32> to vector<16x128xf32>
      %32 = arith.addf %29, %31 : vector<16x128xf32>
      %cst_28 = arith.constant 0.000000e+00 : f32
      %33 = vector.broadcast %cst_28 : f32 to vector<16x128xf32>
      %34 = arith.maximumf %32, %33 : vector<16x128xf32>
      %35 = arith.truncf %26 : vector<16x512xf32> to vector<16x512xbf16>
      %c0_29 = arith.constant 0 : index
      %c0_30 = arith.constant 0 : index
      %36 = vector.load %arg10[%c0_29, %c0_30] : memref<512x256xbf16, #tpu.memory_space<vmem>>, vector<512x256xbf16>
      %cst_31 = arith.constant dense<0.000000e+00> : vector<16x256xf32>
      %37 = tpu.matmul %35, %36, %cst_31 {dimension_numbers = #tpu.dot_dimension_numbers<[1], [0], [0], [1], [0, 0, 1, 1], [], []>} : vector<16x512xbf16>, vector<512x256xbf16>, vector<16x256xf32> -> vector<16x256xf32>
      %38 = arith.truncf %34 : vector<16x128xf32> to vector<16x128xbf16>
      %c0_32 = arith.constant 0 : index
      %c0_33 = arith.constant 0 : index
      %39 = vector.load %arg11[%c0_32, %c0_33] : memref<128x256xbf16, #tpu.memory_space<vmem>>, vector<128x256xbf16>
      %cst_34 = arith.constant dense<0.000000e+00> : vector<16x256xf32>
      %40 = tpu.matmul %38, %39, %cst_34 {dimension_numbers = #tpu.dot_dimension_numbers<[1], [0], [0], [1], [0, 0, 1, 1], [], []>} : vector<16x128xbf16>, vector<128x256xbf16>, vector<16x256xf32> -> vector<16x256xf32>
      %41 = arith.addf %37, %40 : vector<16x256xf32>
      %c0_35 = arith.constant 0 : index
      %c0_36 = arith.constant 0 : index
      %42 = vector.load %arg12[%c0_35, %c0_36] : memref<1x256xf32, #tpu.memory_space<vmem>>, vector<1x256xf32>
      %43 = vector.broadcast %42 : vector<1x256xf32> to vector<16x256xf32>
      %44 = arith.addf %41, %43 : vector<16x256xf32>
      %cst_37 = arith.constant 0.000000e+00 : f32
      %45 = vector.broadcast %cst_37 : f32 to vector<16x256xf32>
      %46 = arith.maximumf %44, %45 : vector<16x256xf32>
      %47 = arith.truncf %46 : vector<16x256xf32> to vector<16x256xbf16>
      %c0_38 = arith.constant 0 : index
      %c0_39 = arith.constant 0 : index
      %48 = vector.load %arg13[%c0_38, %c0_39] : memref<256x128xbf16, #tpu.memory_space<vmem>>, vector<256x128xbf16>
      %cst_40 = arith.constant dense<0.000000e+00> : vector<16x128xf32>
      %49 = tpu.matmul %47, %48, %cst_40 {dimension_numbers = #tpu.dot_dimension_numbers<[1], [0], [0], [1], [0, 0, 1, 1], [], []>} : vector<16x256xbf16>, vector<256x128xbf16>, vector<16x128xf32> -> vector<16x128xf32>
      %c0_41 = arith.constant 0 : index
      %c0_42 = arith.constant 0 : index
      %50 = vector.load %arg14[%c0_41, %c0_42] : memref<1x128xf32, #tpu.memory_space<vmem>>, vector<1x128xf32>
      %51 = vector.broadcast %50 : vector<1x128xf32> to vector<16x128xf32>
      %52 = arith.addf %49, %51 : vector<16x128xf32>
      %c0_43 = arith.constant 0 : index
      %c0_44 = arith.constant 0 : index
      %53 = vector.load %arg15[%c0_43, %c0_44] : memref<16x128xf32, #tpu.memory_space<vmem>>, vector<16x128xf32>
      tpu.vector_store %arg15[%c0_43, %c0_44], %52 {strides = array<i32>} : memref<16x128xf32, #tpu.memory_space<vmem>>, vector<16x128xf32>,
    } else {
    }
    return
  }
  func.func @transform_0(%arg0: i32, %arg1: i32) -> (i32, i32, i32) {
    %c0_i32 = arith.constant 0 : i32
    %c0_i32_0 = arith.constant 0 : i32
    return %arg0, %arg1, %c0_i32 : i32, i32, i32
  }
  func.func @transform_1(%arg0: i32, %arg1: i32) -> (i32, i32) {
    %c0_i32 = arith.constant 0 : i32
    %c0_i32_0 = arith.constant 0 : i32
    return %arg0, %c0_i32 : i32, i32
  }
  func.func @transform_2(%arg0: i32, %arg1: i32) -> (i32, i32) {
    %c0_i32 = arith.constant 0 : i32
    %c0_i32_0 = arith.constant 0 : i32
    %c0_i32_1 = arith.constant 0 : i32
    return %c0_i32, %c0_i32_0 : i32, i32
  }
  func.func @transform_3(%arg0: i32, %arg1: i32) -> (i32, i32) {
    %c0_i32 = arith.constant 0 : i32
    %c0_i32_0 = arith.constant 0 : i32
    %c0_i32_1 = arith.constant 0 : i32
    return %c0_i32, %c0_i32_0 : i32, i32
  }
  func.func @transform_4(%arg0: i32, %arg1: i32) -> (i32, i32) {
    %c0_i32 = arith.constant 0 : i32
    %c0_i32_0 = arith.constant 0 : i32
    %c0_i32_1 = arith.constant 0 : i32
    return %c0_i32, %c0_i32_0 : i32, i32
  }
  func.func @transform_5(%arg0: i32, %arg1: i32) -> (i32, i32) {
    %c0_i32 = arith.constant 0 : i32
    %c0_i32_0 = arith.constant 0 : i32
    %c0_i32_1 = arith.constant 0 : i32
    return %c0_i32, %c0_i32_0 : i32, i32
  }
  func.func @transform_6(%arg0: i32, %arg1: i32) -> (i32, i32) {
    %c0_i32 = arith.constant 0 : i32
    %c0_i32_0 = arith.constant 0 : i32
    %c0_i32_1 = arith.constant 0 : i32
    return %c0_i32, %c0_i32_0 : i32, i32
  }
  func.func @transform_7(%arg0: i32, %arg1: i32) -> (i32, i32) {
    %c0_i32 = arith.constant 0 : i32
    %c0_i32_0 = arith.constant 0 : i32
    %c0_i32_1 = arith.constant 0 : i32
    return %c0_i32, %c0_i32_0 : i32, i32
  }
  func.func @transform_8(%arg0: i32, %arg1: i32) -> (i32, i32) {
    %c0_i32 = arith.constant 0 : i32
    %c0_i32_0 = arith.constant 0 : i32
    %c0_i32_1 = arith.constant 0 : i32
    return %c0_i32, %c0_i32_0 : i32, i32
  }
  func.func @transform_9(%arg0: i32, %arg1: i32) -> (i32, i32) {
    %c0_i32 = arith.constant 0 : i32
    %c0_i32_0 = arith.constant 0 : i32
    %c0_i32_1 = arith.constant 0 : i32
    return %c0_i32, %c0_i32_0 : i32, i32
  }
  func.func @transform_10(%arg0: i32, %arg1: i32) -> (i32, i32) {
    %c0_i32 = arith.constant 0 : i32
    %c0_i32_0 = arith.constant 0 : i32
    %c0_i32_1 = arith.constant 0 : i32
    return %c0_i32, %c0_i32_0 : i32, i32
  }
  func.func @transform_11(%arg0: i32, %arg1: i32) -> (i32, i32) {
    %c0_i32 = arith.constant 0 : i32
    %c0_i32_0 = arith.constant 0 : i32
    %c0_i32_1 = arith.constant 0 : i32
    return %c0_i32, %c0_i32_0 : i32, i32
  }
  func.func @transform_12(%arg0: i32, %arg1: i32) -> (i32, i32) {
    %c0_i32 = arith.constant 0 : i32
    %c0_i32_0 = arith.constant 0 : i32
    %c0_i32_1 = arith.constant 0 : i32
    return %c0_i32, %c0_i32_0 : i32, i32
  }
  func.func @transform_13(%arg0: i32, %arg1: i32) -> (i32, i32) {
    %c0_i32 = arith.constant 0 : i32
    %c0_i32_0 = arith.constant 0 : i32
    return %arg0, %c0_i32 : i32, i32
  }
}

</mosaic_0001>

<bundles_post_ra>
// kernel: hybrid_model_forward.1
= control target key start
LH: loop header
LB: loop body
LE: loop exit
PB: predicated region body
PF: predicated region fallthrough
CT: control target
= control target key end

     0   :  { %s7223_s25 = smov 0   ;;  %s7225_s26 = smov 0   ;;  %s8594_s0 = inlined_call_operand.vmem [shape: bf16[16,256,32], index: 0, kind: input, shape index: {}]   ;;  %s8595_s1 = inlined_call_operand.vmem [shape: bf16[16,128], index: 1, kind: input, shape index: {}]   ;;  %s8596_s2 = inlined_call_operand.vmem [shape: bf16[32,128], index: 2, kind: input, shape index: {}]   ;;  %s8597_s3 = inlined_call_operand.vmem [shape: f32[1,128], index: 3, kind: input, shape index: {}]   ;;  %s8598_s4 = inlined_call_operand.vmem [shape: bf16[128,512], index: 4, kind: input, shape index: {}]   ;;  %s8599_s5 = inlined_call_operand.vmem [shape: f32[1,512], index: 5, kind: input, shape index: {}]   ;;  %s8600_s6 = inlined_call_operand.vmem [shape: bf16[128,128], index: 6, kind: input, shape index: {}]   ;;  %s8601_s7 = inlined_call_operand.vmem [shape: f32[1,128], index: 7, kind: input, shape index: {}]   ;;  %s8602_s8 = inlined_call_operand.vmem [shape: bf16[512,256], index: 8, kind: input, shape index: {}]   ;;  %s8603_s9 = inlined_call_operand.vmem [shape: bf16[128,256], index: 9, kind: input, shape index: {}]   ;;  %s8604_s10 = inlined_call_operand.vmem [shape: f32[1,256], index: 10, kind: input, shape index: {}]   ;;  %s8605_s11 = inlined_call_operand.vmem [shape: bf16[256,128], index: 11, kind: input, shape index: {}]   ;;  %s8606_s12 = inlined_call_operand.vmem [shape: f32[1,128], index: 12, kind: input, shape index: {}]   ;;  %s8607_s13 = inlined_call_operand.vmem [shape: f32[16,128], index: 13, kind: output, shape index: {}]  }
   0x1   :  { %s7227_s27 = smov 0   ;;  %s7229_s28 = smov 0  }
   0x2   :  { %s7231_s29 = smov 0  }
   0x3 LB: > { %s32_s30 = sadd.s32 1, %s7143_s28  ;;  %p51_p1 = scmp.ne.s32.totalorder %s7135_s26, %s7131_s25  ;;  %s7147_s29 = sphi %s7231_s29, %s23_s29   ;;  %s7143_s28 = sphi %s7229_s28, %s8611_s28   ;;  %s7139_s27 = sphi %s7227_s27, %s8610_s27   ;;  %s7135_s26 = sphi %s7225_s26, %s8609_s26   ;;  %s7131_s25 = sphi %s7223_s25, %s8608_s25  }
   0x4   : > { %p33_p0 = scmp.ge.s32.totalorder %s32_s30, 2  ;;  %p52_p2 = scmp.eq.s32.totalorder %s7147_s29, 0 }
   0x5   : > { %s44_s15 = sadd.s32 1, %s7135_s26  ;;  %p5884_p5 = scmp.ge.s32.totalorder %s7147_s29, 2 }
   0x6   : > { %s8613_s30 = smov (%p33_p0, %s32_s30), 0  ;;  %p53_p3 = por %p52_p2, %p51_p1 }
   0x7   : > { %s40_s14 = ssub.s32 %s7143_s28, %s8613_s30  ;;  %402 = sbr.rel (%p5884_p5) target bundleno = 80 (0x50), region = 64 }
   0x8   : > { %p42_p4 = scmp.eq.s32.totalorder %s40_s14, 0 }
   0xa   : > { %s7258_s16 = scalar_select %p42_p4, %s7135_s26, %s44_s15  }
   0xc   : > { %405 = sbr.rel (!%p53_p3) target bundleno = 80 (0x50), region = 68  ;;  %s407_s17 = sand.u32 (%p53_p3), 1, %s7135_s26  }
   0xd   : > { %s6294_s18 = sshll.u32 (%p53_p3), %s7143_s28, 6  ;;  %s5885_s19 = sshll.u32 (%p53_p3), %s407_s17, 10 }
   0xe   : > { %s7266_s22 = scalar_lea.vmem (%p53_p3), %s8594_s0, %s6294_s18  ;;  %s7271_s23 = scalar_lea.vmem (%p53_p3), [#allocation3], %s5885_s19 }
   0xf   : > { %v432_v0 = vld [vmem:[%s7266_s22] sm:$0xff] (%p53_p3)   ;;  %v436_v1 = vld [vmem:[%s7266_s22 + $0x8] sm:$0xff] (%p53_p3)   ;;  %v440_v2 = vld [vmem:[%s7266_s22 + $0x10] sm:$0xff] (%p53_p3)  }
  0x10   : > { %433 = vst [vmem:[%s7271_s23] sm:$0xff] (%p53_p3), %v432_v0   ;;  %437 = vst [vmem:[%s7271_s23 + $0x8] sm:$0xff] (%p53_p3), %v436_v1   ;;  %v444_v3 = vld [vmem:[%s7266_s22 + $0x18] sm:$0xff] (%p53_p3)   ;;  %v448_v4 = vld [vmem:[%s7266_s22 + $0x20] sm:$0xff] (%p53_p3)  }
  0x11   : > { %441 = vst [vmem:[%s7271_s23 + $0x10] sm:$0xff] %v440_v2   ;;  %v452_v5 = vld [vmem:[%s7266_s22 + $0x28] sm:$0xff]   ;;  %445 = vst [vmem:[%s7271_s23 + $0x18] sm:$0xff] %v444_v3   ;;  %v456_v6 = vld [vmem:[%s7266_s22 + $0x30] sm:$0xff]  }
  0x12   : > { %449 = vst [vmem:[%s7271_s23 + $0x20] sm:$0xff] %v448_v4   ;;  %453 = vst [vmem:[%s7271_s23 + $0x28] sm:$0xff] %v452_v5   ;;  %v460_v7 = vld [vmem:[%s7266_s22 + $0x38] sm:$0xff]   ;;  %v464_v8 = vld [vmem:[%s7266_s22 + $0x80] sm:$0xff]  }
  0x13   : > { %457 = vst [vmem:[%s7271_s23 + $0x30] sm:$0xff] %v456_v6   ;;  %461 = vst [vmem:[%s7271_s23 + $0x38] sm:$0xff] %v460_v7   ;;  %v468_v9 = vld [vmem:[%s7266_s22 + $0x88] sm:$0xff]   ;;  %v472_v10 = vld [vmem:[%s7266_s22 + $0x90] sm:$0xff]  }
  0x14   : > { %465 = vst [vmem:[%s7271_s23 + $0x40] sm:$0xff] %v464_v8   ;;  %v476_v11 = vld [vmem:[%s7266_s22 + $0x98] sm:$0xff]   ;;  %469 = vst [vmem:[%s7271_s23 + $0x48] sm:$0xff] %v468_v9   ;;  %v480_v12 = vld [vmem:[%s7266_s22 + $0xa0] sm:$0xff]  }
  0x15   : > { %473 = vst [vmem:[%s7271_s23 + $0x50] sm:$0xff] %v472_v10   ;;  %477 = vst [vmem:[%s7271_s23 + $0x58] sm:$0xff] %v476_v11   ;;  %v484_v13 = vld [vmem:[%s7266_s22 + $0xa8] sm:$0xff]   ;;  %v488_v14 = vld [vmem:[%s7266_s22 + $0xb0] sm:$0xff]  }
  0x16   : > { %481 = vst [vmem:[%s7271_s23 + $0x60] sm:$0xff] %v480_v12   ;;  %485 = vst [vmem:[%s7271_s23 + $0x68] sm:$0xff] %v484_v13   ;;  %v492_v15 = vld [vmem:[%s7266_s22 + $0xb8] sm:$0xff]   ;;  %v496_v16 = vld [vmem:[%s7266_s22 + $0x100] sm:$0xff]  }
  0x17   : > { %489 = vst [vmem:[%s7271_s23 + $0x70] sm:$0xff] %v488_v14   ;;  %v500_v17 = vld [vmem:[%s7266_s22 + $0x108] sm:$0xff]   ;;  %493 = vst [vmem:[%s7271_s23 + $0x78] sm:$0xff] %v492_v15   ;;  %v504_v18 = vld [vmem:[%s7266_s22 + $0x110] sm:$0xff]  }
  0x18   : > { %497 = vst [vmem:[%s7271_s23 + $0x80] sm:$0xff] %v496_v16   ;;  %501 = vst [vmem:[%s7271_s23 + $0x88] sm:$0xff] %v500_v17   ;;  %v508_v19 = vld [vmem:[%s7266_s22 + $0x118] sm:$0xff]   ;;  %v512_v20 = vld [vmem:[%s7266_s22 + $0x120] sm:$0xff]  }
  0x19   : > { %505 = vst [vmem:[%s7271_s23 + $0x90] sm:$0xff] %v504_v18   ;;  %509 = vst [vmem:[%s7271_s23 + $0x98] sm:$0xff] %v508_v19   ;;  %v516_v21 = vld [vmem:[%s7266_s22 + $0x128] sm:$0xff]   ;;  %v520_v22 = vld [vmem:[%s7266_s22 + $0x130] sm:$0xff]  }
  0x1a   : > { %513 = vst [vmem:[%s7271_s23 + $0xa0] sm:$0xff] %v512_v20   ;;  %v524_v23 = vld [vmem:[%s7266_s22 + $0x138] sm:$0xff]   ;;  %517 = vst [vmem:[%s7271_s23 + $0xa8] sm:$0xff] %v516_v21   ;;  %v528_v24 = vld [vmem:[%s7266_s22 + $0x180] sm:$0xff]  }
  0x1b   : > { %521 = vst [vmem:[%s7271_s23 + $0xb0] sm:$0xff] %v520_v22   ;;  %525 = vst [vmem:[%s7271_s23 + $0xb8] sm:$0xff] %v524_v23   ;;  %v532_v25 = vld [vmem:[%s7266_s22 + $0x188] sm:$0xff]   ;;  %v536_v26 = vld [vmem:[%s7266_s22 + $0x190] sm:$0xff]  }
  0x1c   : > { %529 = vst [vmem:[%s7271_s23 + $0xc0] sm:$0xff] %v528_v24   ;;  %533 = vst [vmem:[%s7271_s23 + $0xc8] sm:$0xff] %v532_v25   ;;  %v540_v27 = vld [vmem:[%s7266_s22 + $0x198] sm:$0xff]   ;;  %v544_v28 = vld [vmem:[%s7266_s22 + $0x1a0] sm:$0xff]  }
  0x1d   : > { %537 = vst [vmem:[%s7271_s23 + $0xd0] sm:$0xff] %v536_v26   ;;  %v548_v29 = vld [vmem:[%s7266_s22 + $0x1a8] sm:$0xff]   ;;  %541 = vst [vmem:[%s7271_s23 + $0xd8] sm:$0xff] %v540_v27   ;;  %v552_v30 = vld [vmem:[%s7266_s22 + $0x1b0] sm:$0xff]  }
  0x1e   : > { %545 = vst [vmem:[%s7271_s23 + $0xe0] sm:$0xff] %v544_v28   ;;  %549 = vst [vmem:[%s7271_s23 + $0xe8] sm:$0xff] %v548_v29   ;;  %v556_v31 = vld [vmem:[%s7266_s22 + $0x1b8] sm:$0xff]   ;;  %v560_v32 = vld [vmem:[%s7266_s22 + $0x200] sm:$0xff]  }
  0x1f   : > { %553 = vst [vmem:[%s7271_s23 + $0xf0] sm:$0xff] %v552_v30   ;;  %557 = vst [vmem:[%s7271_s23 + $0xf8] sm:$0xff] %v556_v31   ;;  %v564_v33 = vld [vmem:[%s7266_s22 + $0x208] sm:$0xff]   ;;  %v568_v34 = vld [vmem:[%s7266_s22 + $0x210] sm:$0xff]  }
  0x20   : > { %561 = vst [vmem:[%s7271_s23 + $0x100] sm:$0xff] %v560_v32   ;;  %v572_v35 = vld [vmem:[%s7266_s22 + $0x218] sm:$0xff]   ;;  %565 = vst [vmem:[%s7271_s23 + $0x108] sm:$0xff] %v564_v33   ;;  %v576_v36 = vld [vmem:[%s7266_s22 + $0x220] sm:$0xff]  }
  0x21   : > { %569 = vst [vmem:[%s7271_s23 + $0x110] sm:$0xff] %v568_v34   ;;  %573 = vst [vmem:[%s7271_s23 + $0x118] sm:$0xff] %v572_v35   ;;  %v580_v37 = vld [vmem:[%s7266_s22 + $0x228] sm:$0xff]   ;;  %v584_v38 = vld [vmem:[%s7266_s22 + $0x230] sm:$0xff]  }
  0x22   : > { %577 = vst [vmem:[%s7271_s23 + $0x120] sm:$0xff] %v576_v36   ;;  %581 = vst [vmem:[%s7271_s23 + $0x128] sm:$0xff] %v580_v37   ;;  %v588_v39 = vld [vmem:[%s7266_s22 + $0x238] sm:$0xff]   ;;  %v592_v40 = vld [vmem:[%s7266_s22 + $0x280] sm:$0xff]  }
  0x23   : > { %585 = vst [vmem:[%s7271_s23 + $0x130] sm:$0xff] %v584_v38   ;;  %v596_v41 = vld [vmem:[%s7266_s22 + $0x288] sm:$0xff]   ;;  %589 = vst [vmem:[%s7271_s23 + $0x138] sm:$0xff] %v588_v39   ;;  %v600_v42 = vld [vmem:[%s7266_s22 + $0x290] sm:$0xff]  }
  0x24   : > { %593 = vst [vmem:[%s7271_s23 + $0x140] sm:$0xff] %v592_v40   ;;  %597 = vst [vmem:[%s7271_s23 + $0x148] sm:$0xff] %v596_v41   ;;  %v604_v43 = vld [vmem:[%s7266_s22 + $0x298] sm:$0xff]   ;;  %v608_v44 = vld [vmem:[%s7266_s22 + $0x2a0] sm:$0xff]  }
  0x25   : > { %601 = vst [vmem:[%s7271_s23 + $0x150] sm:$0xff] %v600_v42   ;;  %605 = vst [vmem:[%s7271_s23 + $0x158] sm:$0xff] %v604_v43   ;;  %v612_v45 = vld [vmem:[%s7266_s22 + $0x2a8] sm:$0xff]   ;;  %v616_v46 = vld [vmem:[%s7266_s22 + $0x2b0] sm:$0xff]  }
  0x26   : > { %609 = vst [vmem:[%s7271_s23 + $0x160] sm:$0xff] %v608_v44   ;;  %v620_v47 = vld [vmem:[%s7266_s22 + $0x2b8] sm:$0xff]   ;;  %613 = vst [vmem:[%s7271_s23 + $0x168] sm:$0xff] %v612_v45   ;;  %v624_v48 = vld [vmem:[%s7266_s22 + $0x300] sm:$0xff]  }
  0x27   : > { %617 = vst [vmem:[%s7271_s23 + $0x170] sm:$0xff] %v616_v46   ;;  %621 = vst [vmem:[%s7271_s23 + $0x178] sm:$0xff] %v620_v47   ;;  %v628_v49 = vld [vmem:[%s7266_s22 + $0x308] sm:$0xff]   ;;  %v632_v50 = vld [vmem:[%s7266_s22 + $0x310] sm:$0xff]  }
  0x28   : > { %625 = vst [vmem:[%s7271_s23 + $0x180] sm:$0xff] %v624_v48   ;;  %629 = vst [vmem:[%s7271_s23 + $0x188] sm:$0xff] %v628_v49   ;;  %v636_v51 = vld [vmem:[%s7266_s22 + $0x318] sm:$0xff]   ;;  %v640_v52 = vld [vmem:[%s7266_s22 + $0x320] sm:$0xff]  }
  0x29   : > { %633 = vst [vmem:[%s7271_s23 + $0x190] sm:$0xff] %v632_v50   ;;  %v644_v53 = vld [vmem:[%s7266_s22 + $0x328] sm:$0xff]   ;;  %637 = vst [vmem:[%s7271_s23 + $0x198] sm:$0xff] %v636_v51   ;;  %v648_v54 = vld [vmem:[%s7266_s22 + $0x330] sm:$0xff]  }
  0x2a   : > { %641 = vst [vmem:[%s7271_s23 + $0x1a0] sm:$0xff] %v640_v52   ;;  %645 = vst [vmem:[%s7271_s23 + $0x1a8] sm:$0xff] %v644_v53   ;;  %v652_v55 = vld [vmem:[%s7266_s22 + $0x338] sm:$0xff]   ;;  %v656_v56 = vld [vmem:[%s7266_s22 + $0x380] sm:$0xff]  }
  0x2b   : > { %649 = vst [vmem:[%s7271_s23 + $0x1b0] sm:$0xff] %v648_v54   ;;  %653 = vst [vmem:[%s7271_s23 + $0x1b8] sm:$0xff] %v652_v55   ;;  %v660_v57 = vld [vmem:[%s7266_s22 + $0x388] sm:$0xff]   ;;  %v664_v58 = vld [vmem:[%s7266_s22 + $0x390] sm:$0xff]  }
  0x2c   : > { %657 = vst [vmem:[%s7271_s23 + $0x1c0] sm:$0xff] %v656_v56   ;;  %v668_v59 = vld [vmem:[%s7266_s22 + $0x398] sm:$0xff]   ;;  %661 = vst [vmem:[%s7271_s23 + $0x1c8] sm:$0xff] %v660_v57   ;;  %v672_v60 = vld [vmem:[%s7266_s22 + $0x3a0] sm:$0xff]  }
  0x2d   : > { %665 = vst [vmem:[%s7271_s23 + $0x1d0] sm:$0xff] %v664_v58   ;;  %669 = vst [vmem:[%s7271_s23 + $0x1d8] sm:$0xff] %v668_v59   ;;  %v676_v61 = vld [vmem:[%s7266_s22 + $0x3a8] sm:$0xff]   ;;  %v680_v62 = vld [vmem:[%s7266_s22 + $0x3b0] sm:$0xff]  }
  0x2e   : > { %673 = vst [vmem:[%s7271_s23 + $0x1e0] sm:$0xff] %v672_v60   ;;  %677 = vst [vmem:[%s7271_s23 + $0x1e8] sm:$0xff] %v676_v61   ;;  %v684_v63 = vld [vmem:[%s7266_s22 + $0x3b8] sm:$0xff]   ;;  %v688_v0 = vld [vmem:[%s7266_s22 + $0x400] sm:$0xff]  }
  0x2f   : > { %681 = vst [vmem:[%s7271_s23 + $0x1f0] sm:$0xff] %v680_v62   ;;  %v692_v1 = vld [vmem:[%s7266_s22 + $0x408] sm:$0xff]   ;;  %685 = vst [vmem:[%s7271_s23 + $0x1f8] sm:$0xff] %v684_v63   ;;  %v696_v2 = vld [vmem:[%s7266_s22 + $0x410] sm:$0xff]  }
  0x30   : > { %689 = vst [vmem:[%s7271_s23 + $0x200] sm:$0xff] %v688_v0   ;;  %693 = vst [vmem:[%s7271_s23 + $0x208] sm:$0xff] %v692_v1   ;;  %v700_v3 = vld [vmem:[%s7266_s22 + $0x418] sm:$0xff]   ;;  %v704_v4 = vld [vmem:[%s7266_s22 + $0x420] sm:$0xff]  }
  0x31   : > { %697 = vst [vmem:[%s7271_s23 + $0x210] sm:$0xff] %v696_v2   ;;  %701 = vst [vmem:[%s7271_s23 + $0x218] sm:$0xff] %v700_v3   ;;  %v708_v5 = vld [vmem:[%s7266_s22 + $0x428] sm:$0xff]   ;;  %v712_v6 = vld [vmem:[%s7266_s22 + $0x430] sm:$0xff]  }
  0x32   : > { %705 = vst [vmem:[%s7271_s23 + $0x220] sm:$0xff] %v704_v4   ;;  %v716_v7 = vld [vmem:[%s7266_s22 + $0x438] sm:$0xff]   ;;  %709 = vst [vmem:[%s7271_s23 + $0x228] sm:$0xff] %v708_v5   ;;  %v720_v8 = vld [vmem:[%s7266_s22 + $0x480] sm:$0xff]  }
  0x33   : > { %713 = vst [vmem:[%s7271_s23 + $0x230] sm:$0xff] %v712_v6   ;;  %717 = vst [vmem:[%s7271_s23 + $0x238] sm:$0xff] %v716_v7   ;;  %v724_v9 = vld [vmem:[%s7266_s22 + $0x488] sm:$0xff]   ;;  %v728_v10 = vld [vmem:[%s7266_s22 + $0x490] sm:$0xff]  }
  0x34   : > { %721 = vst [vmem:[%s7271_s23 + $0x240] sm:$0xff] %v720_v8   ;;  %725 = vst [vmem:[%s7271_s23 + $0x248] sm:$0xff] %v724_v9   ;;  %v732_v11 = vld [vmem:[%s7266_s22 + $0x498] sm:$0xff]   ;;  %v736_v12 = vld [vmem:[%s7266_s22 + $0x4a0] sm:$0xff]  }
  0x35   : > { %729 = vst [vmem:[%s7271_s23 + $0x250] sm:$0xff] %v728_v10   ;;  %v740_v13 = vld [vmem:[%s7266_s22 + $0x4a8] sm:$0xff]   ;;  %733 = vst [vmem:[%s7271_s23 + $0x258] sm:$0xff] %v732_v11   ;;  %v744_v14 = vld [vmem:[%s7266_s22 + $0x4b0] sm:$0xff]  }
  0x36   : > { %737 = vst [vmem:[%s7271_s23 + $0x260] sm:$0xff] %v736_v12   ;;  %741 = vst [vmem:[%s7271_s23 + $0x268] sm:$0xff] %v740_v13   ;;  %v748_v15 = vld [vmem:[%s7266_s22 + $0x4b8] sm:$0xff]   ;;  %v752_v16 = vld [vmem:[%s7266_s22 + $0x500] sm:$0xff]  }
  0x37   : > { %745 = vst [vmem:[%s7271_s23 + $0x270] sm:$0xff] %v744_v14   ;;  %749 = vst [vmem:[%s7271_s23 + $0x278] sm:$0xff] %v748_v15   ;;  %v756_v17 = vld [vmem:[%s7266_s22 + $0x508] sm:$0xff]   ;;  %v760_v18 = vld [vmem:[%s7266_s22 + $0x510] sm:$0xff]  }
  0x38   : > { %753 = vst [vmem:[%s7271_s23 + $0x280] sm:$0xff] %v752_v16   ;;  %v764_v19 = vld [vmem:[%s7266_s22 + $0x518] sm:$0xff]   ;;  %757 = vst [vmem:[%s7271_s23 + $0x288] sm:$0xff] %v756_v17   ;;  %v768_v20 = vld [vmem:[%s7266_s22 + $0x520] sm:$0xff]  }
  0x39   : > { %761 = vst [vmem:[%s7271_s23 + $0x290] sm:$0xff] %v760_v18   ;;  %765 = vst [vmem:[%s7271_s23 + $0x298] sm:$0xff] %v764_v19   ;;  %v772_v21 = vld [vmem:[%s7266_s22 + $0x528] sm:$0xff]   ;;  %v776_v22 = vld [vmem:[%s7266_s22 + $0x530] sm:$0xff]  }
  0x3a   : > { %769 = vst [vmem:[%s7271_s23 + $0x2a0] sm:$0xff] %v768_v20   ;;  %773 = vst [vmem:[%s7271_s23 + $0x2a8] sm:$0xff] %v772_v21   ;;  %v780_v23 = vld [vmem:[%s7266_s22 + $0x538] sm:$0xff]   ;;  %v784_v24 = vld [vmem:[%s7266_s22 + $0x580] sm:$0xff]  }
  0x3b   : > { %777 = vst [vmem:[%s7271_s23 + $0x2b0] sm:$0xff] %v776_v22   ;;  %v788_v25 = vld [vmem:[%s7266_s22 + $0x588] sm:$0xff]   ;;  %781 = vst [vmem:[%s7271_s23 + $0x2b8] sm:$0xff] %v780_v23   ;;  %v792_v26 = vld [vmem:[%s7266_s22 + $0x590] sm:$0xff]  }
  0x3c   : > { %785 = vst [vmem:[%s7271_s23 + $0x2c0] sm:$0xff] %v784_v24   ;;  %789 = vst [vmem:[%s7271_s23 + $0x2c8] sm:$0xff] %v788_v25   ;;  %v796_v27 = vld [vmem:[%s7266_s22 + $0x598] sm:$0xff]   ;;  %v800_v28 = vld [vmem:[%s7266_s22 + $0x5a0] sm:$0xff]  }
  0x3d   : > { %793 = vst [vmem:[%s7271_s23 + $0x2d0] sm:$0xff] %v792_v26   ;;  %797 = vst [vmem:[%s7271_s23 + $0x2d8] sm:$0xff] %v796_v27   ;;  %v804_v29 = vld [vmem:[%s7266_s22 + $0x5a8] sm:$0xff]   ;;  %v808_v30 = vld [vmem:[%s7266_s22 + $0x5b0] sm:$0xff]  }
  0x3e   : > { %801 = vst [vmem:[%s7271_s23 + $0x2e0] sm:$0xff] %v800_v28   ;;  %v812_v31 = vld [vmem:[%s7266_s22 + $0x5b8] sm:$0xff]   ;;  %805 = vst [vmem:[%s7271_s23 + $0x2e8] sm:$0xff] %v804_v29   ;;  %v816_v32 = vld [vmem:[%s7266_s22 + $0x600] sm:$0xff]  }
  0x3f   : > { %809 = vst [vmem:[%s7271_s23 + $0x2f0] sm:$0xff] %v808_v30   ;;  %813 = vst [vmem:[%s7271_s23 + $0x2f8] sm:$0xff] %v812_v31   ;;  %v820_v33 = vld [vmem:[%s7266_s22 + $0x608] sm:$0xff]   ;;  %v824_v34 = vld [vmem:[%s7266_s22 + $0x610] sm:$0xff]  }
  0x40   : > { %817 = vst [vmem:[%s7271_s23 + $0x300] sm:$0xff] %v816_v32   ;;  %821 = vst [vmem:[%s7271_s23 + $0x308] sm:$0xff] %v820_v33   ;;  %v828_v35 = vld [vmem:[%s7266_s22 + $0x618] sm:$0xff]   ;;  %v832_v36 = vld [vmem:[%s7266_s22 + $0x620] sm:$0xff]  }
  0x41   : > { %825 = vst [vmem:[%s7271_s23 + $0x310] sm:$0xff] %v824_v34   ;;  %v836_v37 = vld [vmem:[%s7266_s22 + $0x628] sm:$0xff]   ;;  %829 = vst [vmem:[%s7271_s23 + $0x318] sm:$0xff] %v828_v35   ;;  %v840_v38 = vld [vmem:[%s7266_s22 + $0x630] sm:$0xff]  }
  0x42   : > { %833 = vst [vmem:[%s7271_s23 + $0x320] sm:$0xff] %v832_v36   ;;  %837 = vst [vmem:[%s7271_s23 + $0x328] sm:$0xff] %v836_v37   ;;  %v844_v39 = vld [vmem:[%s7266_s22 + $0x638] sm:$0xff]   ;;  %v848_v40 = vld [vmem:[%s7266_s22 + $0x680] sm:$0xff]  }
  0x43   : > { %841 = vst [vmem:[%s7271_s23 + $0x330] sm:$0xff] %v840_v38   ;;  %845 = vst [vmem:[%s7271_s23 + $0x338] sm:$0xff] %v844_v39   ;;  %v852_v41 = vld [vmem:[%s7266_s22 + $0x688] sm:$0xff]   ;;  %v856_v42 = vld [vmem:[%s7266_s22 + $0x690] sm:$0xff]  }
  0x44   : > { %849 = vst [vmem:[%s7271_s23 + $0x340] sm:$0xff] %v848_v40   ;;  %v860_v43 = vld [vmem:[%s7266_s22 + $0x698] sm:$0xff]   ;;  %853 = vst [vmem:[%s7271_s23 + $0x348] sm:$0xff] %v852_v41   ;;  %v864_v44 = vld [vmem:[%s7266_s22 + $0x6a0] sm:$0xff]  }
  0x45   : > { %857 = vst [vmem:[%s7271_s23 + $0x350] sm:$0xff] %v856_v42   ;;  %861 = vst [vmem:[%s7271_s23 + $0x358] sm:$0xff] %v860_v43   ;;  %v868_v45 = vld [vmem:[%s7266_s22 + $0x6a8] sm:$0xff]   ;;  %v872_v46 = vld [vmem:[%s7266_s22 + $0x6b0] sm:$0xff]  }
  0x46   : > { %865 = vst [vmem:[%s7271_s23 + $0x360] sm:$0xff] %v864_v44   ;;  %869 = vst [vmem:[%s7271_s23 + $0x368] sm:$0xff] %v868_v45   ;;  %v876_v47 = vld [vmem:[%s7266_s22 + $0x6b8] sm:$0xff]   ;;  %v880_v48 = vld [vmem:[%s7266_s22 + $0x700] sm:$0xff]  }
  0x47   : > { %873 = vst [vmem:[%s7271_s23 + $0x370] sm:$0xff] %v872_v46   ;;  %v884_v49 = vld [vmem:[%s7266_s22 + $0x708] sm:$0xff]   ;;  %877 = vst [vmem:[%s7271_s23 + $0x378] sm:$0xff] %v876_v47   ;;  %v888_v50 = vld [vmem:[%s7266_s22 + $0x710] sm:$0xff]  }
  0x48   : > { %881 = vst [vmem:[%s7271_s23 + $0x380] sm:$0xff] %v880_v48   ;;  %885 = vst [vmem:[%s7271_s23 + $0x388] sm:$0xff] %v884_v49   ;;  %v892_v51 = vld [vmem:[%s7266_s22 + $0x718] sm:$0xff]   ;;  %v896_v52 = vld [vmem:[%s7266_s22 + $0x720] sm:$0xff]  }
  0x49   : > { %889 = vst [vmem:[%s7271_s23 + $0x390] sm:$0xff] %v888_v50   ;;  %893 = vst [vmem:[%s7271_s23 + $0x398] sm:$0xff] %v892_v51   ;;  %v900_v53 = vld [vmem:[%s7266_s22 + $0x728] sm:$0xff]   ;;  %v904_v54 = vld [vmem:[%s7266_s22 + $0x730] sm:$0xff]  }
  0x4a   : > { %897 = vst [vmem:[%s7271_s23 + $0x3a0] sm:$0xff] %v896_v52   ;;  %v908_v55 = vld [vmem:[%s7266_s22 + $0x738] sm:$0xff]   ;;  %901 = vst [vmem:[%s7271_s23 + $0x3a8] sm:$0xff] %v900_v53   ;;  %v912_v56 = vld [vmem:[%s7266_s22 + $0x780] sm:$0xff]  }
  0x4b   : > { %905 = vst [vmem:[%s7271_s23 + $0x3b0] sm:$0xff] %v904_v54   ;;  %909 = vst [vmem:[%s7271_s23 + $0x3b8] sm:$0xff] %v908_v55   ;;  %v916_v57 = vld [vmem:[%s7266_s22 + $0x788] sm:$0xff]   ;;  %v920_v58 = vld [vmem:[%s7266_s22 + $0x790] sm:$0xff]  }
  0x4c   : > { %913 = vst [vmem:[%s7271_s23 + $0x3c0] sm:$0xff] %v912_v56   ;;  %917 = vst [vmem:[%s7271_s23 + $0x3c8] sm:$0xff] %v916_v57   ;;  %v924_v59 = vld [vmem:[%s7266_s22 + $0x798] sm:$0xff]   ;;  %v928_v60 = vld [vmem:[%s7266_s22 + $0x7a0] sm:$0xff]  }
  0x4d   : > { %921 = vst [vmem:[%s7271_s23 + $0x3d0] sm:$0xff] %v920_v58   ;;  %v932_v61 = vld [vmem:[%s7266_s22 + $0x7a8] sm:$0xff]   ;;  %925 = vst [vmem:[%s7271_s23 + $0x3d8] sm:$0xff] %v924_v59   ;;  %v936_v62 = vld [vmem:[%s7266_s22 + $0x7b0] sm:$0xff]  }
  0x4e   : > { %929 = vst [vmem:[%s7271_s23 + $0x3e0] sm:$0xff] %v928_v60   ;;  %933 = vst [vmem:[%s7271_s23 + $0x3e8] sm:$0xff] %v932_v61   ;;  %v940_v63 = vld [vmem:[%s7266_s22 + $0x7b8] sm:$0xff]  }
  0x4f   : > { %937 = vst [vmem:[%s7271_s23 + $0x3f0] sm:$0xff] %v936_v62   ;;  %941 = vst [vmem:[%s7271_s23 + $0x3f8] sm:$0xff] %v940_v63  }
  0x50 PF: > { %p5888_p6 = scmp.ge.s32.totalorder %s7147_s29, 1  ;;  %p1478_p7 = scmp.lt.s32.totalorder %s7147_s29, 3 }
  0x52   : > { %p1479_p8 = pnand %p5888_p6, %p1478_p7 }
  0x53   : > { %s1485_s24 = sand.u32 (!%p1479_p8), 1, %s7131_s25   ;;  %p5890_p9 = scmp.ne.s32.totalorder (!%p1479_p8), %s7139_s27, 0 }
  0x54   : > { %1482 = sbr.rel (%p1479_p8) target bundleno = 1323 (0x52b), region = 109  ;;  %s5889_s14 = sshll.u32 (!%p1479_p8), %s1485_s24, 10 }
  0x55   : > { %s7529_s15 = scalar_lea.vmem (!%p1479_p8), [#allocation3], %s5889_s14 }
  0x59   : > { %1551 = sbr.rel (%p5890_p9) target bundleno = 96 (0x60), region = 117 }
  0x5e   : > { %v7149_v0 = vmov 0.0  }
  0x5f   : > { %1552 = vst [vmem:[#allocation2] sm:$0xff] %v7149_v0  ;;  %1553 = vst [vmem:[#allocation2 + $0x8] sm:$0xff] %v7149_v0 }
  0x60 PF: > { %v6784_v1 = vld [vmem:[%s8596_s2 + $0x8] sm:$0xff]   ;;  %v6785_v2 = vld [vmem:[%s8596_s2] sm:$0xff]   ;;  %v6786_v3 = vld [vmem:[%s7529_s15] sm:$0xff]   ;;  %vm2473_vm0 = vcmask 261120   ;;  %vm4525_vm1 = vcmask 1041409   ;;  %vm4527_vm2 = vcmask 1042434  }
  0x61   : > { %6456 = vmatprep.subr.bf16.mxu0 %v6784_v1  ;;  %6736 = vmatprep.subr.bf16.mxu1 %v6784_v1  ;;  %v6787_v4 = vld [vmem:[%s7529_s15 + $0x200] sm:$0xff]   ;;  %v6788_v5 = vld [vmem:[%s7529_s15 + $0x8] sm:$0xff]   ;;  %v6790_v7 = vld [vmem:[%s7529_s15 + $0x10] sm:$0xff]   ;;  %vm4529_vm3 = vcmask 1043459   ;;  %vm4531_vm4 = vcmask 1044484   ;;  %vm4533_vm5 = vcmask 1045509  }
  0x62   : > { %6457 = vmatpush3.bf16.msra.mxu0 %v6784_v1  ;;  %6738 = vmatpush3.bf16.msra.mxu1 %v6784_v1  ;;  %v6789_v6 = vld [vmem:[%s7529_s15 + $0x208] sm:$0xff]   ;;  %v6791_v8 = vld [vmem:[%s7529_s15 + $0x210] sm:$0xff]   ;;  %v6792_v9 = vld [vmem:[%s7529_s15 + $0x18] sm:$0xff]   ;;  %vm4535_vm6 = vcmask 1046534   ;;  %vm4537_vm7 = vcmask 1047559   ;;  %p6150_p10 = scmp.ne.s32.totalorder %s7139_s27, 1 }
  0x63   : > { %6458 = vmatprep.subr.bf16.mxu0 %v6785_v2  ;;  %6737 = vmatprep.subr.bf16.mxu1 %v6785_v2  ;;  %v6793_v10 = vld [vmem:[%s7529_s15 + $0x218] sm:$0xff]   ;;  %v6794_v11 = vld [vmem:[%s7529_s15 + $0x20] sm:$0xff]   ;;  %v6796_v13 = vld [vmem:[%s7529_s15 + $0x28] sm:$0xff]  }
  0x64   : > { %6460 = vmatprep.mubr.msk.bf16.mxu0 %vm2473_vm0, %v6786_v3  ;;  %6588 = vmatprep.mubr.msk.bf16.mxu1 %vm2473_vm0, %v6787_v4  ;;  %v6795_v12 = vld [vmem:[%s7529_s15 + $0x220] sm:$0xff]   ;;  %v6797_v14 = vld [vmem:[%s7529_s15 + $0x228] sm:$0xff]   ;;  %v6798_v15 = vld [vmem:[%s7529_s15 + $0x30] sm:$0xff]  }
  0x65   : > { %v6799_v16 = vld [vmem:[%s7529_s15 + $0x230] sm:$0xff]   ;;  %v6800_v17 = vld [vmem:[%s7529_s15 + $0x38] sm:$0xff]   ;;  %v6802_v19 = vld [vmem:[%s7529_s15 + $0x40] sm:$0xff]  }
  0x66   : > { %6459 = vmatpush3.bf16.msra.mxu0 %v6785_v2  ;;  %6739 = vmatpush3.bf16.msra.mxu1 %v6785_v2  ;;  %v6801_v18 = vld [vmem:[%s7529_s15 + $0x238] sm:$0xff]   ;;  %v6803_v20 = vld [vmem:[%s7529_s15 + $0x240] sm:$0xff]   ;;  %v6804_v21 = vld [vmem:[%s7529_s15 + $0x48] sm:$0xff]  }
  0x67   : > { %v6805_v22 = vld [vmem:[%s7529_s15 + $0x248] sm:$0xff]   ;;  %v6806_v23 = vld [vmem:[%s7529_s15 + $0x50] sm:$0xff]   ;;  %v6808_v25 = vld [vmem:[%s7529_s15 + $0x58] sm:$0xff]  }
  0x68   : > { %v6807_v24 = vld [vmem:[%s7529_s15 + $0x250] sm:$0xff]   ;;  %v6809_v26 = vld [vmem:[%s7529_s15 + $0x258] sm:$0xff]   ;;  %v6810_v27 = vld [vmem:[%s7529_s15 + $0x60] sm:$0xff]  }
  0x69   : > { %6461 = vmatmul.mubr.msk.bf16.vlgmr.msra.gmra.mxu0 %vm2473_vm0, %v6788_v5  ;;  %6589 = vmatmul.mubr.msk.bf16.vlgmr.msra.gmra.mxu1 %vm2473_vm0, %v6789_v6  ;;  %v6811_v28 = vld [vmem:[%s7529_s15 + $0x260] sm:$0xff]   ;;  %v6812_v29 = vld [vmem:[%s7529_s15 + $0x68] sm:$0xff]   ;;  %v6814_v31 = vld [vmem:[%s7529_s15 + $0x70] sm:$0xff]  }
  0x6a   : > { %6464 = vmatprep.mubr.msk.bf16.mxu0 %vm2473_vm0, %v6790_v7  ;;  %6592 = vmatprep.mubr.msk.bf16.mxu1 %vm2473_vm0, %v6791_v8  ;;  %v6813_v30 = vld [vmem:[%s7529_s15 + $0x268] sm:$0xff]   ;;  %v6815_v32 = vld [vmem:[%s7529_s15 + $0x270] sm:$0xff]   ;;  %v6816_v33 = vld [vmem:[%s7529_s15 + $0x78] sm:$0xff]  }
  0x6b   : > { %v6817_v34 = vld [vmem:[%s7529_s15 + $0x278] sm:$0xff]   ;;  %v6818_v35 = vld [vmem:[%s7529_s15 + $0x80] sm:$0xff]   ;;  %v6820_v37 = vld [vmem:[%s7529_s15 + $0x88] sm:$0xff]  }
  0x6c   : > { %v6819_v36 = vld [vmem:[%s7529_s15 + $0x280] sm:$0xff]   ;;  %v6821_v38 = vld [vmem:[%s7529_s15 + $0x288] sm:$0xff]   ;;  %v6822_v39 = vld [vmem:[%s7529_s15 + $0x90] sm:$0xff]  }
  0x6d   : > { %v6823_v40 = vld [vmem:[%s7529_s15 + $0x290] sm:$0xff]   ;;  %v6824_v41 = vld [vmem:[%s7529_s15 + $0x98] sm:$0xff]   ;;  %v6826_v43 = vld [vmem:[%s7529_s15 + $0xa0] sm:$0xff]  }
  0x6e   : > { %v6825_v42 = vld [vmem:[%s7529_s15 + $0x298] sm:$0xff]   ;;  %v6827_v44 = vld [vmem:[%s7529_s15 + $0x2a0] sm:$0xff]   ;;  %v6828_v45 = vld [vmem:[%s7529_s15 + $0xa8] sm:$0xff]  }
  0x6f   : > { %v6829_v46 = vld [vmem:[%s7529_s15 + $0x2a8] sm:$0xff]   ;;  %v6830_v47 = vld [vmem:[%s7529_s15 + $0xb0] sm:$0xff]   ;;  %v6832_v49 = vld [vmem:[%s7529_s15 + $0xb8] sm:$0xff]  }
  0x70   : > { %v6831_v48 = vld [vmem:[%s7529_s15 + $0x2b0] sm:$0xff]   ;;  %v6833_v50 = vld [vmem:[%s7529_s15 + $0x2b8] sm:$0xff]   ;;  %v6834_v51 = vld [vmem:[%s7529_s15 + $0xc0] sm:$0xff]  }
  0x71   : > { %6465 = vmatmul.mubr.msk.bf16.gmra.mxu0 %vm2473_vm0, %v6792_v9  ;;  %6593 = vmatmul.mubr.msk.bf16.gmra.mxu1 %vm2473_vm0, %v6793_v10  ;;  %v6835_v52 = vld [vmem:[%s7529_s15 + $0x2c0] sm:$0xff]   ;;  %v6836_v53 = vld [vmem:[%s7529_s15 + $0xc8] sm:$0xff]   ;;  %v6838_v55 = vld [vmem:[%s7529_s15 + $0xd0] sm:$0xff]  }
  0x72   : > { %6468 = vmatprep.mubr.msk.bf16.mxu0 %vm2473_vm0, %v6794_v11  ;;  %6596 = vmatprep.mubr.msk.bf16.mxu1 %vm2473_vm0, %v6795_v12  ;;  %v6837_v54 = vld [vmem:[%s7529_s15 + $0x2c8] sm:$0xff]   ;;  %v6839_v56 = vld [vmem:[%s7529_s15 + $0x2d0] sm:$0xff]   ;;  %v6840_v57 = vld [vmem:[%s7529_s15 + $0xd8] sm:$0xff]  }
  0x73   : > { %v6841_v58 = vld [vmem:[%s7529_s15 + $0x2d8] sm:$0xff]   ;;  %v6842_v59 = vld [vmem:[%s7529_s15 + $0xe0] sm:$0xff]   ;;  %v6844_v61 = vld [vmem:[%s7529_s15 + $0xe8] sm:$0xff]  }
  0x74   : > { %v6843_v60 = vld [vmem:[%s7529_s15 + $0x2e0] sm:$0xff]   ;;  %v6845_v62 = vld [vmem:[%s7529_s15 + $0x2e8] sm:$0xff]   ;;  %v6846_v63 = vld [vmem:[%s7529_s15 + $0xf0] sm:$0xff]  }
  0x75   : > { %v6847_v0 = vld [vmem:[%s7529_s15 + $0x2f0] sm:$0xff]   ;;  %v6848_v1 = vld [vmem:[%s7529_s15 + $0xf8] sm:$0xff]   ;;  %v6850_v3 = vld [vmem:[%s7529_s15 + $0x100] sm:$0xff]  }
  0x76   : > { %v6849_v2 = vld [vmem:[%s7529_s15 + $0x2f8] sm:$0xff]   ;;  %v6851_v4 = vld [vmem:[%s7529_s15 + $0x300] sm:$0xff]   ;;  %v6852_v5 = vld [vmem:[%s7529_s15 + $0x108] sm:$0xff]  }
  0x77   : > { %v6853_v6 = vld [vmem:[%s7529_s15 + $0x308] sm:$0xff]   ;;  %v6854_v7 = vld [vmem:[%s7529_s15 + $0x110] sm:$0xff]   ;;  %v6856_v9 = vld [vmem:[%s7529_s15 + $0x118] sm:$0xff]  }
  0x78   : > { %v6855_v8 = vld [vmem:[%s7529_s15 + $0x310] sm:$0xff]   ;;  %v6857_v10 = vld [vmem:[%s7529_s15 + $0x318] sm:$0xff]   ;;  %v6858_v11 = vld [vmem:[%s7529_s15 + $0x120] sm:$0xff]  }
  0x79   : > { %6469 = vmatmul.mubr.msk.bf16.gmra.mxu0 %vm2473_vm0, %v6796_v13  ;;  %6597 = vmatmul.mubr.msk.bf16.gmra.mxu1 %vm2473_vm0, %v6797_v14  ;;  %v6859_v12 = vld [vmem:[%s7529_s15 + $0x320] sm:$0xff]   ;;  %v6860_v13 = vld [vmem:[%s7529_s15 + $0x128] sm:$0xff]  }
  0x7a   : > { %6472 = vmatprep.mubr.msk.bf16.mxu0 %vm2473_vm0, %v6798_v15  ;;  %6600 = vmatprep.mubr.msk.bf16.mxu1 %vm2473_vm0, %v6799_v16  ;;  %v6861_v14 = vld [vmem:[%s7529_s15 + $0x328] sm:$0xff]   ;;  %v6862_v15 = vld [vmem:[%s7529_s15 + $0x130] sm:$0xff]  }
  0x7b   : > { %v6863_v16 = vld [vmem:[%s7529_s15 + $0x330] sm:$0xff]  }
  0x81   : > { %6473 = vmatmul.mubr.msk.bf16.gmra.mxu0 %vm2473_vm0, %v6800_v17  ;;  %6601 = vmatmul.mubr.msk.bf16.gmra.mxu1 %vm2473_vm0, %v6801_v18  ;;  %v6864_v17 = vld [vmem:[%s7529_s15 + $0x138] sm:$0xff]  }
  0x82   : > { %6476 = vmatprep.mubr.msk.bf16.mxu0 %vm2473_vm0, %v6802_v19  ;;  %6604 = vmatprep.mubr.msk.bf16.mxu1 %vm2473_vm0, %v6803_v20  ;;  %v6865_v18 = vld [vmem:[%s7529_s15 + $0x338] sm:$0xff]   ;;  %v6866_v19 = vld [vmem:[%s7529_s15 + $0x140] sm:$0xff]  }
  0x83   : > { %v6867_v20 = vld [vmem:[%s7529_s15 + $0x340] sm:$0xff]  }
  0x89   : > { %6477 = vmatmul.mubr.msk.bf16.gmra.mxu0 %vm2473_vm0, %v6804_v21  ;;  %6605 = vmatmul.mubr.msk.bf16.gmra.mxu1 %vm2473_vm0, %v6805_v22  ;;  %v6868_v21 = vld [vmem:[%s7529_s15 + $0x148] sm:$0xff]  }
  0x8a   : > { %6480 = vmatprep.mubr.msk.bf16.mxu0 %vm2473_vm0, %v6806_v23  ;;  %6608 = vmatprep.mubr.msk.bf16.mxu1 %vm2473_vm0, %v6807_v24  ;;  %v6869_v22 = vld [vmem:[%s7529_s15 + $0x348] sm:$0xff]   ;;  %v6870_v23 = vld [vmem:[%s7529_s15 + $0x150] sm:$0xff]  }
  0x8b   : > { %v6871_v24 = vld [vmem:[%s7529_s15 + $0x350] sm:$0xff]  }
  0x91   : > { %6481 = vmatmul.mubr.msk.bf16.gmra.mxu0 %vm2473_vm0, %v6808_v25  ;;  %6609 = vmatmul.mubr.msk.bf16.gmra.mxu1 %vm2473_vm0, %v6809_v26  ;;  %v6872_v25 = vld [vmem:[%s7529_s15 + $0x158] sm:$0xff]  }
  0x92   : > { %6484 = vmatprep.mubr.msk.bf16.mxu0 %vm2473_vm0, %v6810_v27  ;;  %6612 = vmatprep.mubr.msk.bf16.mxu1 %vm2473_vm0, %v6811_v28  ;;  %v6873_v26 = vld [vmem:[%s7529_s15 + $0x358] sm:$0xff]   ;;  %v6874_v27 = vld [vmem:[%s7529_s15 + $0x160] sm:$0xff]  }
  0x93   : > { %v6875_v28 = vld [vmem:[%s7529_s15 + $0x360] sm:$0xff]  }
  0x99   : > { %6485 = vmatmul.mubr.msk.bf16.gmra.mxu0 %vm2473_vm0, %v6812_v29  ;;  %6613 = vmatmul.mubr.msk.bf16.gmra.mxu1 %vm2473_vm0, %v6813_v30  ;;  %v6876_v29 = vld [vmem:[%s7529_s15 + $0x168] sm:$0xff]  }
  0x9a   : > { %6488 = vmatprep.mubr.msk.bf16.mxu0 %vm2473_vm0, %v6814_v31  ;;  %6616 = vmatprep.mubr.msk.bf16.mxu1 %vm2473_vm0, %v6815_v32  ;;  %v6877_v30 = vld [vmem:[%s7529_s15 + $0x368] sm:$0xff]   ;;  %v6878_v31 = vld [vmem:[%s7529_s15 + $0x170] sm:$0xff]  }
  0x9b   : > { %v6879_v32 = vld [vmem:[%s7529_s15 + $0x370] sm:$0xff]  }
  0xa1   : > { %6489 = vmatmul.mubr.msk.bf16.gmra.mxu0 %vm2473_vm0, %v6816_v33  ;;  %6617 = vmatmul.mubr.msk.bf16.gmra.mxu1 %vm2473_vm0, %v6817_v34  ;;  %v6880_v33 = vld [vmem:[%s7529_s15 + $0x178] sm:$0xff]  }
  0xa2   : > { %6492 = vmatprep.mubr.msk.bf16.mxu0 %vm2473_vm0, %v6818_v35  ;;  %6620 = vmatprep.mubr.msk.bf16.mxu1 %vm2473_vm0, %v6819_v36  ;;  %v6881_v34 = vld [vmem:[%s7529_s15 + $0x378] sm:$0xff]   ;;  %v6882_v35 = vld [vmem:[%s7529_s15 + $0x180] sm:$0xff]  }
  0xa3   : > { %v6883_v36 = vld [vmem:[%s7529_s15 + $0x380] sm:$0xff]  }
  0xa9   : > { %6493 = vmatmul.mubr.msk.bf16.gmra.mxu0 %vm2473_vm0, %v6820_v37  ;;  %6621 = vmatmul.mubr.msk.bf16.gmra.mxu1 %vm2473_vm0, %v6821_v38  ;;  %v6884_v37 = vld [vmem:[%s7529_s15 + $0x188] sm:$0xff]  }
  0xaa   : > { %6496 = vmatprep.mubr.msk.bf16.mxu0 %vm2473_vm0, %v6822_v39  ;;  %6624 = vmatprep.mubr.msk.bf16.mxu1 %vm2473_vm0, %v6823_v40  ;;  %v6885_v38 = vld [vmem:[%s7529_s15 + $0x388] sm:$0xff]   ;;  %v6886_v39 = vld [vmem:[%s7529_s15 + $0x190] sm:$0xff]  }
  0xab   : > { %v6887_v40 = vld [vmem:[%s7529_s15 + $0x390] sm:$0xff]  }
  0xb1   : > { %6497 = vmatmul.mubr.msk.bf16.gmra.mxu0 %vm2473_vm0, %v6824_v41  ;;  %6625 = vmatmul.mubr.msk.bf16.gmra.mxu1 %vm2473_vm0, %v6825_v42 }
  0xb2   : > { %6500 = vmatprep.mubr.msk.bf16.mxu0 %vm2473_vm0, %v6826_v43  ;;  %6628 = vmatprep.mubr.msk.bf16.mxu1 %vm2473_vm0, %v6827_v44 }
  0xb9   : > { %6501 = vmatmul.mubr.msk.bf16.gmra.mxu0 %vm2473_vm0, %v6828_v45  ;;  %6629 = vmatmul.mubr.msk.bf16.gmra.mxu1 %vm2473_vm0, %v6829_v46  ;;  %v7745_v45 = vld [vmem:[%s8597_s3] ss:$0 sm:$0xff] }
  0xba   : > { %6504 = vmatprep.mubr.msk.bf16.mxu0 %vm2473_vm0, %v6830_v47  ;;  %6632 = vmatprep.mubr.msk.bf16.mxu1 %vm2473_vm0, %v6831_v48 }
  0xc1   : > { %6505 = vmatmul.mubr.msk.bf16.gmra.mxu0 %vm2473_vm0, %v6832_v49  ;;  %6633 = vmatmul.mubr.msk.bf16.gmra.mxu1 %vm2473_vm0, %v6833_v50  ;;  %v6888_v50 = vld [vmem:[%s7529_s15 + $0x198] sm:$0xff]  }
  0xc2   : > { %6508 = vmatprep.mubr.msk.bf16.mxu0 %vm2473_vm0, %v6834_v51  ;;  %6636 = vmatprep.mubr.msk.bf16.mxu1 %vm2473_vm0, %v6835_v52  ;;  %v6889_v51 = vld [vmem:[%s7529_s15 + $0x398] sm:$0xff]   ;;  %v6890_v52 = vld [vmem:[%s7529_s15 + $0x1a0] sm:$0xff]  }
  0xc9   : > { %6509 = vmatmul.mubr.msk.bf16.gmra.mxu0 %vm2473_vm0, %v6836_v53  ;;  %6637 = vmatmul.mubr.msk.bf16.gmra.mxu1 %vm2473_vm0, %v6837_v54  ;;  %v6891_v53 = vld [vmem:[%s7529_s15 + $0x3a0] sm:$0xff]  }
  0xca   : > { %6512 = vmatprep.mubr.msk.bf16.mxu0 %vm2473_vm0, %v6838_v55  ;;  %6640 = vmatprep.mubr.msk.bf16.mxu1 %vm2473_vm0, %v6839_v56 }
  0xd1   : > { %6513 = vmatmul.mubr.msk.bf16.gmra.mxu0 %vm2473_vm0, %v6840_v57  ;;  %6641 = vmatmul.mubr.msk.bf16.gmra.mxu1 %vm2473_vm0, %v6841_v58 }
  0xd2   : > { %6516 = vmatprep.mubr.msk.bf16.mxu0 %vm2473_vm0, %v6842_v59  ;;  %6644 = vmatprep.mubr.msk.bf16.mxu1 %vm2473_vm0, %v6843_v60 }
  0xd9   : > { %6517 = vmatmul.mubr.msk.bf16.gmra.mxu0 %vm2473_vm0, %v6844_v61  ;;  %6645 = vmatmul.mubr.msk.bf16.gmra.mxu1 %vm2473_vm0, %v6845_v62 }
  0xda   : > { %6520 = vmatprep.mubr.msk.bf16.mxu0 %vm2473_vm0, %v6846_v63  ;;  %6648 = vmatprep.mubr.msk.bf16.mxu1 %vm2473_vm0, %v6847_v0 }
  0xe1   : > { %6521 = vmatmul.mubr.msk.bf16.gmra.mxu0 %vm2473_vm0, %v6848_v1  ;;  %6649 = vmatmul.mubr.msk.bf16.gmra.mxu1 %vm2473_vm0, %v6849_v2 }
  0xe2   : > { %6524 = vmatprep.mubr.msk.bf16.mxu0 %vm2473_vm0, %v6850_v3  ;;  %6652 = vmatprep.mubr.msk.bf16.mxu1 %vm2473_vm0, %v6851_v4 }
  0xe9   : > { %6525 = vmatmul.mubr.msk.bf16.gmra.mxu0 %vm2473_vm0, %v6852_v5  ;;  %6653 = vmatmul.mubr.msk.bf16.gmra.mxu1 %vm2473_vm0, %v6853_v6 }
  0xea   : > { %6528 = vmatprep.mubr.msk.bf16.mxu0 %vm2473_vm0, %v6854_v7  ;;  %6656 = vmatprep.mubr.msk.bf16.mxu1 %vm2473_vm0, %v6855_v8 }
  0xf1   : > { %6529 = vmatmul.mubr.msk.bf16.gmra.mxu0 %vm2473_vm0, %v6856_v9  ;;  %6657 = vmatmul.mubr.msk.bf16.gmra.mxu1 %vm2473_vm0, %v6857_v10 }
  0xf2   : > { %6532 = vmatprep.mubr.msk.bf16.mxu0 %vm2473_vm0, %v6858_v11  ;;  %6660 = vmatprep.mubr.msk.bf16.mxu1 %vm2473_vm0, %v6859_v12 }
  0xf9   : > { %6533 = vmatmul.mubr.msk.bf16.gmra.mxu0 %vm2473_vm0, %v6860_v13  ;;  %6661 = vmatmul.mubr.msk.bf16.gmra.mxu1 %vm2473_vm0, %v6861_v14  ;;  %v6892_v14 = vld [vmem:[%s7529_s15 + $0x1a8] sm:$0xff]  }
  0xfa   : > { %6536 = vmatprep.mubr.msk.bf16.mxu0 %vm2473_vm0, %v6862_v15  ;;  %6664 = vmatprep.mubr.msk.bf16.mxu1 %vm2473_vm0, %v6863_v16  ;;  %v6893_v15 = vld [vmem:[%s7529_s15 + $0x3a8] sm:$0xff]  }
 0x101   : > { %6537 = vmatmul.mubr.msk.bf16.gmra.mxu0 %vm2473_vm0, %v6864_v17  ;;  %6665 = vmatmul.mubr.msk.bf16.gmra.mxu1 %vm2473_vm0, %v6865_v18 }
 0x102   : > { %6540 = vmatprep.mubr.msk.bf16.mxu0 %vm2473_vm0, %v6866_v19  ;;  %6668 = vmatprep.mubr.msk.bf16.mxu1 %vm2473_vm0, %v6867_v20  ;;  %v6894_v20 = vld [vmem:[%s7529_s15 + $0x1b0] sm:$0xff]  }
 0x109   : > { %6541 = vmatmul.mubr.msk.bf16.gmra.mxu0 %vm2473_vm0, %v6868_v21  ;;  %6669 = vmatmul.mubr.msk.bf16.gmra.mxu1 %vm2473_vm0, %v6869_v22 }
 0x10a   : > { %6544 = vmatprep.mubr.msk.bf16.mxu0 %vm2473_vm0, %v6870_v23  ;;  %6672 = vmatprep.mubr.msk.bf16.mxu1 %vm2473_vm0, %v6871_v24 }
 0x111   : > { %6545 = vmatmul.mubr.msk.bf16.gmra.mxu0 %vm2473_vm0, %v6872_v25  ;;  %6673 = vmatmul.mubr.msk.bf16.gmra.mxu1 %vm2473_vm0, %v6873_v26  ;;  %v6895_v25 = vld [vmem:[%s7529_s15 + $0x3b0] sm:$0xff]  }
 0x112   : > { %6548 = vmatprep.mubr.msk.bf16.mxu0 %vm2473_vm0, %v6874_v27  ;;  %6676 = vmatprep.mubr.msk.bf16.mxu1 %vm2473_vm0, %v6875_v28 }
 0x119   : > { %6549 = vmatmul.mubr.msk.bf16.gmra.mxu0 %vm2473_vm0, %v6876_v29  ;;  %6677 = vmatmul.mubr.msk.bf16.gmra.mxu1 %vm2473_vm0, %v6877_v30 }
 0x11a   : > { %6552 = vmatprep.mubr.msk.bf16.mxu0 %vm2473_vm0, %v6878_v31  ;;  %6680 = vmatprep.mubr.msk.bf16.mxu1 %vm2473_vm0, %v6879_v32 }
 0x121   : > { %6553 = vmatmul.mubr.msk.bf16.gmra.mxu0 %vm2473_vm0, %v6880_v33  ;;  %6681 = vmatmul.mubr.msk.bf16.gmra.mxu1 %vm2473_vm0, %v6881_v34 }
 0x122   : > { %6556 = vmatprep.mubr.msk.bf16.mxu0 %vm2473_vm0, %v6882_v35  ;;  %6684 = vmatprep.mubr.msk.bf16.mxu1 %vm2473_vm0, %v6883_v36 }
 0x129   : > { %v6462_v41 = vpop.f32.mrf.mxu0  ;;  %6557 = vmatmul.mubr.msk.bf16.gmra.mxu0 %vm2473_vm0, %v6884_v37  ;;  %v6590_v42 = vpop.f32.mrf.mxu1  ;;  %6685 = vmatmul.mubr.msk.bf16.gmra.mxu1 %vm2473_vm0, %v6885_v38 }
 0x12a   : > { %6560 = vmatprep.mubr.msk.bf16.mxu0 %vm2473_vm0, %v6886_v39  ;;  %6688 = vmatprep.mubr.msk.bf16.mxu1 %vm2473_vm0, %v6887_v40  ;;  %v2901_v56 = vadd.f32 %v6462_v41, %v7745_v45  ;;  %v3413_v57 = vadd.f32 %v6590_v42, %v7745_v45 }
 0x12b   : > { %v2892_v43 = vpop.f32.mrf.mxu0  ;;  %v3404_v44 = vpop.f32.mrf.mxu1 }
 0x12c   : > { %v2893_v46 = vadd.f32 %v7745_v45, %v2892_v43  ;;  %v3405_v47 = vadd.f32 %v7745_v45, %v3404_v44  ;;  %v3917_v6 = vmax.f32 %v2901_v56, 0.0  ;;  %v4045_v7 = vmax.f32 %v3413_v57, 0.0 }
 0x12d   : > { %v6463_v48 = vpop.f32.mrf.mxu0  ;;  %v6591_v49 = vpop.f32.mrf.mxu1 }
 0x12e   : > { %v3915_v60 = vmax.f32 %v2893_v46, 0.0  ;;  %v4043_v61 = vmax.f32 %v3405_v47, 0.0  ;;  %v2904_v0 = vadd.f32 %v6463_v48, %v7745_v45  ;;  %v3416_v1 = vadd.f32 %v6591_v49, %v7745_v45 }
 0x12f   : > { %v2895_v54 = vpop.f32.mrf.mxu0  ;;  %v3407_v55 = vpop.f32.mrf.mxu1 }
 0x130   : > { %v2896_v58 = vadd.f32 %v7745_v45, %v2895_v54  ;;  %v3408_v59 = vadd.f32 %v7745_v45, %v3407_v55  ;;  %v3918_v16 = vmax.f32 %v2904_v0, 0.0  ;;  %v4046_v17 = vmax.f32 %v3416_v1, 0.0  ;;  %v6899_v54 = vld [vmem:[%s7529_s15 + $0x3c0] sm:$0xff]  }
 0x131   : > { %v6466_v62 = vpop.f32.mrf.mxu0  ;;  %6561 = vmatmul.mubr.msk.bf16.gmra.mxu0 %vm2473_vm0, %v6888_v50  ;;  %v6594_v63 = vpop.f32.mrf.mxu1  ;;  %6689 = vmatmul.mubr.msk.bf16.gmra.mxu1 %vm2473_vm0, %v6889_v51  ;;  %v6896_v51 = vld [vmem:[%s7529_s15 + $0x1b8] sm:$0xff]  }
 0x132   : > { %v3916_v2 = vmax.f32 %v2896_v58, 0.0  ;;  %v4044_v3 = vmax.f32 %v3408_v59, 0.0  ;;  %6564 = vmatprep.mubr.msk.bf16.mxu0 %vm2473_vm0, %v6890_v52  ;;  %6692 = vmatprep.mubr.msk.bf16.mxu1 %vm2473_vm0, %v6891_v53  ;;  %v2917_v21 = vadd.f32 %v6466_v62, %v7745_v45  ;;  %v3429_v22 = vadd.f32 %v6594_v63, %v7745_v45  ;;  %v6897_v52 = vld [vmem:[%s7529_s15 + $0x3b8] sm:$0xff]   ;;  %v6898_v53 = vld [vmem:[%s7529_s15 + $0x1c0] sm:$0xff]  }
 0x133   : > { %v2908_v4 = vpop.f32.mrf.mxu0  ;;  %v3420_v5 = vpop.f32.mrf.mxu1 }
 0x134   : > { %v4173_v8 = vadd.f32 %v3916_v2, %v3915_v60  ;;  %v4341_v9 = vadd.f32 %v4044_v3, %v4043_v61  ;;  %v2909_v10 = vadd.f32 %v7745_v45, %v2908_v4  ;;  %v3421_v11 = vadd.f32 %v7745_v45, %v3420_v5 }
 0x135   : > { %v6467_v12 = vpop.f32.mrf.mxu0  ;;  %v6595_v13 = vpop.f32.mrf.mxu1  ;;  %v3921_v42 = vmax.f32 %v2917_v21, 0.0  ;;  %v4049_v43 = vmax.f32 %v3429_v22, 0.0 }
 0x136   : > { %v4174_v18 = vadd.f32 %v4173_v8, %v3917_v6  ;;  %v4342_v19 = vadd.f32 %v4341_v9, %v4045_v7  ;;  %v3919_v26 = vmax.f32 %v2909_v10, 0.0  ;;  %v4047_v28 = vmax.f32 %v3421_v11, 0.0 }
 0x137   : > { %v2911_v23 = vpop.f32.mrf.mxu0  ;;  %v3423_v24 = vpop.f32.mrf.mxu1  ;;  %v2920_v36 = vadd.f32 %v6467_v12, %v7745_v45  ;;  %v3432_v37 = vadd.f32 %v6595_v13, %v7745_v45 }
 0x138   : > { %v4175_v27 = vadd.f32 %v4174_v18, %v3918_v16  ;;  %v4343_v29 = vadd.f32 %v4342_v19, %v4046_v17  ;;  %v2912_v30 = vadd.f32 %v7745_v45, %v2911_v23  ;;  %v3424_v31 = vadd.f32 %v7745_v45, %v3423_v24  ;;  %v6900_v23 = vld [vmem:[%s7529_s15 + $0x1c8] sm:$0xff]  }
 0x139   : > { %v6470_v32 = vpop.f32.mrf.mxu0  ;;  %6565 = vmatmul.mubr.msk.bf16.gmra.mxu0 %vm2473_vm0, %v6892_v14  ;;  %v6598_v33 = vpop.f32.mrf.mxu1  ;;  %6693 = vmatmul.mubr.msk.bf16.gmra.mxu1 %vm2473_vm0, %v6893_v15  ;;  %v3922_v55 = vmax.f32 %v2920_v36, 0.0  ;;  %v4050_v56 = vmax.f32 %v3432_v37, 0.0  ;;  %v6901_v24 = vld [vmem:[%s7529_s15 + $0x3c8] sm:$0xff]  }
 0x13a   : > { %v4176_v34 = vadd.f32 %v4175_v27, %v3919_v26  ;;  %v4344_v35 = vadd.f32 %v4343_v29, %v4047_v28  ;;  %6568 = vmatprep.mubr.msk.bf16.mxu0 %vm2473_vm0, %v6894_v20  ;;  %v3920_v38 = vmax.f32 %v2912_v30, 0.0  ;;  %v4048_v39 = vmax.f32 %v3424_v31, 0.0  ;;  %6696 = vmatprep.mubr.msk.bf16.mxu1 %vm2473_vm0, %v6895_v25  ;;  %v6902_v25 = vld [vmem:[%s7529_s15 + $0x1d0] sm:$0xff]  }
 0x13b   : > { %v2924_v40 = vpop.f32.mrf.mxu0  ;;  %v3436_v41 = vpop.f32.mrf.mxu1  ;;  %v2933_v61 = vadd.f32 %v6470_v32, %v7745_v45  ;;  %v3445_v62 = vadd.f32 %v6598_v33, %v7745_v45  ;;  %v6903_v26 = vld [vmem:[%s7529_s15 + $0x3d0] sm:$0xff]  }
 0x13c   : > { %v4177_v44 = vadd.f32 %v4176_v34, %v3920_v38  ;;  %v4345_v46 = vadd.f32 %v4344_v35, %v4048_v39  ;;  %v2925_v47 = vadd.f32 %v7745_v45, %v2924_v40  ;;  %v3437_v48 = vadd.f32 %v7745_v45, %v3436_v41 }
 0x13d   : > { %v6471_v49 = vpop.f32.mrf.mxu0  ;;  %v6599_v50 = vpop.f32.mrf.mxu1  ;;  %v3925_v15 = vmax.f32 %v2933_v61, 0.0  ;;  %v4053_v16 = vmax.f32 %v3445_v62, 0.0  ;;  %v6905_v61 = vld [vmem:[%s7529_s15 + $0x3d8] sm:$0xff]   ;;  %v6906_v62 = vld [vmem:[%s7529_s15 + $0x1e0] sm:$0xff]  }
 0x13e   : > { %v4178_v57 = vadd.f32 %v4177_v44, %v3921_v42  ;;  %v4346_v58 = vadd.f32 %v4345_v46, %v4049_v43  ;;  %v3923_v1 = vmax.f32 %v2925_v47, 0.0  ;;  %v4051_v3 = vmax.f32 %v3437_v48, 0.0 }
 0x13f   : > { %v2927_v59 = vpop.f32.mrf.mxu0  ;;  %v3439_v60 = vpop.f32.mrf.mxu1  ;;  %v2936_v11 = vadd.f32 %v6471_v49, %v7745_v45  ;;  %v3448_v12 = vadd.f32 %v6599_v50, %v7745_v45 }
 0x140   : > { %v2928_v63 = vadd.f32 %v7745_v45, %v2927_v59  ;;  %v3440_v0 = vadd.f32 %v7745_v45, %v3439_v60  ;;  %v4179_v2 = vadd.f32 %v4178_v57, %v3922_v55  ;;  %v4347_v4 = vadd.f32 %v4346_v58, %v4050_v56  ;;  %v6904_v60 = vld [vmem:[%s7529_s15 + $0x1d8] sm:$0xff]  }
 0x141   : > { %v6474_v5 = vpop.f32.mrf.mxu0  ;;  %6569 = vmatmul.mubr.msk.bf16.gmra.mxu0 %vm2473_vm0, %v6896_v51  ;;  %v6602_v6 = vpop.f32.mrf.mxu1  ;;  %6697 = vmatmul.mubr.msk.bf16.gmra.mxu1 %vm2473_vm0, %v6897_v52  ;;  %v3926_v27 = vmax.f32 %v2936_v11, 0.0  ;;  %v4054_v28 = vmax.f32 %v3448_v12, 0.0 }
 0x142   : > { %v3924_v7 = vmax.f32 %v2928_v63, 0.0  ;;  %v4052_v8 = vmax.f32 %v3440_v0, 0.0  ;;  %6572 = vmatprep.mubr.msk.bf16.mxu0 %vm2473_vm0, %v6898_v53  ;;  %6700 = vmatprep.mubr.msk.bf16.mxu1 %vm2473_vm0, %v6899_v54  ;;  %v4180_v9 = vadd.f32 %v4179_v2, %v3923_v1  ;;  %v4348_v10 = vadd.f32 %v4347_v4, %v4051_v3  ;;  %v6907_v63 = vld [vmem:[%s7529_s15 + $0x3e0] sm:$0xff]  }
 0x143   : > { %v2940_v13 = vpop.f32.mrf.mxu0  ;;  %v3452_v14 = vpop.f32.mrf.mxu1  ;;  %v2949_v33 = vadd.f32 %v6474_v5, %v7745_v45  ;;  %v3461_v34 = vadd.f32 %v6602_v6, %v7745_v45 }
 0x144   : > { %v4181_v17 = vadd.f32 %v4180_v9, %v3924_v7  ;;  %v4349_v18 = vadd.f32 %v4348_v10, %v4052_v8  ;;  %v2941_v19 = vadd.f32 %v7745_v45, %v2940_v13  ;;  %v3453_v20 = vadd.f32 %v7745_v45, %v3452_v14 }
 0x145   : > { %v6475_v21 = vpop.f32.mrf.mxu0  ;;  %v6603_v22 = vpop.f32.mrf.mxu1  ;;  %v3929_v52 = vmax.f32 %v2949_v33, 0.0  ;;  %v4057_v53 = vmax.f32 %v3461_v34, 0.0 }
 0x146   : > { %v4182_v29 = vadd.f32 %v4181_v17, %v3925_v15  ;;  %v4350_v30 = vadd.f32 %v4349_v18, %v4053_v16  ;;  %v3927_v37 = vmax.f32 %v2941_v19, 0.0  ;;  %v4055_v39 = vmax.f32 %v3453_v20, 0.0 }
 0x147   : > { %v2943_v31 = vpop.f32.mrf.mxu0  ;;  %v3455_v32 = vpop.f32.mrf.mxu1  ;;  %v2952_v48 = vadd.f32 %v6475_v21, %v7745_v45  ;;  %v3464_v49 = vadd.f32 %v6603_v22, %v7745_v45 }
 0x148   : > { %v2944_v35 = vadd.f32 %v7745_v45, %v2943_v31  ;;  %v3456_v36 = vadd.f32 %v7745_v45, %v3455_v32  ;;  %v4183_v38 = vadd.f32 %v4182_v29, %v3926_v27  ;;  %v4351_v40 = vadd.f32 %v4350_v30, %v4054_v28  ;;  %v6908_v30 = vld [vmem:[%s7529_s15 + $0x1e8] sm:$0xff]  }
 0x149   : > { %v6478_v41 = vpop.f32.mrf.mxu0  ;;  %6573 = vmatmul.mubr.msk.bf16.gmra.mxu0 %vm2473_vm0, %v6900_v23  ;;  %v6606_v42 = vpop.f32.mrf.mxu1  ;;  %6701 = vmatmul.mubr.msk.bf16.gmra.mxu1 %vm2473_vm0, %v6901_v24  ;;  %v3930_v0 = vmax.f32 %v2952_v48, 0.0  ;;  %v4058_v1 = vmax.f32 %v3464_v49, 0.0 }
 0x14a   : > { %v3928_v43 = vmax.f32 %v2944_v35, 0.0  ;;  %v4056_v44 = vmax.f32 %v3456_v36, 0.0  ;;  %6576 = vmatprep.mubr.msk.bf16.mxu0 %vm2473_vm0, %v6902_v25  ;;  %6704 = vmatprep.mubr.msk.bf16.mxu1 %vm2473_vm0, %v6903_v26  ;;  %v4184_v46 = vadd.f32 %v4183_v38, %v3927_v37  ;;  %v4352_v47 = vadd.f32 %v4351_v40, %v4055_v39  ;;  %v6909_v35 = vld [vmem:[%s7529_s15 + $0x3e8] sm:$0xff]   ;;  %v6910_v40 = vld [vmem:[%s7529_s15 + $0x1f0] sm:$0xff]  }
 0x14b   : > { %v2956_v50 = vpop.f32.mrf.mxu0  ;;  %v3468_v51 = vpop.f32.mrf.mxu1  ;;  %v2965_v6 = vadd.f32 %v6478_v41, %v7745_v45  ;;  %v3477_v7 = vadd.f32 %v6606_v42, %v7745_v45  ;;  %v6911_v41 = vld [vmem:[%s7529_s15 + $0x3f0] sm:$0xff]  }
 0x14c   : > { %v4185_v54 = vadd.f32 %v4184_v46, %v3928_v43  ;;  %v4353_v55 = vadd.f32 %v4352_v47, %v4056_v44  ;;  %v2957_v56 = vadd.f32 %v7745_v45, %v2956_v50  ;;  %v3469_v57 = vadd.f32 %v7745_v45, %v3468_v51 }
 0x14d   : > { %v6479_v58 = vpop.f32.mrf.mxu0  ;;  %v6607_v59 = vpop.f32.mrf.mxu1  ;;  %v3933_v22 = vmax.f32 %v2965_v6, 0.0  ;;  %v4061_v23 = vmax.f32 %v3477_v7, 0.0  ;;  %v6913_v6 = vld [vmem:[%s7529_s15 + $0x3f8] sm:$0xff]  }
 0x14e   : > { %v4186_v2 = vadd.f32 %v4185_v54, %v3929_v52  ;;  %v4354_v3 = vadd.f32 %v4353_v55, %v4057_v53  ;;  %v3931_v12 = vmax.f32 %v2957_v56, 0.0  ;;  %v4059_v13 = vmax.f32 %v3469_v57, 0.0 }
 0x14f   : > { %v2959_v4 = vpop.f32.mrf.mxu0  ;;  %v3471_v5 = vpop.f32.mrf.mxu1  ;;  %v2968_v16 = vadd.f32 %v6479_v58, %v7745_v45  ;;  %v3480_v17 = vadd.f32 %v6607_v59, %v7745_v45 }
 0x150   : > { %v2960_v8 = vadd.f32 %v7745_v45, %v2959_v4  ;;  %v3472_v9 = vadd.f32 %v7745_v45, %v3471_v5  ;;  %v7821_v10 = vadd.f32 %v4186_v2, %v3930_v0  ;;  %v7823_v11 = vadd.f32 %v4354_v3, %v4058_v1  ;;  %v6912_v3 = vld [vmem:[%s7529_s15 + $0x1f8] sm:$0xff]  }
 0x151   : > { %v6482_v14 = vpop.f32.mrf.mxu0  ;;  %6577 = vmatmul.mubr.msk.bf16.gmra.mxu0 %vm2473_vm0, %v6904_v60  ;;  %v6610_v15 = vpop.f32.mrf.mxu1  ;;  %6705 = vmatmul.mubr.msk.bf16.gmra.mxu1 %vm2473_vm0, %v6905_v61  ;;  %v3934_v31 = vmax.f32 %v2968_v16, 0.0  ;;  %v4062_v32 = vmax.f32 %v3480_v17, 0.0 }
 0x152   : > { %v3932_v18 = vmax.f32 %v2960_v8, 0.0  ;;  %v4060_v19 = vmax.f32 %v3472_v9, 0.0  ;;  %6580 = vmatprep.mubr.msk.bf16.mxu0 %vm2473_vm0, %v6906_v62  ;;  %6708 = vmatprep.mubr.msk.bf16.mxu1 %vm2473_vm0, %v6907_v63  ;;  %v2981_v36 = vadd.f32 %v6482_v14, %v7745_v45  ;;  %v3493_v37 = vadd.f32 %v6610_v15, %v7745_v45 }
 0x153   : > { %v2972_v20 = vpop.f32.mrf.mxu0  ;;  %v3484_v21 = vpop.f32.mrf.mxu1  ;;  %v4188_v4 = vrot.slane %v7821_v10, 4  ;;  %v4356_v5 = vrot.slane %v7823_v11, 4 }
 0x154   : > { %v4194_v24 = vadd.f32 %v3932_v18, %v3931_v12  ;;  %v4362_v25 = vadd.f32 %v4060_v19, %v4059_v13  ;;  %v2973_v26 = vadd.f32 %v7745_v45, %v2972_v20  ;;  %v3485_v27 = vadd.f32 %v7745_v45, %v3484_v21 }
 0x155   : > { %v6483_v28 = vpop.f32.mrf.mxu0  ;;  %v6611_v29 = vpop.f32.mrf.mxu1  ;;  %v3937_v59 = vmax.f32 %v2981_v36, 0.0  ;;  %v4065_v60 = vmax.f32 %v3493_v37, 0.0 }
 0x156   : > { %v4195_v33 = vadd.f32 %v4194_v24, %v3933_v22  ;;  %v4363_v34 = vadd.f32 %v4362_v25, %v4061_v23  ;;  %v3935_v42 = vmax.f32 %v2973_v26, 0.0  ;;  %v4063_v44 = vmax.f32 %v3485_v27, 0.0 }
 0x157   : > { %v2975_v38 = vpop.f32.mrf.mxu0  ;;  %v3487_v39 = vpop.f32.mrf.mxu1  ;;  %v2984_v53 = vadd.f32 %v6483_v28, %v7745_v45  ;;  %v3496_v54 = vadd.f32 %v6611_v29, %v7745_v45  ;;  %v4189_v25 = vadd.f32 %v4188_v4, %v7821_v10  ;;  %v4357_v26 = vadd.f32 %v4356_v5, %v7823_v11 }
 0x158   : > { %v4196_v43 = vadd.f32 %v4195_v33, %v3934_v31  ;;  %v4364_v46 = vadd.f32 %v4363_v34, %v4062_v32  ;;  %v2976_v47 = vadd.f32 %v7745_v45, %v2975_v38  ;;  %v3488_v48 = vadd.f32 %v7745_v45, %v3487_v39 }
 0x159   : > { %v6486_v49 = vpop.f32.mrf.mxu0  ;;  %6581 = vmatmul.mubr.msk.bf16.gmra.mxu0 %vm2473_vm0, %v6908_v30  ;;  %v6614_v50 = vpop.f32.mrf.mxu1  ;;  %6709 = vmatmul.mubr.msk.bf16.gmra.mxu1 %vm2473_vm0, %v6909_v35  ;;  %v3938_v7 = vmax.f32 %v2984_v53, 0.0  ;;  %v4066_v8 = vmax.f32 %v3496_v54, 0.0 }
 0x15a   : > { %v4197_v51 = vadd.f32 %v4196_v43, %v3935_v42  ;;  %v4365_v52 = vadd.f32 %v4364_v46, %v4063_v44  ;;  %v3936_v55 = vmax.f32 %v2976_v47, 0.0  ;;  %v4064_v56 = vmax.f32 %v3488_v48, 0.0  ;;  %6584 = vmatprep.mubr.msk.bf16.mxu0 %vm2473_vm0, %v6910_v40  ;;  %6712 = vmatprep.mubr.msk.bf16.mxu1 %vm2473_vm0, %v6911_v41 }
 0x15b   : > { %v2988_v57 = vpop.f32.mrf.mxu0  ;;  %v3500_v58 = vpop.f32.mrf.mxu1  ;;  %v2997_v15 = vadd.f32 %v6486_v49, %v7745_v45  ;;  %v3509_v16 = vadd.f32 %v6614_v50, %v7745_v45  ;;  %v4190_v41 = vrot.slane %v4189_v25, 2  ;;  %v4358_v42 = vrot.slane %v4357_v26, 2 }
 0x15c   : > { %v4198_v61 = vadd.f32 %v4197_v51, %v3936_v55  ;;  %v4366_v62 = vadd.f32 %v4365_v52, %v4064_v56  ;;  %v2989_v63 = vadd.f32 %v7745_v45, %v2988_v57  ;;  %v3501_v0 = vadd.f32 %v7745_v45, %v3500_v58 }
 0x15d   : > { %v6487_v1 = vpop.f32.mrf.mxu0  ;;  %v6615_v2 = vpop.f32.mrf.mxu1  ;;  %v3941_v35 = vmax.f32 %v2997_v15, 0.0  ;;  %v4069_v36 = vmax.f32 %v3509_v16, 0.0 }
 0x15e   : > { %v4199_v9 = vadd.f32 %v4198_v61, %v3937_v59  ;;  %v4367_v12 = vadd.f32 %v4366_v62, %v4065_v60  ;;  %v3939_v19 = vmax.f32 %v2989_v63, 0.0  ;;  %v4067_v21 = vmax.f32 %v3501_v0, 0.0 }
 0x15f   : > { %v2991_v13 = vpop.f32.mrf.mxu0  ;;  %v3503_v14 = vpop.f32.mrf.mxu1  ;;  %v3000_v31 = vadd.f32 %v6487_v1, %v7745_v45  ;;  %v3512_v32 = vadd.f32 %v6615_v2, %v7745_v45  ;;  %v4191_v60 = vadd.f32 %v4190_v41, %v4189_v25  ;;  %v4359_v61 = vadd.f32 %v4358_v42, %v4357_v26 }
 0x160   : > { %v2992_v17 = vadd.f32 %v7745_v45, %v2991_v13  ;;  %v3504_v18 = vadd.f32 %v7745_v45, %v3503_v14  ;;  %v4200_v20 = vadd.f32 %v4199_v9, %v3938_v7  ;;  %v4368_v22 = vadd.f32 %v4367_v12, %v4066_v8 }
 0x161   : > { %v6490_v23 = vpop.f32.mrf.mxu0  ;;  %6585 = vmatmul.mubr.msk.bf16.gmra.mxu0 %vm2473_vm0, %v6912_v3  ;;  %v6618_v24 = vpop.f32.mrf.mxu1  ;;  %6713 = vmatmul.mubr.msk.bf16.gmra.mxu1 %vm2473_vm0, %v6913_v6  ;;  %v3942_v43 = vmax.f32 %v3000_v31, 0.0  ;;  %v4070_v44 = vmax.f32 %v3512_v32, 0.0  ;;  %v4192_v16 = vrot.slane %v4191_v60, 1 }
 0x162   : > { %v3940_v27 = vmax.f32 %v2992_v17, 0.0  ;;  %v4068_v28 = vmax.f32 %v3504_v18, 0.0  ;;  %v4201_v29 = vadd.f32 %v4200_v20, %v3939_v19  ;;  %v4369_v30 = vadd.f32 %v4368_v22, %v4067_v21 }
 0x163   : > { %v3004_v33 = vpop.f32.mrf.mxu0  ;;  %v3516_v34 = vpop.f32.mrf.mxu1  ;;  %v3013_v50 = vadd.f32 %v6490_v23, %v7745_v45  ;;  %v3525_v51 = vadd.f32 %v6618_v24, %v7745_v45  ;;  %v4360_v17 = vrot.slane %v4359_v61, 1 }
 0x164   : > { %v4202_v37 = vadd.f32 %v4201_v29, %v3940_v27  ;;  %v4370_v38 = vadd.f32 %v4369_v30, %v4068_v28  ;;  %v3005_v10 = vadd.f32 %v7745_v45, %v3004_v33  ;;  %v3517_v11 = vadd.f32 %v7745_v45, %v3516_v34 }
 0x165   : > { %v6491_v39 = vpop.f32.mrf.mxu0  ;;  %v6619_v40 = vpop.f32.mrf.mxu1  ;;  %v3945_v6 = vmax.f32 %v3013_v50, 0.0  ;;  %v4073_v7 = vmax.f32 %v3525_v51, 0.0 }
 0x166   : > { %v4203_v46 = vadd.f32 %v4202_v37, %v3941_v35  ;;  %v4371_v47 = vadd.f32 %v4370_v38, %v4069_v36  ;;  %v3943_v54 = vmax.f32 %v3005_v10, 0.0  ;;  %v4071_v56 = vmax.f32 %v3517_v11, 0.0 }
 0x167   : > { %v3007_v48 = vpop.f32.mrf.mxu0  ;;  %v3519_v49 = vpop.f32.mrf.mxu1  ;;  %v3016_v2 = vadd.f32 %v6491_v39, %v7745_v45  ;;  %v3528_v3 = vadd.f32 %v6619_v40, %v7745_v45  ;;  %v4193_v38 = vadd.f32 %v4192_v16, %v4191_v60  ;;  %v4361_v10 = vadd.f32 %v4360_v17, %v4359_v61 }
 0x168   : > { %v3008_v52 = vadd.f32 %v7745_v45, %v3007_v48  ;;  %v3520_v53 = vadd.f32 %v7745_v45, %v3519_v49  ;;  %v4204_v55 = vadd.f32 %v4203_v46, %v3942_v43  ;;  %v4372_v57 = vadd.f32 %v4371_v47, %v4070_v44 }
 0x169   : > { %v6494_v58 = vpop.f32.mrf.mxu0  ;;  %v6622_v59 = vpop.f32.mrf.mxu1  ;;  %v3946_v18 = vmax.f32 %v3016_v2, 0.0  ;;  %v4074_v19 = vmax.f32 %v3528_v3, 0.0 }
 0x16a   : > { %v3944_v62 = vmax.f32 %v3008_v52, 0.0  ;;  %v4072_v63 = vmax.f32 %v3520_v53, 0.0  ;;  %v4205_v0 = vadd.f32 %v4204_v55, %v3943_v54  ;;  %v4373_v1 = vadd.f32 %v4372_v57, %v4071_v56 }
 0x16b   : > { %v3020_v4 = vpop.f32.mrf.mxu0  ;;  %v3532_v5 = vpop.f32.mrf.mxu1  ;;  %v3029_v24 = vadd.f32 %v6494_v58, %v7745_v45  ;;  %v3541_v25 = vadd.f32 %v6622_v59, %v7745_v45 }
 0x16c   : > { %v4206_v8 = vadd.f32 %v4205_v0, %v3944_v62  ;;  %v4374_v9 = vadd.f32 %v4373_v1, %v4072_v63  ;;  %v3021_v12 = vadd.f32 %v7745_v45, %v3020_v4  ;;  %v3533_v13 = vadd.f32 %v7745_v45, %v3532_v5 }
 0x16d   : > { %v6495_v14 = vpop.f32.mrf.mxu0  ;;  %v6623_v15 = vpop.f32.mrf.mxu1  ;;  %v3949_v42 = vmax.f32 %v3029_v24, 0.0  ;;  %v4077_v43 = vmax.f32 %v3541_v25, 0.0 }
 0x16e   : > { %v4207_v20 = vadd.f32 %v4206_v8, %v3945_v6  ;;  %v4375_v21 = vadd.f32 %v4374_v9, %v4073_v7  ;;  %v3947_v30 = vmax.f32 %v3021_v12, 0.0  ;;  %v4075_v31 = vmax.f32 %v3533_v13, 0.0 }
 0x16f   : > { %v3023_v22 = vpop.f32.mrf.mxu0  ;;  %v3535_v23 = vpop.f32.mrf.mxu1  ;;  %v3032_v34 = vadd.f32 %v6495_v14, %v7745_v45  ;;  %v3544_v35 = vadd.f32 %v6623_v15, %v7745_v45 }
 0x170   : > { %v3024_v26 = vadd.f32 %v7745_v45, %v3023_v22  ;;  %v3536_v27 = vadd.f32 %v7745_v45, %v3535_v23  ;;  %v4208_v28 = vadd.f32 %v4207_v20, %v3946_v18  ;;  %v4376_v29 = vadd.f32 %v4375_v21, %v4074_v19 }
 0x171   : > { %v6498_v32 = vpop.f32.mrf.mxu0  ;;  %v6626_v33 = vpop.f32.mrf.mxu1  ;;  %v3950_v53 = vmax.f32 %v3032_v34, 0.0  ;;  %v4078_v54 = vmax.f32 %v3544_v35, 0.0 }
 0x172   : > { %v3948_v36 = vmax.f32 %v3024_v26, 0.0  ;;  %v4076_v37 = vmax.f32 %v3536_v27, 0.0  ;;  %v4209_v11 = vrot.slane %v4208_v28, 4  ;;  %v4377_v39 = vrot.slane %v4376_v29, 4 }
 0x173   : > { %v3036_v40 = vpop.f32.mrf.mxu0  ;;  %v3548_v41 = vpop.f32.mrf.mxu1  ;;  %v3045_v59 = vadd.f32 %v6498_v32, %v7745_v45  ;;  %v3557_v60 = vadd.f32 %v6626_v33, %v7745_v45 }
 0x174   : > { %v4215_v44 = vadd.f32 %v3948_v36, %v3947_v30  ;;  %v4383_v46 = vadd.f32 %v4076_v37, %v4075_v31  ;;  %v4210_v47 = vadd.f32 %v4209_v11, %v4208_v28  ;;  %v4378_v48 = vadd.f32 %v4377_v39, %v4376_v29 }
 0x175   : > { %v3037_v49 = vadd.f32 %v7745_v45, %v3036_v40  ;;  %v3549_v50 = vadd.f32 %v7745_v45, %v3548_v41  ;;  %v6499_v51 = vpop.f32.mrf.mxu0  ;;  %v6627_v52 = vpop.f32.mrf.mxu1  ;;  %v3953_v21 = vmax.f32 %v3045_v59, 0.0  ;;  %v4081_v22 = vmax.f32 %v3557_v60, 0.0 }
 0x176   : > { %v4216_v55 = vadd.f32 %v4215_v44, %v3949_v42  ;;  %v4384_v56 = vadd.f32 %v4383_v46, %v4077_v43  ;;  %v4211_v57 = vrot.slane %v4210_v47, 2  ;;  %v4379_v58 = vrot.slane %v4378_v48, 2 }
 0x177   : > { %v3039_v61 = vpop.f32.mrf.mxu0  ;;  %v3551_v62 = vpop.f32.mrf.mxu1  ;;  %v3951_v63 = vmax.f32 %v3037_v49, 0.0  ;;  %v4079_v1 = vmax.f32 %v3549_v50, 0.0  ;;  %v3048_v13 = vadd.f32 %v6499_v51, %v7745_v45  ;;  %v3560_v14 = vadd.f32 %v6627_v52, %v7745_v45 }
 0x178   : > { %v4217_v0 = vadd.f32 %v4216_v55, %v3950_v53  ;;  %v4385_v2 = vadd.f32 %v4384_v56, %v4078_v54  ;;  %v4212_v3 = vadd.f32 %v4211_v57, %v4210_v47  ;;  %v4380_v4 = vadd.f32 %v4379_v58, %v4378_v48 }
 0x179   : > { %v3040_v5 = vadd.f32 %v7745_v45, %v3039_v61  ;;  %v3552_v6 = vadd.f32 %v7745_v45, %v3551_v62  ;;  %v6502_v7 = vpop.f32.mrf.mxu0  ;;  %v6630_v8 = vpop.f32.mrf.mxu1  ;;  %v3954_v31 = vmax.f32 %v3048_v13, 0.0  ;;  %v4082_v32 = vmax.f32 %v3560_v14, 0.0 }
 0x17a   : > { %v4218_v9 = vadd.f32 %v4217_v0, %v3951_v63  ;;  %v4386_v12 = vadd.f32 %v4385_v2, %v4079_v1  ;;  %v4213_v15 = vrot.slane %v4212_v3, 1  ;;  %v4381_v16 = vrot.slane %v4380_v4, 1 }
 0x17b   : > { %v3952_v17 = vmax.f32 %v3040_v5, 0.0  ;;  %v4080_v18 = vmax.f32 %v3552_v6, 0.0  ;;  %v3052_v19 = vpop.f32.mrf.mxu0  ;;  %v3564_v20 = vpop.f32.mrf.mxu1  ;;  %v3061_v39 = vadd.f32 %v6502_v7, %v7745_v45  ;;  %v3573_v40 = vadd.f32 %v6630_v8, %v7745_v45 }
 0x17c   : > { %v3053_v23 = vadd.f32 %v7745_v45, %v3052_v19  ;;  %v3565_v24 = vadd.f32 %v7745_v45, %v3564_v20  ;;  %v4214_v25 = vadd.f32 %v4213_v15, %v4212_v3  ;;  %v4382_v26 = vadd.f32 %v4381_v16, %v4380_v4 }
 0x17d   : > { %v4219_v27 = vadd.f32 %v4218_v9, %v3952_v17  ;;  %v4387_v28 = vadd.f32 %v4386_v12, %v4080_v18  ;;  %v6503_v29 = vpop.f32.mrf.mxu0  ;;  %v6631_v30 = vpop.f32.mrf.mxu1  ;;  %v3957_v56 = vmax.f32 %v3061_v39, 0.0  ;;  %v4085_v57 = vmax.f32 %v3573_v40, 0.0 }
 0x17e   : > { %v7890_v33 = vsel %vm4525_vm1, %v4214_v25, %v4193_v38  ;;  %v7893_v34 = vsel %vm4525_vm1, %v4382_v26, %v4361_v10  ;;  %v3955_v43 = vmax.f32 %v3053_v23, 0.0  ;;  %v4083_v46 = vmax.f32 %v3565_v24, 0.0 }
 0x17f   : > { %v4220_v35 = vadd.f32 %v4219_v27, %v3953_v21  ;;  %v4388_v36 = vadd.f32 %v4387_v28, %v4081_v22  ;;  %v3055_v37 = vpop.f32.mrf.mxu0  ;;  %v3567_v11 = vpop.f32.mrf.mxu1  ;;  %v3064_v52 = vadd.f32 %v6503_v29, %v7745_v45  ;;  %v3576_v53 = vadd.f32 %v6631_v30, %v7745_v45 }
 0x180   : > { %v3056_v41 = vadd.f32 %v7745_v45, %v3055_v37  ;;  %v3568_v42 = vadd.f32 %v7745_v45, %v3567_v11 }
 0x181   : > { %v4221_v44 = vadd.f32 %v4220_v35, %v3954_v31  ;;  %v4389_v38 = vadd.f32 %v4388_v36, %v4082_v32  ;;  %v6506_v47 = vpop.f32.mrf.mxu0  ;;  %v6634_v48 = vpop.f32.mrf.mxu1  ;;  %v3958_v0 = vmax.f32 %v3064_v52, 0.0  ;;  %v4086_v1 = vmax.f32 %v3576_v53, 0.0 }
 0x182   : > { %v3956_v10 = vmax.f32 %v3056_v41, 0.0  ;;  %v4084_v49 = vmax.f32 %v3568_v42, 0.0  ;;  %v3077_v6 = vadd.f32 %v6506_v47, %v7745_v45  ;;  %v3589_v7 = vadd.f32 %v6634_v48, %v7745_v45 }
 0x183   : > { %v4222_v50 = vadd.f32 %v4221_v44, %v3955_v43  ;;  %v4390_v51 = vadd.f32 %v4389_v38, %v4083_v46  ;;  %v3068_v54 = vpop.f32.mrf.mxu0  ;;  %v3580_v55 = vpop.f32.mrf.mxu1 }
 0x184   : > { %v3069_v60 = vadd.f32 %v7745_v45, %v3068_v54  ;;  %v3581_v61 = vadd.f32 %v7745_v45, %v3580_v55  ;;  %v3961_v26 = vmax.f32 %v3077_v6, 0.0  ;;  %v4089_v27 = vmax.f32 %v3589_v7, 0.0 }
 0x185   : > { %v4223_v58 = vadd.f32 %v4222_v50, %v3956_v10  ;;  %v4391_v59 = vadd.f32 %v4390_v51, %v4084_v49  ;;  %v6507_v62 = vpop.f32.mrf.mxu0  ;;  %v6635_v63 = vpop.f32.mrf.mxu1 }
 0x186   : > { %v3959_v12 = vmax.f32 %v3069_v60, 0.0  ;;  %v4087_v14 = vmax.f32 %v3581_v61, 0.0  ;;  %v3080_v22 = vadd.f32 %v6507_v62, %v7745_v45  ;;  %v3592_v23 = vadd.f32 %v6635_v63, %v7745_v45 }
 0x187   : > { %v4224_v2 = vadd.f32 %v4223_v58, %v3957_v56  ;;  %v4392_v3 = vadd.f32 %v4391_v59, %v4085_v57  ;;  %v3071_v4 = vpop.f32.mrf.mxu0  ;;  %v3583_v5 = vpop.f32.mrf.mxu1 }
 0x188   : > { %v3072_v8 = vadd.f32 %v7745_v45, %v3071_v4  ;;  %v3584_v9 = vadd.f32 %v7745_v45, %v3583_v5  ;;  %v3962_v36 = vmax.f32 %v3080_v22, 0.0  ;;  %v4090_v37 = vmax.f32 %v3592_v23, 0.0 }
 0x189   : > { %v4225_v13 = vadd.f32 %v4224_v2, %v3958_v0  ;;  %v4393_v15 = vadd.f32 %v4392_v3, %v4086_v1  ;;  %v6510_v16 = vpop.f32.mrf.mxu0  ;;  %v6638_v17 = vpop.f32.mrf.mxu1 }
 0x18a   : > { %v3960_v18 = vmax.f32 %v3072_v8, 0.0  ;;  %v4088_v19 = vmax.f32 %v3584_v9, 0.0  ;;  %v3093_v42 = vadd.f32 %v6510_v16, %v7745_v45  ;;  %v3605_v43 = vadd.f32 %v6638_v17, %v7745_v45 }
 0x18b   : > { %v4226_v20 = vadd.f32 %v4225_v13, %v3959_v12  ;;  %v4394_v21 = vadd.f32 %v4393_v15, %v4087_v14  ;;  %v3084_v24 = vpop.f32.mrf.mxu0  ;;  %v3596_v25 = vpop.f32.mrf.mxu1 }
 0x18c   : > { %v3085_v30 = vadd.f32 %v7745_v45, %v3084_v24  ;;  %v3597_v31 = vadd.f32 %v7745_v45, %v3596_v25  ;;  %v3965_v59 = vmax.f32 %v3093_v42, 0.0  ;;  %v4093_v60 = vmax.f32 %v3605_v43, 0.0 }
 0x18d   : > { %v4227_v28 = vadd.f32 %v4226_v20, %v3960_v18  ;;  %v4395_v29 = vadd.f32 %v4394_v21, %v4088_v19  ;;  %v6511_v32 = vpop.f32.mrf.mxu0  ;;  %v6639_v35 = vpop.f32.mrf.mxu1 }
 0x18e   : > { %v3963_v48 = vmax.f32 %v3085_v30, 0.0  ;;  %v4091_v10 = vmax.f32 %v3597_v31, 0.0  ;;  %v3096_v51 = vadd.f32 %v6511_v32, %v7745_v45  ;;  %v3608_v52 = vadd.f32 %v6639_v35, %v7745_v45 }
 0x18f   : > { %v4228_v11 = vadd.f32 %v4227_v28, %v3961_v26  ;;  %v4396_v39 = vadd.f32 %v4395_v29, %v4089_v27  ;;  %v3087_v40 = vpop.f32.mrf.mxu0  ;;  %v3599_v41 = vpop.f32.mrf.mxu1  ;;  %v7926_v29 = vld [vmem:[%s8597_s3] ss:$0 sm:$0xff] }
 0x190   : > { %v3088_v44 = vadd.f32 %v7745_v45, %v3087_v40  ;;  %v3600_v46 = vadd.f32 %v7745_v45, %v3599_v41  ;;  %v3966_v5 = vmax.f32 %v3096_v51, 0.0  ;;  %v4094_v6 = vmax.f32 %v3608_v52, 0.0 }
 0x191   : > { %v4229_v38 = vadd.f32 %v4228_v11, %v3962_v36  ;;  %v4397_v47 = vadd.f32 %v4396_v39, %v4090_v37  ;;  %v6514_v49 = vpop.f32.mrf.mxu0  ;;  %v6642_v50 = vpop.f32.mrf.mxu1 }
 0x192   : > { %v3964_v53 = vmax.f32 %v3088_v44, 0.0  ;;  %v4092_v54 = vmax.f32 %v3600_v46, 0.0  ;;  %v3109_v13 = vadd.f32 %v6514_v49, %v7745_v45  ;;  %v3621_v14 = vadd.f32 %v6642_v50, %v7745_v45 }
 0x193   : > { %v4230_v55 = vrot.slane %v4229_v38, 4  ;;  %v4398_v56 = vrot.slane %v4397_v47, 4  ;;  %v3100_v57 = vpop.f32.mrf.mxu0  ;;  %v3612_v58 = vpop.f32.mrf.mxu1 }
 0x194   : > { %v4236_v61 = vadd.f32 %v3964_v53, %v3963_v48  ;;  %v4404_v62 = vadd.f32 %v4092_v54, %v4091_v10  ;;  %v3101_v1 = vadd.f32 %v7745_v45, %v3100_v57  ;;  %v3613_v2 = vadd.f32 %v7745_v45, %v3612_v58 }
 0x195   : > { %v4231_v63 = vadd.f32 %v4230_v55, %v4229_v38  ;;  %v4399_v0 = vadd.f32 %v4398_v56, %v4397_v47  ;;  %v6515_v3 = vpop.f32.mrf.mxu0  ;;  %v6643_v4 = vpop.f32.mrf.mxu1  ;;  %v4097_v40 = vmax.f32 %v3621_v14, 0.0 }
 0x196   : > { %v4237_v7 = vadd.f32 %v4236_v61, %v3965_v59  ;;  %v4405_v8 = vadd.f32 %v4404_v62, %v4093_v60  ;;  %v3967_v17 = vmax.f32 %v3101_v1, 0.0  ;;  %v4095_v19 = vmax.f32 %v3613_v2, 0.0 }
 0x197   : > { %v4232_v9 = vrot.slane %v4231_v63, 2  ;;  %v4400_v12 = vrot.slane %v4399_v0, 2  ;;  %v3103_v15 = vpop.f32.mrf.mxu0  ;;  %v3615_v16 = vpop.f32.mrf.mxu1  ;;  %v3112_v30 = vadd.f32 %v7926_v29, %v6515_v3  ;;  %v3624_v31 = vadd.f32 %v7926_v29, %v6643_v4 }
 0x198   : > { %v4238_v18 = vadd.f32 %v4237_v7, %v3966_v5  ;;  %v4406_v20 = vadd.f32 %v4405_v8, %v4094_v6  ;;  %v3104_v23 = vadd.f32 %v7745_v45, %v3103_v15  ;;  %v3616_v24 = vadd.f32 %v7745_v45, %v3615_v16 }
 0x199   : > { %v4233_v21 = vadd.f32 %v4232_v9, %v4231_v63  ;;  %v4401_v22 = vadd.f32 %v4400_v12, %v4399_v0  ;;  %v6518_v25 = vpop.f32.mrf.mxu0  ;;  %v6646_v26 = vpop.f32.mrf.mxu1  ;;  %v3969_v45 = vmax.f32 %v3109_v13, 0.0  ;;  %v3970_v10 = vmax.f32 %v3112_v30, 0.0 }
 0x19a   : > { %v4239_v27 = vadd.f32 %v4238_v18, %v3967_v17  ;;  %v4407_v28 = vadd.f32 %v4406_v20, %v4095_v19  ;;  %v3968_v36 = vmax.f32 %v3104_v23, 0.0  ;;  %v4096_v37 = vmax.f32 %v3616_v24, 0.0 }
 0x19b   : > { %v4234_v32 = vrot.slane %v4233_v21, 1  ;;  %v4402_v35 = vrot.slane %v4401_v22, 1  ;;  %v3116_v11 = vpop.f32.mrf.mxu0  ;;  %v3628_v39 = vpop.f32.mrf.mxu1  ;;  %v4098_v49 = vmax.f32 %v3624_v31, 0.0  ;;  %v3125_v56 = vadd.f32 %v7926_v29, %v6518_v25 }
 0x19c   : > { %v3117_v41 = vadd.f32 %v7926_v29, %v3116_v11  ;;  %v3629_v42 = vadd.f32 %v7926_v29, %v3628_v39  ;;  %v4240_v46 = vadd.f32 %v4239_v27, %v3968_v36  ;;  %v4408_v38 = vadd.f32 %v4407_v28, %v4096_v37 }
 0x19d   : > { %v4235_v43 = vadd.f32 %v4234_v32, %v4233_v21  ;;  %v4403_v44 = vadd.f32 %v4402_v35, %v4401_v22  ;;  %v6519_v47 = vpop.f32.mrf.mxu0  ;;  %v6647_v48 = vpop.f32.mrf.mxu1  ;;  %v3637_v57 = vadd.f32 %v7926_v29, %v6646_v26  ;;  %v3973_v8 = vmax.f32 %v3125_v56, 0.0 }
 0x19e   : > { %v4241_v52 = vadd.f32 %v4240_v46, %v3969_v45  ;;  %v4409_v53 = vadd.f32 %v4408_v38, %v4097_v40  ;;  %v3971_v60 = vmax.f32 %v3117_v41, 0.0  ;;  %v3128_v4 = vadd.f32 %v7926_v29, %v6519_v47 }
 0x19f   : > { %v7934_v50 = vsel %vm4527_vm2, %v4235_v43, %v7890_v33  ;;  %v7938_v51 = vsel %vm4527_vm2, %v4403_v44, %v7893_v34  ;;  %v3119_v54 = vpop.f32.mrf.mxu0  ;;  %v3631_v55 = vpop.f32.mrf.mxu1  ;;  %v4099_v33 = vmax.f32 %v3629_v42, 0.0  ;;  %v3640_v5 = vadd.f32 %v7926_v29, %v6647_v48 }
 0x1a0   : > { %v3120_v58 = vadd.f32 %v7926_v29, %v3119_v54  ;;  %v3632_v59 = vadd.f32 %v7926_v29, %v3631_v55  ;;  %v4242_v61 = vadd.f32 %v4241_v52, %v3970_v10  ;;  %v4410_v62 = vadd.f32 %v4409_v53, %v4098_v49 }
 0x1a1   : > { %v6522_v63 = vpop.f32.mrf.mxu0  ;;  %v6650_v0 = vpop.f32.mrf.mxu1  ;;  %v4101_v9 = vmax.f32 %v3637_v57, 0.0  ;;  %v3974_v18 = vmax.f32 %v3128_v4, 0.0  ;;  %v4102_v19 = vmax.f32 %v3640_v5, 0.0 }
 0x1a2   : > { %v3972_v34 = vmax.f32 %v3120_v58, 0.0  ;;  %v4100_v1 = vmax.f32 %v3632_v59, 0.0  ;;  %v4243_v2 = vadd.f32 %v4242_v61, %v3971_v60  ;;  %v4411_v3 = vadd.f32 %v4410_v62, %v4099_v33 }
 0x1a3   : > { %v3132_v6 = vpop.f32.mrf.mxu0  ;;  %v3644_v7 = vpop.f32.mrf.mxu1  ;;  %v3141_v24 = vadd.f32 %v7926_v29, %v6522_v63  ;;  %v3653_v25 = vadd.f32 %v7926_v29, %v6650_v0 }
 0x1a4   : > { %v4244_v12 = vadd.f32 %v4243_v2, %v3972_v34  ;;  %v4412_v13 = vadd.f32 %v4411_v3, %v4100_v1  ;;  %v3133_v14 = vadd.f32 %v7926_v29, %v3132_v6  ;;  %v3645_v15 = vadd.f32 %v7926_v29, %v3644_v7 }
 0x1a5   : > { %v6523_v16 = vpop.f32.mrf.mxu0  ;;  %v6651_v17 = vpop.f32.mrf.mxu1  ;;  %v3977_v44 = vmax.f32 %v3141_v24, 0.0  ;;  %v4105_v46 = vmax.f32 %v3653_v25, 0.0 }
 0x1a6   : > { %v4245_v20 = vadd.f32 %v4244_v12, %v3973_v8  ;;  %v4413_v21 = vadd.f32 %v4412_v13, %v4101_v9  ;;  %v3975_v28 = vmax.f32 %v3133_v14, 0.0  ;;  %v4103_v31 = vmax.f32 %v3645_v15, 0.0 }
 0x1a7   : > { %v3135_v22 = vpop.f32.mrf.mxu0  ;;  %v3647_v23 = vpop.f32.mrf.mxu1  ;;  %v3144_v40 = vadd.f32 %v7926_v29, %v6523_v16  ;;  %v3656_v41 = vadd.f32 %v7926_v29, %v6651_v17 }
 0x1a8   : > { %v3136_v26 = vadd.f32 %v7926_v29, %v3135_v22  ;;  %v3648_v27 = vadd.f32 %v7926_v29, %v3647_v23  ;;  %v4246_v30 = vadd.f32 %v4245_v20, %v3974_v18  ;;  %v4414_v32 = vadd.f32 %v4413_v21, %v4102_v19 }
 0x1a9   : > { %v6526_v35 = vpop.f32.mrf.mxu0  ;;  %v6654_v36 = vpop.f32.mrf.mxu1  ;;  %v3978_v53 = vmax.f32 %v3144_v40, 0.0  ;;  %v4106_v54 = vmax.f32 %v3656_v41, 0.0 }
 0x1aa   : > { %v3976_v37 = vmax.f32 %v3136_v26, 0.0  ;;  %v4104_v11 = vmax.f32 %v3648_v27, 0.0  ;;  %v4247_v39 = vadd.f32 %v4246_v30, %v3975_v28  ;;  %v4415_v45 = vadd.f32 %v4414_v32, %v4103_v31 }
 0x1ab   : > { %v3148_v42 = vpop.f32.mrf.mxu0  ;;  %v3660_v43 = vpop.f32.mrf.mxu1  ;;  %v3157_v59 = vadd.f32 %v7926_v29, %v6526_v35  ;;  %v3669_v60 = vadd.f32 %v7926_v29, %v6654_v36 }
 0x1ac   : > { %v4248_v38 = vadd.f32 %v4247_v39, %v3976_v37  ;;  %v4416_v47 = vadd.f32 %v4415_v45, %v4104_v11  ;;  %v3149_v48 = vadd.f32 %v7926_v29, %v3148_v42  ;;  %v3661_v10 = vadd.f32 %v7926_v29, %v3660_v43 }
 0x1ad   : > { %v6527_v49 = vpop.f32.mrf.mxu0  ;;  %v6655_v52 = vpop.f32.mrf.mxu1  ;;  %v3981_v13 = vmax.f32 %v3157_v59, 0.0  ;;  %v4109_v14 = vmax.f32 %v3669_v60, 0.0 }
 0x1ae   : > { %v4249_v55 = vadd.f32 %v4248_v38, %v3977_v44  ;;  %v4417_v56 = vadd.f32 %v4416_v47, %v4105_v46  ;;  %v3979_v0 = vmax.f32 %v3149_v48, 0.0  ;;  %v4107_v34 = vmax.f32 %v3661_v10, 0.0 }
 0x1af   : > { %v3151_v57 = vpop.f32.mrf.mxu0  ;;  %v3663_v58 = vpop.f32.mrf.mxu1  ;;  %v3160_v3 = vadd.f32 %v7926_v29, %v6527_v49  ;;  %v3672_v4 = vadd.f32 %v7926_v29, %v6655_v52 }
 0x1b0   : > { %v3152_v61 = vadd.f32 %v7926_v29, %v3151_v57  ;;  %v3664_v33 = vadd.f32 %v7926_v29, %v3663_v58  ;;  %v4250_v62 = vadd.f32 %v4249_v55, %v3978_v53  ;;  %v4418_v63 = vadd.f32 %v4417_v56, %v4106_v54 }
 0x1b1   : > { %v6530_v1 = vpop.f32.mrf.mxu0  ;;  %v6658_v2 = vpop.f32.mrf.mxu1  ;;  %v3982_v23 = vmax.f32 %v3160_v3, 0.0  ;;  %v4110_v24 = vmax.f32 %v3672_v4, 0.0 }
 0x1b2   : > { %v3980_v5 = vmax.f32 %v3152_v61, 0.0  ;;  %v4108_v6 = vmax.f32 %v3664_v33, 0.0  ;;  %v4251_v7 = vrot.slane %v4250_v62, 4  ;;  %v4419_v8 = vrot.slane %v4418_v63, 4 }
 0x1b3   : > { %v3164_v9 = vpop.f32.mrf.mxu0  ;;  %v3676_v12 = vpop.f32.mrf.mxu1  ;;  %v3173_v30 = vadd.f32 %v7926_v29, %v6530_v1  ;;  %v3685_v31 = vadd.f32 %v7926_v29, %v6658_v2 }
 0x1b4   : > { %v4257_v15 = vadd.f32 %v3980_v5, %v3979_v0  ;;  %v4425_v16 = vadd.f32 %v4108_v6, %v4107_v34  ;;  %v4252_v17 = vadd.f32 %v4251_v7, %v4250_v62  ;;  %v4420_v18 = vadd.f32 %v4419_v8, %v4418_v63 }
 0x1b5   : > { %v3165_v19 = vadd.f32 %v7926_v29, %v3164_v9  ;;  %v3677_v20 = vadd.f32 %v7926_v29, %v3676_v12  ;;  %v6531_v21 = vpop.f32.mrf.mxu0  ;;  %v6659_v22 = vpop.f32.mrf.mxu1  ;;  %v3985_v56 = vmax.f32 %v3173_v30, 0.0  ;;  %v4113_v57 = vmax.f32 %v3685_v31, 0.0 }
 0x1b6   : > { %v4258_v25 = vadd.f32 %v4257_v15, %v3981_v13  ;;  %v4426_v26 = vadd.f32 %v4425_v16, %v4109_v14  ;;  %v4253_v27 = vrot.slane %v4252_v17, 2  ;;  %v4421_v28 = vrot.slane %v4420_v18, 2 }
 0x1b7   : > { %v3167_v32 = vpop.f32.mrf.mxu0  ;;  %v3679_v35 = vpop.f32.mrf.mxu1  ;;  %v3983_v36 = vmax.f32 %v3165_v19, 0.0  ;;  %v4111_v11 = vmax.f32 %v3677_v20, 0.0  ;;  %v3176_v47 = vadd.f32 %v7926_v29, %v6531_v21  ;;  %v3688_v48 = vadd.f32 %v7926_v29, %v6659_v22 }
 0x1b8   : > { %v4259_v37 = vadd.f32 %v4258_v25, %v3982_v23  ;;  %v4427_v39 = vadd.f32 %v4426_v26, %v4110_v24  ;;  %v4254_v45 = vadd.f32 %v4253_v27, %v4252_v17  ;;  %v4422_v40 = vadd.f32 %v4421_v28, %v4420_v18 }
 0x1b9   : > { %v3168_v41 = vadd.f32 %v7926_v29, %v3167_v32  ;;  %v3680_v42 = vadd.f32 %v7926_v29, %v3679_v35  ;;  %v6534_v43 = vpop.f32.mrf.mxu0  ;;  %v6662_v44 = vpop.f32.mrf.mxu1  ;;  %v3986_v34 = vmax.f32 %v3176_v47, 0.0  ;;  %v4114_v1 = vmax.f32 %v3688_v48, 0.0 }
 0x1ba   : > { %v4260_v46 = vadd.f32 %v4259_v37, %v3983_v36  ;;  %v4428_v38 = vadd.f32 %v4427_v39, %v4111_v11  ;;  %v4255_v10 = vrot.slane %v4254_v45, 1  ;;  %v4423_v49 = vrot.slane %v4422_v40, 1 }
 0x1bb   : > { %v3984_v52 = vmax.f32 %v3168_v41, 0.0  ;;  %v4112_v53 = vmax.f32 %v3680_v42, 0.0  ;;  %v3180_v54 = vpop.f32.mrf.mxu0  ;;  %v3692_v55 = vpop.f32.mrf.mxu1  ;;  %v3189_v8 = vadd.f32 %v7926_v29, %v6534_v43  ;;  %v3701_v9 = vadd.f32 %v7926_v29, %v6662_v44 }
 0x1bc   : > { %v3181_v58 = vadd.f32 %v7926_v29, %v3180_v54  ;;  %v3693_v59 = vadd.f32 %v7926_v29, %v3692_v55  ;;  %v4256_v60 = vadd.f32 %v4255_v10, %v4254_v45  ;;  %v4424_v61 = vadd.f32 %v4423_v49, %v4422_v40 }
 0x1bd   : > { %v4261_v33 = vadd.f32 %v4260_v46, %v3984_v52  ;;  %v4429_v62 = vadd.f32 %v4428_v38, %v4112_v53  ;;  %v6535_v63 = vpop.f32.mrf.mxu0  ;;  %v6663_v0 = vpop.f32.mrf.mxu1  ;;  %v3989_v26 = vmax.f32 %v3189_v8, 0.0  ;;  %v4117_v27 = vmax.f32 %v3701_v9, 0.0 }
 0x1be   : > { %v7974_v2 = vsel %vm4529_vm3, %v4256_v60, %v7934_v50  ;;  %v7978_v3 = vsel %vm4529_vm3, %v4424_v61, %v7938_v51  ;;  %v3987_v14 = vmax.f32 %v3181_v58, 0.0  ;;  %v4115_v50 = vmax.f32 %v3693_v59, 0.0 }
 0x1bf   : > { %v4262_v4 = vadd.f32 %v4261_v33, %v3985_v56  ;;  %v4430_v5 = vadd.f32 %v4429_v62, %v4113_v57  ;;  %v3183_v6 = vpop.f32.mrf.mxu0  ;;  %v3695_v7 = vpop.f32.mrf.mxu1  ;;  %v3192_v22 = vadd.f32 %v7926_v29, %v6535_v63  ;;  %v3704_v23 = vadd.f32 %v7926_v29, %v6663_v0 }
 0x1c0   : > { %v3184_v12 = vadd.f32 %v7926_v29, %v3183_v6  ;;  %v3696_v13 = vadd.f32 %v7926_v29, %v3695_v7 }
 0x1c1   : > { %v4263_v15 = vadd.f32 %v4262_v4, %v3986_v34  ;;  %v4431_v16 = vadd.f32 %v4430_v5, %v4114_v1  ;;  %v6538_v17 = vpop.f32.mrf.mxu0  ;;  %v6666_v18 = vpop.f32.mrf.mxu1  ;;  %v3990_v37 = vmax.f32 %v3192_v22, 0.0  ;;  %v4118_v11 = vmax.f32 %v3704_v23, 0.0 }
 0x1c2   : > { %v3988_v51 = vmax.f32 %v3184_v12, 0.0  ;;  %v4116_v19 = vmax.f32 %v3696_v13, 0.0  ;;  %v3205_v42 = vadd.f32 %v7926_v29, %v6538_v17  ;;  %v3717_v43 = vadd.f32 %v7926_v29, %v6666_v18 }
 0x1c3   : > { %v4264_v20 = vadd.f32 %v4263_v15, %v3987_v14  ;;  %v4432_v21 = vadd.f32 %v4431_v16, %v4115_v50  ;;  %v3196_v24 = vpop.f32.mrf.mxu0  ;;  %v3708_v25 = vpop.f32.mrf.mxu1 }
 0x1c4   : > { %v3197_v31 = vadd.f32 %v7926_v29, %v3196_v24  ;;  %v3709_v32 = vadd.f32 %v7926_v29, %v3708_v25  ;;  %v3993_v61 = vmax.f32 %v3205_v42, 0.0  ;;  %v4121_v33 = vmax.f32 %v3717_v43, 0.0 }
 0x1c5   : > { %v4265_v28 = vadd.f32 %v4264_v20, %v3988_v51  ;;  %v4433_v30 = vadd.f32 %v4432_v21, %v4116_v19  ;;  %v6539_v35 = vpop.f32.mrf.mxu0  ;;  %v6667_v36 = vpop.f32.mrf.mxu1 }
 0x1c6   : > { %v3991_v38 = vmax.f32 %v3197_v31, 0.0  ;;  %v4119_v48 = vmax.f32 %v3709_v32, 0.0  ;;  %v3208_v57 = vadd.f32 %v7926_v29, %v6539_v35  ;;  %v3720_v58 = vadd.f32 %v7926_v29, %v6667_v36 }
 0x1c7   : > { %v4266_v39 = vadd.f32 %v4265_v28, %v3989_v26  ;;  %v4434_v45 = vadd.f32 %v4433_v30, %v4117_v27  ;;  %v3199_v40 = vpop.f32.mrf.mxu0  ;;  %v3711_v41 = vpop.f32.mrf.mxu1 }
 0x1c8   : > { %v3200_v44 = vadd.f32 %v7926_v29, %v3199_v40  ;;  %v3712_v46 = vadd.f32 %v7926_v29, %v3711_v41  ;;  %v3994_v5 = vmax.f32 %v3208_v57, 0.0  ;;  %v4122_v6 = vmax.f32 %v3720_v58, 0.0 }
 0x1c9   : > { %v4267_v47 = vadd.f32 %v4266_v39, %v3990_v37  ;;  %v4435_v10 = vadd.f32 %v4434_v45, %v4118_v11  ;;  %v6542_v49 = vpop.f32.mrf.mxu0  ;;  %v6670_v52 = vpop.f32.mrf.mxu1 }
 0x1ca   : > { %v3992_v53 = vmax.f32 %v3200_v44, 0.0  ;;  %v4120_v54 = vmax.f32 %v3712_v46, 0.0  ;;  %v3221_v13 = vadd.f32 %v7926_v29, %v6542_v49  ;;  %v3733_v14 = vadd.f32 %v7926_v29, %v6670_v52 }
 0x1cb   : > { %v4268_v55 = vadd.f32 %v4267_v47, %v3991_v38  ;;  %v4436_v56 = vadd.f32 %v4435_v10, %v4119_v48  ;;  %v3212_v59 = vpop.f32.mrf.mxu0  ;;  %v3724_v60 = vpop.f32.mrf.mxu1 }
 0x1cc   : > { %v3213_v0 = vadd.f32 %v7926_v29, %v3212_v59  ;;  %v3725_v34 = vadd.f32 %v7926_v29, %v3724_v60  ;;  %v3997_v30 = vmax.f32 %v3221_v13, 0.0  ;;  %v4125_v31 = vmax.f32 %v3733_v14, 0.0 }
 0x1cd   : > { %v4269_v62 = vadd.f32 %v4268_v55, %v3992_v53  ;;  %v4437_v63 = vadd.f32 %v4436_v56, %v4120_v54  ;;  %v6543_v1 = vpop.f32.mrf.mxu0  ;;  %v6671_v4 = vpop.f32.mrf.mxu1 }
 0x1ce   : > { %v3995_v18 = vmax.f32 %v3213_v0, 0.0  ;;  %v4123_v51 = vmax.f32 %v3725_v34, 0.0  ;;  %v3224_v21 = vadd.f32 %v7926_v29, %v6543_v1  ;;  %v3736_v22 = vadd.f32 %v7926_v29, %v6671_v4 }
 0x1cf   : > { %v4270_v7 = vadd.f32 %v4269_v62, %v3993_v61  ;;  %v4438_v8 = vadd.f32 %v4437_v63, %v4121_v33  ;;  %v3215_v9 = vpop.f32.mrf.mxu0  ;;  %v3727_v12 = vpop.f32.mrf.mxu1 }
 0x1d0   : > { %v3216_v15 = vadd.f32 %v7926_v29, %v3215_v9  ;;  %v3728_v50 = vadd.f32 %v7926_v29, %v3727_v12  ;;  %v3998_v41 = vmax.f32 %v3224_v21, 0.0  ;;  %v4126_v42 = vmax.f32 %v3736_v22, 0.0 }
 0x1d1   : > { %v4271_v16 = vadd.f32 %v4270_v7, %v3994_v5  ;;  %v4439_v17 = vadd.f32 %v4438_v8, %v4122_v6  ;;  %v6546_v19 = vpop.f32.mrf.mxu0  ;;  %v6674_v20 = vpop.f32.mrf.mxu1 }
 0x1d2   : > { %v3996_v23 = vmax.f32 %v3216_v15, 0.0  ;;  %v4124_v24 = vmax.f32 %v3728_v50, 0.0  ;;  %v3237_v47 = vadd.f32 %v7926_v29, %v6546_v19  ;;  %v3749_v48 = vadd.f32 %v7926_v29, %v6674_v20 }
 0x1d3   : > { %v4272_v25 = vrot.slane %v4271_v16, 4  ;;  %v4440_v26 = vrot.slane %v4439_v17, 4  ;;  %v3228_v27 = vpop.f32.mrf.mxu0  ;;  %v3740_v28 = vpop.f32.mrf.mxu1 }
 0x1d4   : > { %v4278_v32 = vadd.f32 %v3996_v23, %v3995_v18  ;;  %v4446_v35 = vadd.f32 %v4124_v24, %v4123_v51  ;;  %v3229_v11 = vadd.f32 %v7926_v29, %v3228_v27  ;;  %v3741_v39 = vadd.f32 %v7926_v29, %v3740_v28 }
 0x1d5   : > { %v4273_v36 = vadd.f32 %v4272_v25, %v4271_v16  ;;  %v4441_v37 = vadd.f32 %v4440_v26, %v4439_v17  ;;  %v6547_v45 = vpop.f32.mrf.mxu0  ;;  %v6675_v40 = vpop.f32.mrf.mxu1  ;;  %v4001_v8 = vmax.f32 %v3237_v47, 0.0  ;;  %v4129_v9 = vmax.f32 %v3749_v48, 0.0 }
 0x1d6   : > { %v4279_v43 = vadd.f32 %v4278_v32, %v3997_v30  ;;  %v4447_v44 = vadd.f32 %v4446_v35, %v4125_v31  ;;  %v3999_v52 = vmax.f32 %v3229_v11, 0.0  ;;  %v4127_v54 = vmax.f32 %v3741_v39, 0.0 }
 0x1d7   : > { %v4274_v46 = vrot.slane %v4273_v36, 2  ;;  %v4442_v38 = vrot.slane %v4441_v37, 2  ;;  %v3231_v10 = vpop.f32.mrf.mxu0  ;;  %v3743_v49 = vpop.f32.mrf.mxu1  ;;  %v3240_v63 = vadd.f32 %v7926_v29, %v6547_v45  ;;  %v3752_v0 = vadd.f32 %v7926_v29, %v6675_v40 }
 0x1d8   : > { %v4280_v53 = vadd.f32 %v4279_v43, %v3998_v41  ;;  %v4448_v55 = vadd.f32 %v4447_v44, %v4126_v42  ;;  %v3232_v58 = vadd.f32 %v7926_v29, %v3231_v10  ;;  %v3744_v59 = vadd.f32 %v7926_v29, %v3743_v49 }
 0x1d9   : > { %v4275_v56 = vadd.f32 %v4274_v46, %v4273_v36  ;;  %v4443_v57 = vadd.f32 %v4442_v38, %v4441_v37  ;;  %v6550_v60 = vpop.f32.mrf.mxu0  ;;  %v6678_v61 = vpop.f32.mrf.mxu1  ;;  %v4002_v51 = vmax.f32 %v3240_v63, 0.0  ;;  %v4130_v19 = vmax.f32 %v3752_v0, 0.0 }
 0x1da   : > { %v4281_v33 = vadd.f32 %v4280_v53, %v3999_v52  ;;  %v4449_v62 = vadd.f32 %v4448_v55, %v4127_v54  ;;  %v4000_v4 = vmax.f32 %v3232_v58, 0.0  ;;  %v4128_v5 = vmax.f32 %v3744_v59, 0.0 }
 0x1db   : > { %v4276_v34 = vrot.slane %v4275_v56, 1  ;;  %v4444_v1 = vrot.slane %v4443_v57, 1  ;;  %v3244_v6 = vpop.f32.mrf.mxu0  ;;  %v3756_v7 = vpop.f32.mrf.mxu1  ;;  %v3253_v26 = vadd.f32 %v7926_v29, %v6550_v60  ;;  %v3765_v27 = vadd.f32 %v7926_v29, %v6678_v61 }
 0x1dc   : > { %v3245_v12 = vadd.f32 %v7926_v29, %v3244_v6  ;;  %v3757_v13 = vadd.f32 %v7926_v29, %v3756_v7  ;;  %v4282_v50 = vadd.f32 %v4281_v33, %v4000_v4  ;;  %v4450_v16 = vadd.f32 %v4449_v62, %v4128_v5 }
 0x1dd   : > { %v4277_v14 = vadd.f32 %v4276_v34, %v4275_v56  ;;  %v4445_v15 = vadd.f32 %v4444_v1, %v4443_v57  ;;  %v6551_v17 = vpop.f32.mrf.mxu0  ;;  %v6679_v18 = vpop.f32.mrf.mxu1  ;;  %v4005_v44 = vmax.f32 %v3253_v26, 0.0  ;;  %v4133_v46 = vmax.f32 %v3765_v27, 0.0 }
 0x1de   : > { %v4283_v22 = vadd.f32 %v4282_v50, %v4001_v8  ;;  %v4451_v23 = vadd.f32 %v4450_v16, %v4129_v9  ;;  %v4003_v31 = vmax.f32 %v3245_v12, 0.0  ;;  %v3256_v40 = vadd.f32 %v7926_v29, %v6551_v17 }
 0x1df   : > { %v8014_v20 = vsel %vm4531_vm4, %v4277_v14, %v7974_v2  ;;  %v8018_v21 = vsel %vm4531_vm4, %v4445_v15, %v7978_v3  ;;  %v3247_v24 = vpop.f32.mrf.mxu0  ;;  %v3759_v25 = vpop.f32.mrf.mxu1  ;;  %v4131_v2 = vmax.f32 %v3757_v13, 0.0  ;;  %v3768_v41 = vadd.f32 %v7926_v29, %v6679_v18 }
 0x1e0   : > { %v3248_v28 = vadd.f32 %v7926_v29, %v3247_v24  ;;  %v3760_v30 = vadd.f32 %v7926_v29, %v3759_v25  ;;  %v4284_v32 = vadd.f32 %v4283_v22, %v4002_v51  ;;  %v4452_v35 = vadd.f32 %v4451_v23, %v4130_v19 }
 0x1e1   : > { %v6554_v36 = vpop.f32.mrf.mxu0  ;;  %v6682_v37 = vpop.f32.mrf.mxu1  ;;  %v4006_v53 = vmax.f32 %v3256_v40, 0.0  ;;  %v4134_v54 = vmax.f32 %v3768_v41, 0.0 }
 0x1e2   : > { %v4004_v3 = vmax.f32 %v3248_v28, 0.0  ;;  %v4132_v11 = vmax.f32 %v3760_v30, 0.0  ;;  %v4285_v39 = vadd.f32 %v4284_v32, %v4003_v31  ;;  %v4453_v45 = vadd.f32 %v4452_v35, %v4131_v2 }
 0x1e3   : > { %v3260_v42 = vpop.f32.mrf.mxu0  ;;  %v3772_v43 = vpop.f32.mrf.mxu1  ;;  %v3269_v59 = vadd.f32 %v7926_v29, %v6554_v36  ;;  %v3781_v60 = vadd.f32 %v7926_v29, %v6682_v37 }
 0x1e4   : > { %v4286_v38 = vadd.f32 %v4285_v39, %v4004_v3  ;;  %v4454_v47 = vadd.f32 %v4453_v45, %v4132_v11  ;;  %v3261_v48 = vadd.f32 %v7926_v29, %v3260_v42  ;;  %v3773_v10 = vadd.f32 %v7926_v29, %v3772_v43 }
 0x1e5   : > { %v6555_v49 = vpop.f32.mrf.mxu0  ;;  %v6683_v52 = vpop.f32.mrf.mxu1  ;;  %v4009_v15 = vmax.f32 %v3269_v59, 0.0  ;;  %v4137_v50 = vmax.f32 %v3781_v60, 0.0 }
 0x1e6   : > { %v4287_v55 = vadd.f32 %v4286_v38, %v4005_v44  ;;  %v4455_v56 = vadd.f32 %v4454_v47, %v4133_v46  ;;  %v4007_v62 = vmax.f32 %v3261_v48, 0.0  ;;  %v4135_v0 = vmax.f32 %v3773_v10, 0.0 }
 0x1e7   : > { %v3263_v57 = vpop.f32.mrf.mxu0  ;;  %v3775_v58 = vpop.f32.mrf.mxu1  ;;  %v3272_v9 = vadd.f32 %v7926_v29, %v6555_v49  ;;  %v3784_v12 = vadd.f32 %v7926_v29, %v6683_v52 }
 0x1e8   : > { %v3264_v61 = vadd.f32 %v7926_v29, %v3263_v57  ;;  %v3776_v33 = vadd.f32 %v7926_v29, %v3775_v58  ;;  %v4288_v63 = vadd.f32 %v4287_v55, %v4006_v53  ;;  %v4456_v34 = vadd.f32 %v4455_v56, %v4134_v54 }
 0x1e9   : > { %v6558_v1 = vpop.f32.mrf.mxu0  ;;  %v6686_v4 = vpop.f32.mrf.mxu1  ;;  %v4010_v23 = vmax.f32 %v3272_v9, 0.0  ;;  %v4138_v24 = vmax.f32 %v3784_v12, 0.0 }
 0x1ea   : > { %v4008_v5 = vmax.f32 %v3264_v61, 0.0  ;;  %v4136_v6 = vmax.f32 %v3776_v33, 0.0  ;;  %v4289_v7 = vadd.f32 %v4288_v63, %v4007_v62  ;;  %v4457_v8 = vadd.f32 %v4456_v34, %v4135_v0 }
 0x1eb   : > { %v3276_v13 = vpop.f32.mrf.mxu0  ;;  %v3788_v14 = vpop.f32.mrf.mxu1  ;;  %v3285_v30 = vadd.f32 %v7926_v29, %v6558_v1  ;;  %v3797_v31 = vadd.f32 %v7926_v29, %v6686_v4 }
 0x1ec   : > { %v4290_v16 = vadd.f32 %v4289_v7, %v4008_v5  ;;  %v4458_v17 = vadd.f32 %v4457_v8, %v4136_v6  ;;  %v3277_v18 = vadd.f32 %v7926_v29, %v3276_v13  ;;  %v3789_v51 = vadd.f32 %v7926_v29, %v3788_v14 }
 0x1ed   : > { %v6559_v19 = vpop.f32.mrf.mxu0  ;;  %v6687_v22 = vpop.f32.mrf.mxu1  ;;  %v4013_v47 = vmax.f32 %v3285_v30, 0.0  ;;  %v4141_v48 = vmax.f32 %v3797_v31, 0.0 }
 0x1ee   : > { %v4291_v25 = vadd.f32 %v4290_v16, %v4009_v15  ;;  %v4459_v26 = vadd.f32 %v4458_v17, %v4137_v50  ;;  %v4011_v37 = vmax.f32 %v3277_v18, 0.0  ;;  %v4139_v3 = vmax.f32 %v3789_v51, 0.0 }
 0x1ef   : > { %v3279_v27 = vpop.f32.mrf.mxu0  ;;  %v3791_v28 = vpop.f32.mrf.mxu1  ;;  %v3288_v45 = vadd.f32 %v7926_v29, %v6559_v19  ;;  %v3800_v40 = vadd.f32 %v7926_v29, %v6687_v22 }
 0x1f0   : > { %v3280_v32 = vadd.f32 %v7926_v29, %v3279_v27  ;;  %v3792_v2 = vadd.f32 %v7926_v29, %v3791_v28  ;;  %v4292_v35 = vadd.f32 %v4291_v25, %v4010_v23  ;;  %v4460_v36 = vadd.f32 %v4459_v26, %v4138_v24 }
 0x1f1   : > { %v6562_v11 = vpop.f32.mrf.mxu0  ;;  %v6690_v39 = vpop.f32.mrf.mxu1  ;;  %v4014_v58 = vmax.f32 %v3288_v45, 0.0  ;;  %v4142_v59 = vmax.f32 %v3800_v40, 0.0 }
 0x1f2   : > { %v4012_v41 = vmax.f32 %v3280_v32, 0.0  ;;  %v4140_v42 = vmax.f32 %v3792_v2, 0.0  ;;  %v4293_v43 = vrot.slane %v4292_v35, 4  ;;  %v4461_v44 = vrot.slane %v4460_v36, 4 }
 0x1f3   : > { %v3292_v46 = vpop.f32.mrf.mxu0  ;;  %v3804_v38 = vpop.f32.mrf.mxu1  ;;  %v3301_v63 = vadd.f32 %v7926_v29, %v6562_v11  ;;  %v3813_v0 = vadd.f32 %v7926_v29, %v6690_v39 }
 0x1f4   : > { %v4299_v10 = vadd.f32 %v4012_v41, %v4011_v37  ;;  %v4467_v49 = vadd.f32 %v4140_v42, %v4139_v3  ;;  %v4294_v52 = vadd.f32 %v4293_v43, %v4292_v35  ;;  %v4462_v53 = vadd.f32 %v4461_v44, %v4460_v36 }
 0x1f5   : > { %v3293_v54 = vadd.f32 %v7926_v29, %v3292_v46  ;;  %v3805_v55 = vadd.f32 %v7926_v29, %v3804_v38  ;;  %v6563_v56 = vpop.f32.mrf.mxu0  ;;  %v6691_v57 = vpop.f32.mrf.mxu1  ;;  %v4017_v26 = vmax.f32 %v3301_v63, 0.0  ;;  %v4145_v27 = vmax.f32 %v3813_v0, 0.0 }
 0x1f6   : > { %v4300_v60 = vadd.f32 %v4299_v10, %v4013_v47  ;;  %v4468_v61 = vadd.f32 %v4467_v49, %v4141_v48  ;;  %v4295_v33 = vrot.slane %v4294_v52, 2  ;;  %v4463_v62 = vrot.slane %v4462_v53, 2 }
 0x1f7   : > { %v3295_v34 = vpop.f32.mrf.mxu0  ;;  %v3807_v1 = vpop.f32.mrf.mxu1  ;;  %v4015_v4 = vmax.f32 %v3293_v54, 0.0  ;;  %v4143_v6 = vmax.f32 %v3805_v55, 0.0  ;;  %v3304_v17 = vadd.f32 %v7926_v29, %v6563_v56  ;;  %v3816_v18 = vadd.f32 %v7926_v29, %v6691_v57 }
 0x1f8   : > { %v4301_v5 = vadd.f32 %v4300_v60, %v4014_v58  ;;  %v4469_v7 = vadd.f32 %v4468_v61, %v4142_v59  ;;  %v4296_v8 = vadd.f32 %v4295_v33, %v4294_v52  ;;  %v4464_v9 = vadd.f32 %v4463_v62, %v4462_v53 }
 0x1f9   : > { %v3296_v12 = vadd.f32 %v7926_v29, %v3295_v34  ;;  %v3808_v13 = vadd.f32 %v7926_v29, %v3807_v1  ;;  %v6566_v14 = vpop.f32.mrf.mxu0  ;;  %v6694_v15 = vpop.f32.mrf.mxu1  ;;  %v4018_v36 = vmax.f32 %v3304_v17, 0.0  ;;  %v4146_v37 = vmax.f32 %v3816_v18, 0.0 }
 0x1fa   : > { %v4302_v50 = vadd.f32 %v4301_v5, %v4015_v4  ;;  %v4470_v16 = vadd.f32 %v4469_v7, %v4143_v6  ;;  %v4297_v51 = vrot.slane %v4296_v8, 1  ;;  %v4465_v19 = vrot.slane %v4464_v9, 1 }
 0x1fb   : > { %v4016_v22 = vmax.f32 %v3296_v12, 0.0  ;;  %v4144_v23 = vmax.f32 %v3808_v13, 0.0  ;;  %v3308_v24 = vpop.f32.mrf.mxu0  ;;  %v3820_v25 = vpop.f32.mrf.mxu1  ;;  %v3317_v59 = vadd.f32 %v7926_v29, %v6566_v14  ;;  %v3829_v60 = vadd.f32 %v7926_v29, %v6694_v15 }
 0x1fc   : > { %v4298_v28 = vadd.f32 %v4297_v51, %v4296_v8  ;;  %v4466_v30 = vadd.f32 %v4465_v19, %v4464_v9  ;;  %v3309_v3 = vadd.f32 %v7926_v29, %v3308_v24  ;;  %v3821_v11 = vadd.f32 %v7926_v29, %v3820_v25 }
 0x1fd   : > { %v4303_v31 = vadd.f32 %v4302_v50, %v4016_v22  ;;  %v4471_v32 = vadd.f32 %v4470_v16, %v4144_v23  ;;  %v6567_v2 = vpop.f32.mrf.mxu0  ;;  %v6695_v35 = vpop.f32.mrf.mxu1  ;;  %v4021_v5 = vmax.f32 %v3317_v59, 0.0  ;;  %v4149_v6 = vmax.f32 %v3829_v60, 0.0 }
 0x1fe   : > { %v8053_v39 = vsel %vm4533_vm5, %v4298_v28, %v8014_v20  ;;  %v8056_v45 = vsel %vm4533_vm5, %v4466_v30, %v8018_v21  ;;  %v4019_v49 = vmax.f32 %v3309_v3, 0.0  ;;  %v4147_v20 = vmax.f32 %v3821_v11, 0.0 }
 0x1ff   : > { %v4304_v40 = vadd.f32 %v4303_v31, %v4017_v26  ;;  %v4472_v41 = vadd.f32 %v4471_v32, %v4145_v27  ;;  %v3311_v42 = vpop.f32.mrf.mxu0  ;;  %v3823_v43 = vpop.f32.mrf.mxu1  ;;  %v3320_v1 = vadd.f32 %v7926_v29, %v6567_v2  ;;  %v3832_v4 = vadd.f32 %v7926_v29, %v6695_v35 }
 0x200   : > { %v3312_v38 = vadd.f32 %v7926_v29, %v3311_v42  ;;  %v3824_v47 = vadd.f32 %v7926_v29, %v3823_v43 }
 0x201   : > { %v4305_v44 = vadd.f32 %v4304_v40, %v4018_v36  ;;  %v4473_v46 = vadd.f32 %v4472_v41, %v4146_v37  ;;  %v8060_v48 = vpop.f32.mrf.mxu0  ;;  %v8062_v10 = vpop.f32.mrf.mxu1  ;;  %v4022_v16 = vmax.f32 %v3320_v1, 0.0  ;;  %v4150_v17 = vmax.f32 %v3832_v4, 0.0 }
 0x202   : > { %v4020_v55 = vmax.f32 %v3312_v38, 0.0  ;;  %v4148_v56 = vmax.f32 %v3824_v47, 0.0 }
 0x203   : > { %v3324_v52 = vpop.f32.mrf.mxu0  ;;  %v3836_v53 = vpop.f32.mrf.mxu1  ;;  %v4306_v21 = vadd.f32 %v4305_v44, %v4019_v49  ;;  %v4474_v54 = vadd.f32 %v4473_v46, %v4147_v20 }
 0x204   : > { %v3325_v18 = vadd.f32 %v7926_v29, %v3324_v52  ;;  %v3837_v51 = vadd.f32 %v7926_v29, %v3836_v53 }
 0x205   : > { %v8064_v57 = vpop.f32.mrf.mxu0  ;;  %v8066_v58 = vpop.f32.mrf.mxu1  ;;  %v4307_v62 = vadd.f32 %v4306_v21, %v4020_v55  ;;  %v4475_v63 = vadd.f32 %v4474_v54, %v4148_v56  ;;  %v8087_v54 = vld [vmem:[%s8597_s3] ss:$0 sm:$0xff] }
 0x206   : > { %v4023_v41 = vmax.f32 %v3325_v18, 0.0  ;;  %v4151_v42 = vmax.f32 %v3837_v51, 0.0  ;;  %v3848_v1 = vadd.f32 %v8087_v54, %v8066_v58 }
 0x207   : > { %v3327_v61 = vpop.f32.mrf.mxu0  ;;  %v3839_v33 = vpop.f32.mrf.mxu1  ;;  %v4308_v9 = vadd.f32 %v4307_v62, %v4021_v5  ;;  %v4476_v12 = vadd.f32 %v4475_v63, %v4149_v6  ;;  %v3333_v63 = vadd.f32 %v8087_v54, %v8060_v48 }
 0x208   : > { %v3328_v19 = vadd.f32 %v7926_v29, %v3327_v61  ;;  %v3840_v22 = vadd.f32 %v7926_v29, %v3839_v33 }
 0x209   : > { %v6574_v0 = vpop.f32.mrf.mxu0  ;;  %v6702_v34 = vpop.f32.mrf.mxu1  ;;  %v4309_v30 = vadd.f32 %v4308_v9, %v4022_v16  ;;  %v4477_v31 = vadd.f32 %v4476_v12, %v4150_v17 }
 0x20a   : > { %v3349_v25 = vadd.f32 %v7926_v29, %v6574_v0  ;;  %v3861_v26 = vadd.f32 %v7926_v29, %v6702_v34  ;;  %v4024_v43 = vmax.f32 %v3328_v19, 0.0  ;;  %v4152_v44 = vmax.f32 %v3840_v22, 0.0 }
 0x20b   : > { %v3340_v7 = vpop.f32.mrf.mxu0  ;;  %v3852_v8 = vpop.f32.mrf.mxu1  ;;  %v4310_v53 = vadd.f32 %v4309_v30, %v4023_v41  ;;  %v4478_v21 = vadd.f32 %v4477_v31, %v4151_v42  ;;  %v3845_v0 = vadd.f32 %v8087_v54, %v8062_v10  ;;  %v3336_v34 = vadd.f32 %v8087_v54, %v8064_v57 }
 0x20c   : > { %v3341_v13 = vadd.f32 %v7926_v29, %v3340_v7  ;;  %v3853_v14 = vadd.f32 %v7926_v29, %v3852_v8  ;;  %v4029_v47 = vmax.f32 %v3349_v25, 0.0  ;;  %v4157_v49 = vmax.f32 %v3861_v26, 0.0 }
 0x20d   : > { %v6575_v15 = vpop.f32.mrf.mxu0  ;;  %v6703_v50 = vpop.f32.mrf.mxu1  ;;  %v4479_v57 = vadd.f32 %v4478_v21, %v4152_v44  ;;  %v4026_v25 = vmax.f32 %v3336_v34, 0.0 }
 0x20e   : > { %v4027_v32 = vmax.f32 %v3341_v13, 0.0  ;;  %v4155_v2 = vmax.f32 %v3853_v14, 0.0  ;;  %v3352_v37 = vadd.f32 %v7926_v29, %v6575_v15  ;;  %v3864_v3 = vadd.f32 %v7926_v29, %v6703_v50 }
 0x20f   : > { %v3343_v23 = vpop.f32.mrf.mxu0  ;;  %v3855_v24 = vpop.f32.mrf.mxu1  ;;  %v4311_v15 = vadd.f32 %v4310_v53, %v4024_v43 }
 0x210   : > { %v3344_v27 = vadd.f32 %v7926_v29, %v3343_v23  ;;  %v3856_v28 = vadd.f32 %v7926_v29, %v3855_v24  ;;  %v4030_v60 = vmax.f32 %v3352_v37, 0.0  ;;  %v4158_v61 = vmax.f32 %v3864_v3, 0.0 }
 0x211   : > { %v6578_v35 = vpop.f32.mrf.mxu0  ;;  %v6706_v36 = vpop.f32.mrf.mxu1  ;;  %v4025_v23 = vmax.f32 %v3333_v63, 0.0  ;;  %v4153_v24 = vmax.f32 %v3845_v0, 0.0 }
 0x212   : > { %v4028_v11 = vmax.f32 %v3344_v27, 0.0  ;;  %v4156_v40 = vmax.f32 %v3856_v28, 0.0  ;;  %v3365_v12 = vadd.f32 %v8087_v54, %v6578_v35  ;;  %v3877_v13 = vadd.f32 %v8087_v54, %v6706_v36 }
 0x213   : > { %v3356_v46 = vpop.f32.mrf.mxu0  ;;  %v3868_v38 = vpop.f32.mrf.mxu1  ;;  %v4154_v35 = vmax.f32 %v3848_v1, 0.0  ;;  %v4312_v36 = vadd.f32 %v4311_v15, %v4025_v23  ;;  %v4480_v37 = vadd.f32 %v4479_v57, %v4153_v24 }
 0x214   : > { %v4320_v20 = vadd.f32 %v4028_v11, %v4027_v32  ;;  %v4488_v52 = vadd.f32 %v4156_v40, %v4155_v2  ;;  %v3357_v29 = vadd.f32 %v8087_v54, %v3356_v46  ;;  %v3869_v55 = vadd.f32 %v8087_v54, %v3868_v38 }
 0x215   : > { %v6579_v56 = vpop.f32.mrf.mxu0  ;;  %v6707_v59 = vpop.f32.mrf.mxu1  ;;  %v4033_v28 = vmax.f32 %v3365_v12, 0.0  ;;  %v4161_v30 = vmax.f32 %v3877_v13, 0.0 }
 0x216   : > { %v4321_v33 = vadd.f32 %v4320_v20, %v4029_v47  ;;  %v4489_v62 = vadd.f32 %v4488_v52, %v4157_v49  ;;  %v4031_v6 = vmax.f32 %v3357_v29, 0.0  ;;  %v4159_v8 = vmax.f32 %v3869_v55, 0.0 }
 0x217   : > { %v3359_v4 = vpop.f32.mrf.mxu0  ;;  %v3871_v5 = vpop.f32.mrf.mxu1  ;;  %v3368_v17 = vadd.f32 %v8087_v54, %v6579_v56  ;;  %v3880_v18 = vadd.f32 %v8087_v54, %v6707_v59  ;;  %v4313_v56 = vadd.f32 %v4312_v36, %v4026_v25  ;;  %v4481_v59 = vadd.f32 %v4480_v37, %v4154_v35 }
 0x218   : > { %v4322_v7 = vadd.f32 %v4321_v33, %v4030_v60  ;;  %v4490_v9 = vadd.f32 %v4489_v62, %v4158_v61  ;;  %v3360_v48 = vadd.f32 %v8087_v54, %v3359_v4  ;;  %v3872_v10 = vadd.f32 %v8087_v54, %v3871_v5 }
 0x219   : > { %v6582_v14 = vpop.f32.mrf.mxu0  ;;  %v6710_v58 = vpop.f32.mrf.mxu1  ;;  %v4034_v40 = vmax.f32 %v3368_v17, 0.0  ;;  %v4162_v41 = vmax.f32 %v3880_v18, 0.0 }
 0x21a   : > { %v4323_v50 = vadd.f32 %v4322_v7, %v4031_v6  ;;  %v4491_v16 = vadd.f32 %v4490_v9, %v4159_v8  ;;  %v4032_v51 = vmax.f32 %v3360_v48, 0.0  ;;  %v4160_v19 = vmax.f32 %v3872_v10, 0.0 }
 0x21b   : > { %v3372_v22 = vpop.f32.mrf.mxu0  ;;  %v3884_v27 = vpop.f32.mrf.mxu1  ;;  %v3381_v46 = vadd.f32 %v8087_v54, %v6582_v14  ;;  %v3893_v38 = vadd.f32 %v8087_v54, %v6710_v58  ;;  %v4314_v48 = vrot.slane %v4313_v56, 4  ;;  %v4482_v10 = vrot.slane %v4481_v59, 4 }
 0x21c   : > { %v3373_v26 = vadd.f32 %v8087_v54, %v3372_v22  ;;  %v4324_v31 = vadd.f32 %v4323_v50, %v4032_v51  ;;  %v4492_v32 = vadd.f32 %v4491_v16, %v4160_v19  ;;  %v3885_v3 = vadd.f32 %v8087_v54, %v3884_v27 }
 0x21d   : > { %v6583_v2 = vpop.f32.mrf.mxu0  ;;  %v6711_v11 = vpop.f32.mrf.mxu1  ;;  %v4037_v4 = vmax.f32 %v3381_v46, 0.0  ;;  %v4165_v7 = vmax.f32 %v3893_v38, 0.0  ;;  %v4315_v27 = vadd.f32 %v4314_v48, %v4313_v56 }
 0x21e   : > { %v4325_v42 = vadd.f32 %v4324_v31, %v4033_v28  ;;  %v4493_v43 = vadd.f32 %v4492_v32, %v4161_v30  ;;  %v4035_v47 = vmax.f32 %v3373_v26, 0.0  ;;  %v4163_v53 = vmax.f32 %v3885_v3, 0.0 }
 0x21f   : > { %v3375_v44 = vpop.f32.mrf.mxu0  ;;  %v3887_v20 = vpop.f32.mrf.mxu1  ;;  %v3384_v60 = vadd.f32 %v8087_v54, %v6583_v2  ;;  %v3896_v0 = vadd.f32 %v8087_v54, %v6711_v11  ;;  %v4483_v28 = vadd.f32 %v4482_v10, %v4481_v59 }
 0x220   : > { %v3376_v49 = vadd.f32 %v8087_v54, %v3375_v44  ;;  %v4326_v52 = vadd.f32 %v4325_v42, %v4034_v40  ;;  %v4494_v21 = vadd.f32 %v4493_v43, %v4162_v41  ;;  %v3888_v29 = vadd.f32 %v8087_v54, %v3887_v20 }
 0x221   : > { %v6586_v55 = vpop.f32.mrf.mxu0  ;;  %v6714_v33 = vpop.f32.mrf.mxu1  ;;  %v4038_v15 = vmax.f32 %v3384_v60, 0.0  ;;  %v4166_v57 = vmax.f32 %v3896_v0, 0.0  ;;  %v4316_v41 = vrot.slane %v4315_v27, 2  ;;  %v4484_v42 = vrot.slane %v4483_v28, 2 }
 0x222   : > { %v4036_v61 = vmax.f32 %v3376_v49, 0.0  ;;  %v4327_v62 = vadd.f32 %v4326_v52, %v4035_v47  ;;  %v4495_v63 = vadd.f32 %v4494_v21, %v4163_v53  ;;  %v4164_v34 = vmax.f32 %v3888_v29, 0.0 }
 0x223   : > { %v3388_v1 = vpop.f32.mrf.mxu0  ;;  %v3900_v6 = vpop.f32.mrf.mxu1  ;;  %v3397_v17 = vadd.f32 %v8087_v54, %v6586_v55  ;;  %v3909_v18 = vadd.f32 %v8087_v54, %v6714_v33  ;;  %v4317_v20 = vadd.f32 %v4316_v41, %v4315_v27  ;;  %v4485_v52 = vadd.f32 %v4484_v42, %v4483_v28 }
 0x224   : > { %v3389_v5 = vadd.f32 %v8087_v54, %v3388_v1  ;;  %v4328_v8 = vadd.f32 %v4327_v62, %v4036_v61  ;;  %v4496_v9 = vadd.f32 %v4495_v63, %v4164_v34  ;;  %v3901_v12 = vadd.f32 %v8087_v54, %v3900_v6  ;;  %v4171_v1 = vld [vmem:[#allocation2] sm:$0xff] }
 0x225   : > { %v6587_v13 = vpop.f32.mrf.mxu0  ;;  %v6715_v14 = vpop.f32.mrf.mxu1  ;;  %v4041_v37 = vmax.f32 %v3397_v17, 0.0  ;;  %v4169_v3 = vmax.f32 %v3909_v18, 0.0  ;;  %v4486_v56 = vrot.slane %v4485_v52, 1 }
 0x226   : > { %v4329_v50 = vadd.f32 %v4328_v8, %v4037_v4  ;;  %v4497_v16 = vadd.f32 %v4496_v9, %v4165_v7  ;;  %v4039_v51 = vmax.f32 %v3389_v5, 0.0  ;;  %v4167_v24 = vmax.f32 %v3901_v12, 0.0  ;;  %v4172_v5 = vld [vmem:[#allocation2 + $0x8] sm:$0xff] }
 0x227   : > { %v3391_v58 = vpop.f32.mrf.mxu0  ;;  %v3903_v22 = vpop.f32.mrf.mxu1  ;;  %v3400_v30 = vadd.f32 %v8087_v54, %v6587_v13  ;;  %v3912_v35 = vadd.f32 %v8087_v54, %v6715_v14  ;;  %v4487_v63 = vadd.f32 %v4486_v56, %v4485_v52 }
 0x228   : > { %v3392_v19 = vadd.f32 %v8087_v54, %v3391_v58  ;;  %v4330_v23 = vadd.f32 %v4329_v50, %v4038_v15  ;;  %v4498_v25 = vadd.f32 %v4497_v16, %v4166_v57  ;;  %v3904_v26 = vadd.f32 %v8087_v54, %v3903_v22 }
 0x229   : > { %v4042_v43 = vmax.f32 %v3400_v30, 0.0  ;;  %v4170_v44 = vmax.f32 %v3912_v35, 0.0  ;;  %v4318_v54 = vrot.slane %v4317_v20, 1  ;;  %v4544_v8 = vsel %vm4535_vm6, %v4487_v63, %v8056_v45 }
 0x22a   : > { %v4040_v31 = vmax.f32 %v3392_v19, 0.0  ;;  %v4331_v32 = vadd.f32 %v4330_v23, %v4039_v51  ;;  %v4499_v2 = vadd.f32 %v4498_v25, %v4167_v24  ;;  %v4168_v36 = vmax.f32 %v3904_v26, 0.0 }
 0x22b   : > { %v4319_v62 = vadd.f32 %v4318_v54, %v4317_v20 }
 0x22c   : > { %v4332_v11 = vadd.f32 %v4331_v32, %v4040_v31  ;;  %v4500_v40 = vadd.f32 %v4499_v2, %v4168_v36 }
 0x22d   : > { %v4536_v7 = vsel %vm4535_vm6, %v4319_v62, %v8053_v39 }
 0x22e   : > { %v4333_v46 = vadd.f32 %v4332_v11, %v4041_v37  ;;  %v4501_v38 = vadd.f32 %v4500_v40, %v4169_v3 }
 0x230   : > { %v4334_v47 = vadd.f32 %v4333_v46, %v4042_v43  ;;  %v4502_v49 = vadd.f32 %v4501_v38, %v4170_v44 }
 0x232   : > { %v4335_v53 = vrot.slane %v4334_v47, 4  ;;  %v4503_v21 = vrot.slane %v4502_v49, 4 }
 0x234   : > { %v4336_v29 = vadd.f32 %v4335_v53, %v4334_v47  ;;  %v4504_v55 = vadd.f32 %v4503_v21, %v4502_v49 }
 0x236   : > { %v4337_v59 = vrot.slane %v4336_v29, 2  ;;  %v4505_v60 = vrot.slane %v4504_v55, 2 }
 0x238   : > { %v4338_v61 = vadd.f32 %v4337_v59, %v4336_v29  ;;  %v4506_v33 = vadd.f32 %v4505_v60, %v4504_v55 }
 0x23a   : > { %v4339_v0 = vrot.slane %v4338_v61, 1  ;;  %v4507_v34 = vrot.slane %v4506_v33, 1 }
 0x23c   : > { %v4340_v4 = vadd.f32 %v4339_v0, %v4338_v61  ;;  %v4508_v6 = vadd.f32 %v4507_v34, %v4506_v33 }
 0x23d   : > { %4555 = sbr.rel (%p6150_p10) target bundleno = 1323 (0x52b), region = 121 }
 0x23e   : > { %v4538_v9 = vsel %vm4537_vm7, %v4340_v4, %v4536_v7  ;;  %v4545_v12 = vsel %vm4537_vm7, %v4508_v6, %v4544_v8 }
 0x23f   : > { %v4548_v13 = vadd.f32 %v4538_v9, %v4171_v1  ;;  %v4549_v48 = vadd.f32 %v4545_v12, %v4172_v5 }
 0x241   : > { %4550 = vst [vmem:[#allocation2] sm:$0xff] %v4548_v13  ;;  %4551 = vst [vmem:[#allocation2 + $0x8] sm:$0xff] %v4549_v48 }
 0x242   : > { %v6916_v10 = vld [vmem:[%s8598_s4 + $0xe4] ss:$16 sps:$4 sm:$0xff]   ;;  %v6918_v14 = vld [vmem:[%s8598_s4 + $0xe0] ss:$16 sps:$4 sm:$0xff]   ;;  %v7150_v39 = vmov 0   ;;  %v6940_v3 = vld [vmem:[%s8600_s6 + $0x38] sm:$0xff]  }
 0x243   : > { %4805 = vmatprep.mubr.bf16.mxu0 %v7150_v39  ;;  %4848 = vmatprep.mubr.bf16.mxu1 %v7150_v39  ;;  %v6919_v45 = vld [vmem:[%s8598_s4 + $0xc4] ss:$16 sps:$4 sm:$0xff]   ;;  %v6921_v15 = vld [vmem:[%s8598_s4 + $0xc0] ss:$16 sps:$4 sm:$0xff]   ;;  %v6949_v23 = vld [vmem:[%s8598_s4 + $0xec] ss:$16 sps:$4 sm:$0xff]  }
 0x244   : > { %4773 = vmatprep.subr.bf16.mxu0 %v6916_v10  ;;  %v6922_v57 = vld [vmem:[%s8598_s4 + $0xa4] ss:$16 sps:$4 sm:$0xff]   ;;  %v6924_v50 = vld [vmem:[%s8598_s4 + $0xa0] ss:$16 sps:$4 sm:$0xff]   ;;  %v6951_v24 = vld [vmem:[%s8598_s4 + $0xe8] ss:$16 sps:$4 sm:$0xff]   ;;  %4816 = vmatprep.subr.bf16.mxu1 %v6949_v23 }
 0x245   : > { %4774 = vmatpush1.bf16.msra.mxu0 %v6918_v14  ;;  %v6925_v16 = vld [vmem:[%s8598_s4 + $0x84] ss:$16 sps:$4 sm:$0xff]   ;;  %v6927_v58 = vld [vmem:[%s8598_s4 + $0x80] ss:$16 sps:$4 sm:$0xff]   ;;  %v6952_v26 = vld [vmem:[%s8598_s4 + $0xcc] ss:$16 sps:$4 sm:$0xff]   ;;  %4817 = vmatpush1.bf16.msra.mxu1 %v6951_v24 }
 0x246   : > { %4775 = vmatprep.subr.bf16.mxu0 %v6919_v45  ;;  %v6928_v17 = vld [vmem:[%s8598_s4 + $0x64] ss:$16 sps:$4 sm:$0xff]   ;;  %v6930_v18 = vld [vmem:[%s8598_s4 + $0x60] ss:$16 sps:$4 sm:$0xff]   ;;  %v6954_v28 = vld [vmem:[%s8598_s4 + $0xc8] ss:$16 sps:$4 sm:$0xff]   ;;  %4818 = vmatprep.subr.bf16.mxu1 %v6952_v26 }
 0x247   : > { %v6931_v51 = vld [vmem:[%s8598_s4 + $0x44] ss:$16 sps:$4 sm:$0xff]   ;;  %v6933_v19 = vld [vmem:[%s8598_s4 + $0x40] ss:$16 sps:$4 sm:$0xff]   ;;  %v6955_v30 = vld [vmem:[%s8598_s4 + $0xac] ss:$16 sps:$4 sm:$0xff]  }
 0x248   : > { %v6934_v22 = vld [vmem:[%s8598_s4 + $0x24] ss:$16 sps:$4 sm:$0xff]   ;;  %v6936_v25 = vld [vmem:[%s8598_s4 + $0x20] ss:$16 sps:$4 sm:$0xff]   ;;  %v4557_v2 = vld [vmem:[#allocation2 + $0x8] sm:$0xff]  ;;  %v7151_v11 = vmov 0.0  }
 0x249   : > { %4776 = vmatpush1.bf16.msra.mxu0 %v6921_v15  ;;  %v6937_v27 = vld [vmem:[%s8598_s4 + $0x4] ss:$16 sps:$4 sm:$0xff]   ;;  %v6939_v31 = vld [vmem:[%s8598_s4] ss:$16 sps:$4 sm:$0xff]   ;;  %4819 = vmatpush1.bf16.msra.mxu1 %v6954_v28  ;;  %v6957_v35 = vld [vmem:[%s8598_s4 + $0xa8] ss:$16 sps:$4 sm:$0xff]  }
 0x24a   : > { %4777 = vmatprep.subr.bf16.mxu0 %v6922_v57  ;;  %v4556_v32 = vld [vmem:[#allocation2] sm:$0xff]  ;;  %4820 = vmatprep.subr.bf16.mxu1 %v6955_v30  ;;  %v6958_v36 = vld [vmem:[%s8598_s4 + $0x8c] ss:$16 sps:$4 sm:$0xff]   ;;  %v6960_v40 = vld [vmem:[%s8598_s4 + $0x88] ss:$16 sps:$4 sm:$0xff]   ;;  %vm7152_vm8 = vmmov 0  }
 0x24b   : > { %v4558_v37 = vpack.c.bf16 %v4557_v2, %v4556_v32  ;;  %v6961_v41 = vld [vmem:[%s8598_s4 + $0x6c] ss:$16 sps:$4 sm:$0xff]   ;;  %v6941_v42 = vld [vmem:[%s8600_s6 + $0x30] sm:$0xff]   ;;  %v6963_v43 = vld [vmem:[%s8598_s4 + $0x68] ss:$16 sps:$4 sm:$0xff]  }
 0x24c   : > { %v6964_v44 = vld [vmem:[%s8598_s4 + $0x4c] ss:$16 sps:$4 sm:$0xff]   ;;  %v6966_v38 = vld [vmem:[%s8598_s4 + $0x48] ss:$16 sps:$4 sm:$0xff]   ;;  %v6943_v49 = vld [vmem:[%s8600_s6 + $0x20] sm:$0xff]  }
 0x24d   : > { %4778 = vmatpush1.bf16.msra.mxu0 %v6924_v50  ;;  %4821 = vmatpush1.bf16.msra.mxu1 %v6957_v35  ;;  %v6942_v46 = vld [vmem:[%s8600_s6 + $0x28] sm:$0xff]   ;;  %v6944_v53 = vld [vmem:[%s8600_s6 + $0x18] sm:$0xff]   ;;  %v6945_v29 = vld [vmem:[%s8600_s6 + $0x10] sm:$0xff]  }
 0x24e   : > { %4779 = vmatprep.subr.bf16.mxu0 %v6925_v16  ;;  %4822 = vmatprep.subr.bf16.mxu1 %v6958_v36  ;;  %v6967_v47 = vld [vmem:[%s8598_s4 + $0x2c] ss:$16 sps:$4 sm:$0xff]   ;;  %v6969_v20 = vld [vmem:[%s8598_s4 + $0x28] ss:$16 sps:$4 sm:$0xff]   ;;  %v6947_v54 = vld [vmem:[%s8600_s6] sm:$0xff]  }
 0x24f   : > { %v6970_v52 = vld [vmem:[%s8598_s4 + $0xc] ss:$16 sps:$4 sm:$0xff]   ;;  %v6972_v21 = vld [vmem:[%s8598_s4 + $0x8] ss:$16 sps:$4 sm:$0xff]   ;;  %v6948_v59 = vld [vmem:[%s8595_s1] sm:$0xff]  }
 0x250   : > { %v6946_v55 = vld [vmem:[%s8600_s6 + $0x8] sm:$0xff]   ;;  %v6975_v56 = vld [vmem:[%s8602_s8 + $0x74] ss:$8 sps:$4 sm:$0xff]   ;;  %v6973_v60 = vld [vmem:[%s8602_s8 + $0x70] ss:$8 sps:$4 sm:$0xff]  }
 0x251   : > { %4780 = vmatpush1.bf16.msra.mxu0 %v6927_v58  ;;  %4823 = vmatpush1.bf16.msra.mxu1 %v6960_v40  ;;  %v6978_v61 = vld [vmem:[%s8602_s8 + $0x64] ss:$8 sps:$4 sm:$0xff]   ;;  %v6976_v33 = vld [vmem:[%s8602_s8 + $0x60] ss:$8 sps:$4 sm:$0xff]   ;;  %v6981_v62 = vld [vmem:[%s8602_s8 + $0x54] ss:$8 sps:$4 sm:$0xff]  }
 0x252   : > { %4781 = vmatprep.subr.bf16.mxu0 %v6928_v17  ;;  %4824 = vmatprep.subr.bf16.mxu1 %v6961_v41  ;;  %v6979_v63 = vld [vmem:[%s8602_s8 + $0x50] ss:$8 sps:$4 sm:$0xff]   ;;  %v6984_v0 = vld [vmem:[%s8602_s8 + $0x44] ss:$8 sps:$4 sm:$0xff]   ;;  %v6982_v34 = vld [vmem:[%s8602_s8 + $0x40] ss:$8 sps:$4 sm:$0xff]  }
 0x253   : > { %v6987_v1 = vld [vmem:[%s8602_s8 + $0x34] ss:$8 sps:$4 sm:$0xff]   ;;  %v6985_v4 = vld [vmem:[%s8602_s8 + $0x30] ss:$8 sps:$4 sm:$0xff]   ;;  %v6990_v5 = vld [vmem:[%s8602_s8 + $0x24] ss:$8 sps:$4 sm:$0xff]  }
 0x254   : > { %v6988_v6 = vld [vmem:[%s8602_s8 + $0x20] ss:$8 sps:$4 sm:$0xff]   ;;  %v6993_v7 = vld [vmem:[%s8602_s8 + $0x14] ss:$8 sps:$4 sm:$0xff]   ;;  %v6991_v8 = vld [vmem:[%s8602_s8 + $0x10] ss:$8 sps:$4 sm:$0xff]  }
 0x255   : > { %4782 = vmatpush1.bf16.msra.mxu0 %v6930_v18  ;;  %4825 = vmatpush1.bf16.msra.mxu1 %v6963_v43  ;;  %v6996_v9 = vld [vmem:[%s8602_s8 + $0x4] ss:$8 sps:$4 sm:$0xff]   ;;  %v6994_v12 = vld [vmem:[%s8602_s8] ss:$8 sps:$4 sm:$0xff]   ;;  %v6999_v13 = vld [vmem:[%s8602_s8 + $0xf4] ss:$8 sps:$4 sm:$0xff]  }
 0x256   : > { %4783 = vmatprep.subr.bf16.mxu0 %v6931_v51  ;;  %4826 = vmatprep.subr.bf16.mxu1 %v6964_v44  ;;  %v6997_v48 = vld [vmem:[%s8602_s8 + $0xf0] ss:$8 sps:$4 sm:$0xff]   ;;  %v7002_v10 = vld [vmem:[%s8602_s8 + $0xe4] ss:$8 sps:$4 sm:$0xff]   ;;  %v7000_v14 = vld [vmem:[%s8602_s8 + $0xe0] ss:$8 sps:$4 sm:$0xff]  }
 0x257   : > { %v7003_v45 = vld [vmem:[%s8602_s8 + $0xd0] ss:$8 sps:$4 sm:$0xff]   ;;  %v7008_v15 = vld [vmem:[%s8602_s8 + $0xc4] ss:$8 sps:$4 sm:$0xff]   ;;  %v7023_v57 = vld [vmem:[%s8603_s9 + $0x74] ss:$8 sps:$4 sm:$0xff]  }
 0x258   : > { %v7006_v50 = vld [vmem:[%s8602_s8 + $0xc0] ss:$8 sps:$4 sm:$0xff]   ;;  %v7021_v16 = vld [vmem:[%s8603_s9 + $0x70] ss:$8 sps:$4 sm:$0xff]   ;;  %v7011_v58 = vld [vmem:[%s8602_s8 + $0xb4] ss:$8 sps:$4 sm:$0xff]  }
 0x259   : > { %4784 = vmatpush1.bf16.msra.mxu0 %v6933_v19  ;;  %4827 = vmatpush1.bf16.msra.mxu1 %v6966_v38  ;;  %v7024_v17 = vld [vmem:[%s8603_s9 + $0x60] ss:$8 sps:$4 sm:$0xff]   ;;  %v7026_v18 = vld [vmem:[%s8603_s9 + $0x64] ss:$8 sps:$4 sm:$0xff]   ;;  %v7009_v51 = vld [vmem:[%s8602_s8 + $0xb0] ss:$8 sps:$4 sm:$0xff]  }
 0x25a   : > { %4785 = vmatprep.subr.bf16.mxu0 %v6934_v22  ;;  %4828 = vmatprep.subr.bf16.mxu1 %v6967_v47  ;;  %v7029_v19 = vld [vmem:[%s8603_s9 + $0x54] ss:$8 sps:$4 sm:$0xff]   ;;  %v7014_v22 = vld [vmem:[%s8602_s8 + $0xa4] ss:$8 sps:$4 sm:$0xff]   ;;  %v7027_v23 = vld [vmem:[%s8603_s9 + $0x50] ss:$8 sps:$4 sm:$0xff]  }
 0x25b   : > { %v7032_v24 = vld [vmem:[%s8603_s9 + $0x44] ss:$8 sps:$4 sm:$0xff]   ;;  %v7017_v26 = vld [vmem:[%s8602_s8 + $0x94] ss:$8 sps:$4 sm:$0xff]   ;;  %v7015_v30 = vld [vmem:[%s8602_s8 + $0x90] ss:$8 sps:$4 sm:$0xff]  }
 0x25c   : > { %v7035_v28 = vld [vmem:[%s8603_s9 + $0x34] ss:$8 sps:$4 sm:$0xff]   ;;  %v7033_v32 = vld [vmem:[%s8603_s9 + $0x30] ss:$8 sps:$4 sm:$0xff]   ;;  %v7038_v2 = vld [vmem:[%s8603_s9 + $0x24] ss:$8 sps:$4 sm:$0xff]  }
 0x25d   : > { %4786 = vmatpush1.bf16.msra.mxu0 %v6936_v25  ;;  %4829 = vmatpush1.bf16.msra.mxu1 %v6969_v20  ;;  %v7012_v25 = vld [vmem:[%s8602_s8 + $0xa0] ss:$8 sps:$4 sm:$0xff]   ;;  %v7047_v41 = vld [vmem:[%s8602_s8 + $0x174] ss:$8 sps:$4 sm:$0xff]  }
 0x25e   : > { %4787 = vmatprep.subr.bf16.mxu0 %v6937_v27  ;;  %4830 = vmatprep.subr.bf16.mxu1 %v6970_v52  ;;  %v7030_v27 = vld [vmem:[%s8603_s9 + $0x40] ss:$8 sps:$4 sm:$0xff]  }
 0x25f   : > { %v7018_v35 = vld [vmem:[%s8602_s8 + $0x80] ss:$8 sps:$4 sm:$0xff]  }
 0x260   : > { %v7036_v36 = vld [vmem:[%s8603_s9 + $0x20] ss:$8 sps:$4 sm:$0xff]  }
 0x261   : > { %4788 = vmatpush1.bf16.msra.mxu0 %v6939_v31  ;;  %4831 = vmatpush1.bf16.msra.mxu1 %v6972_v21  ;;  %v7020_v31 = vld [vmem:[%s8602_s8 + $0x84] ss:$8 sps:$4 sm:$0xff]   ;;  %v7042_v40 = vld [vmem:[%s8603_s9] ss:$8 sps:$4 sm:$0xff]  }
 0x262   : > { %6716 = vmatprep.subr.bf16.mxu0 %v7151_v11  ;;  %5146 = vmatprep.subr.bf16.mxu1 %v7023_v57 }
 0x264   : > { %4806 = vmatmul.mubr.bf16.vlgmr.msra.gmra.mxu0 %v4558_v37  ;;  %4849 = vmatmul.mubr.bf16.vlgmr.msra.gmra.mxu1 %v4558_v37  ;;  %v7041_v37 = vld [vmem:[%s8603_s9 + $0x14] ss:$8 sps:$4 sm:$0xff]  }
 0x265   : > { %6717 = vmatpush3.bf16.msra.mxu0 %v6940_v3  ;;  %6732 = vmatprep.mubr.msk.bf16.mxu0 %vm7152_vm8, %v7151_v11  ;;  %v7039_v3 = vld [vmem:[%s8603_s9 + $0x10] ss:$8 sps:$4 sm:$0xff]  }
 0x266   : > { %6718 = vmatprep.subr.bf16.mxu0 %v7151_v11  ;;  %5178 = vmatprep.mubr.bf16.mxu1 %v7150_v39  ;;  %v7005_v39 = vld [vmem:[%s8602_s8 + $0xd4] ss:$8 sps:$4 sm:$0xff]  }
 0x267   : > { %5147 = vmatpush1.bf16.msra.mxu1 %v7021_v16 }
 0x268   : > { %5148 = vmatprep.subr.bf16.mxu1 %v7026_v18  ;;  %v7048_v18 = vld [vmem:[%s8602_s8 + $0x160] ss:$8 sps:$4 sm:$0xff]  }
 0x269   : > { %6719 = vmatpush3.bf16.msra.mxu0 %v6941_v42  ;;  %v4593_v42 = vlaneseq }
 0x26a   : > { %6720 = vmatprep.subr.bf16.mxu0 %v7151_v11 }
 0x26b   : > { %5149 = vmatpush1.bf16.msra.mxu1 %v7024_v17  ;;  %v8397_v43 = vshrl.u32 %v4593_v42, 7  ;;  %v7050_v17 = vld [vmem:[%s8602_s8 + $0x164] ss:$8 sps:$4 sm:$0xff]   ;;  %v7083_v42 = vld [vmem:[%s8602_s8 + $0x1b4] ss:$8 sps:$4 sm:$0xff]  }
 0x26c   : > { %5150 = vmatprep.subr.bf16.mxu1 %v7029_v19  ;;  %v7051_v19 = vld [vmem:[%s8602_s8 + $0x150] ss:$8 sps:$4 sm:$0xff]  }
 0x26d   : > { %6721 = vmatpush3.bf16.msra.mxu0 %v6942_v46  ;;  %v4599_v44 = vsub.s32 1, %v8397_v43  ;;  %v4591_v46 = vld [vmem:[%s8599_s5] sm:$0xf]  ;;  %v4595_v38 = vsub.s32 0, %v8397_v43 }
 0x26e   : > { %6722 = vmatprep.subr.bf16.mxu0 %v7151_v11 }
 0x26f   : > { %5151 = vmatpush1.bf16.msra.mxu1 %v7027_v23  ;;  %v4600_v20 = vrot.slane %v4591_v46, %v4599_v44  ;;  %v4596_v52 = vrot.slane %v4591_v46, %v4595_v38  ;;  %v7054_v23 = vld [vmem:[%s8602_s8 + $0x140] ss:$8 sps:$4 sm:$0xff]  }
 0x270   : > { %5152 = vmatprep.subr.bf16.mxu1 %v7032_v24  ;;  %v7059_v24 = vld [vmem:[%s8602_s8 + $0x134] ss:$8 sps:$4 sm:$0xff]  }
 0x271   : > { %6723 = vmatpush3.bf16.msra.mxu0 %v6943_v49 }
 0x272   : > { %6724 = vmatprep.subr.bf16.mxu0 %v7151_v11 }
 0x273   : > { %5153 = vmatpush1.bf16.msra.mxu1 %v7030_v27  ;;  %v7060_v27 = vld [vmem:[%s8602_s8 + $0x120] ss:$8 sps:$4 sm:$0xff]  }
 0x274   : > { %5154 = vmatprep.subr.bf16.mxu1 %v7035_v28  ;;  %v7065_v28 = vld [vmem:[%s8602_s8 + $0x114] ss:$8 sps:$4 sm:$0xff]  }
 0x275   : > { %6725 = vmatpush3.bf16.msra.mxu0 %v6944_v53 }
 0x276   : > { %6726 = vmatprep.subr.bf16.mxu0 %v7151_v11 }
 0x277   : > { %5155 = vmatpush1.bf16.msra.mxu1 %v7033_v32  ;;  %v7066_v32 = vld [vmem:[%s8602_s8 + $0x100] ss:$8 sps:$4 sm:$0xff]  }
 0x278   : > { %5156 = vmatprep.subr.bf16.mxu1 %v7038_v2  ;;  %v7071_v2 = vld [vmem:[%s8602_s8 + $0x1f4] ss:$8 sps:$4 sm:$0xff]  }
 0x279   : > { %6727 = vmatpush3.bf16.msra.mxu0 %v6945_v29 }
 0x27a   : > { %6728 = vmatprep.subr.bf16.mxu0 %v7151_v11 }
 0x27b   : > { %5157 = vmatpush1.bf16.msra.mxu1 %v7036_v36  ;;  %v7074_v36 = vld [vmem:[%s8602_s8 + $0x1e4] ss:$8 sps:$4 sm:$0xff]  }
 0x27c   : > { %5158 = vmatprep.subr.bf16.mxu1 %v7041_v37  ;;  %v7072_v37 = vld [vmem:[%s8602_s8 + $0x1e0] ss:$8 sps:$4 sm:$0xff]  }
 0x27d   : > { %6729 = vmatpush3.bf16.msra.mxu0 %v6946_v55 }
 0x27e   : > { %6730 = vmatprep.subr.bf16.mxu0 %v7151_v11  ;;  %v7044_v11 = vld [vmem:[%s8603_s9 + $0x4] ss:$8 sps:$4 sm:$0xff]  }
 0x27f   : > { %5159 = vmatpush1.bf16.msra.mxu1 %v7039_v3  ;;  %v7077_v3 = vld [vmem:[%s8602_s8 + $0x1d4] ss:$8 sps:$4 sm:$0xff]  }
 0x280   : > { %5160 = vmatprep.subr.bf16.mxu1 %v7044_v11  ;;  %v7075_v11 = vld [vmem:[%s8602_s8 + $0x1d0] ss:$8 sps:$4 sm:$0xff]  }
 0x281   : > { %6731 = vmatpush3.bf16.msra.mxu0 %v6947_v54 }
 0x282   : > { %5509 = vmatprep.subr.bf16.mxu0 %v6975_v56 }
 0x283   : > { %5161 = vmatpush1.bf16.msra.mxu1 %v7042_v40  ;;  %v7080_v40 = vld [vmem:[%s8602_s8 + $0x1c4] ss:$8 sps:$4 sm:$0xff]  }
 0x284   : > { %6733 = vmatmul.mubr.bf16.vlgmr.msra.gmra.mxu0 %v6948_v59  ;;  %5552 = vmatprep.subr.bf16.mxu1 %v7047_v41  ;;  %v7078_v41 = vld [vmem:[%s8602_s8 + $0x1c0] ss:$8 sps:$4 sm:$0xff]  }
 0x285   : > { %5510 = vmatpush1.bf16.msra.mxu0 %v6973_v60 }
 0x286   : > { %5511 = vmatprep.subr.bf16.mxu0 %v6978_v61  ;;  %v4603_v61 = vsub.s32 2, %v8397_v43 }
 0x289   : > { %5512 = vmatpush1.bf16.msra.mxu0 %v6976_v33  ;;  %v4604_v33 = vrot.slane %v4591_v46, %v4603_v61  ;;  %v7099_v61 = vld [vmem:[%s8605_s11 + $0x60] sm:$0xff]  }
 0x28a   : > { %5513 = vmatprep.subr.bf16.mxu0 %v6981_v62 }
 0x28d   : > { %5514 = vmatpush1.bf16.msra.mxu0 %v6979_v63 }
 0x28e   : > { %5515 = vmatprep.subr.bf16.mxu0 %v6984_v0 }
 0x291   : > { %5516 = vmatpush1.bf16.msra.mxu0 %v6982_v34 }
 0x292   : > { %5517 = vmatprep.subr.bf16.mxu0 %v6987_v1 }
 0x295   : > { %5518 = vmatpush1.bf16.msra.mxu0 %v6985_v4  ;;  %v4607_v4 = vsub.s32 3, %v8397_v43  ;;  %v6273_v43 = vld [vmem:[%s8606_s12] ss:$0 sm:$0xff] }
 0x296   : > { %5519 = vmatprep.subr.bf16.mxu0 %v6990_v5 }
 0x299   : > { %5520 = vmatpush1.bf16.msra.mxu0 %v6988_v6  ;;  %v6183_v6 = vld [vmem:[%s8601_s7] ss:$0 sm:$0xff] }
 0x29a   : > { %5521 = vmatprep.subr.bf16.mxu0 %v6993_v7 }
 0x29d   : > { %5522 = vmatpush1.bf16.msra.mxu0 %v6991_v8  ;;  %v4608_v8 = vrot.slane %v4591_v46, %v4607_v4  ;;  %v7081_v46 = vld [vmem:[%s8602_s8 + $0x1b0] ss:$8 sps:$4 sm:$0xff]   ;;  %v7106_v4 = vld [vmem:[%s8605_s11 + $0x8] sm:$0xff]  }
 0x29e   : > { %5523 = vmatprep.subr.bf16.mxu0 %v6996_v9 }
 0x2a1   : > { %5524 = vmatpush1.bf16.msra.mxu0 %v6994_v12 }
 0x2a2   : > { %5525 = vmatprep.subr.bf16.mxu0 %v6999_v13 }
 0x2a5   : > { %5526 = vmatpush2.bf16.msra.mxu0 %v6997_v48 }
 0x2a6   : > { %5527 = vmatprep.subr.bf16.mxu0 %v7002_v10 }
 0x2a9   : > { %5528 = vmatpush2.bf16.msra.mxu0 %v7000_v14 }
 0x2aa   : > { %5529 = vmatprep.subr.bf16.mxu0 %v7005_v39 }
 0x2ad   : > { %5530 = vmatpush2.bf16.msra.mxu0 %v7003_v45 }
 0x2ae   : > { %5531 = vmatprep.subr.bf16.mxu0 %v7008_v15 }
 0x2b1   : > { %5532 = vmatpush2.bf16.msra.mxu0 %v7006_v50  ;;  %v7045_v50 = vld [vmem:[%s8602_s8 + $0x170] ss:$8 sps:$4 sm:$0xff]  }
 0x2b2   : > { %5533 = vmatprep.subr.bf16.mxu0 %v7011_v58 }
 0x2b5   : > { %5534 = vmatpush2.bf16.msra.mxu0 %v7009_v51  ;;  %v7053_v51 = vld [vmem:[%s8602_s8 + $0x154] ss:$8 sps:$4 sm:$0xff]  }
 0x2b6   : > { %5535 = vmatprep.subr.bf16.mxu0 %v7014_v22  ;;  %v7056_v22 = vld [vmem:[%s8602_s8 + $0x144] ss:$8 sps:$4 sm:$0xff]  }
 0x2b9   : > { %5536 = vmatpush2.bf16.msra.mxu0 %v7012_v25  ;;  %v7057_v25 = vld [vmem:[%s8602_s8 + $0x130] ss:$8 sps:$4 sm:$0xff]  }
 0x2ba   : > { %5537 = vmatprep.subr.bf16.mxu0 %v7017_v26  ;;  %v7062_v26 = vld [vmem:[%s8602_s8 + $0x124] ss:$8 sps:$4 sm:$0xff]  }
 0x2bd   : > { %5538 = vmatpush2.bf16.msra.mxu0 %v7015_v30  ;;  %v7063_v30 = vld [vmem:[%s8602_s8 + $0x110] ss:$8 sps:$4 sm:$0xff]  }
 0x2be   : > { %5539 = vmatprep.subr.bf16.mxu0 %v7020_v31  ;;  %v7068_v31 = vld [vmem:[%s8602_s8 + $0x104] ss:$8 sps:$4 sm:$0xff]  }
 0x2c1   : > { %5540 = vmatpush2.bf16.msra.mxu0 %v7018_v35  ;;  %v7069_v35 = vld [vmem:[%s8602_s8 + $0x1f0] ss:$8 sps:$4 sm:$0xff]  }
 0x324   : > { %v4807_v47 = vpop.f32.mrf.mxu0  ;;  %v4850_v62 = vpop.f32.mrf.mxu1 }
 0x325   : > { %v4808_v56 = vadd.f32 %v4807_v47, %v4596_v52  ;;  %v8409_v0 = vadd.f32 %v4850_v62, %v4604_v33  ;;  %v7086_v47 = vld [vmem:[%s8602_s8 + $0x1a4] ss:$8 sps:$4 sm:$0xff]   ;;  %v7101_v62 = vld [vmem:[%s8605_s11 + $0x58] sm:$0xff]  }
 0x326   : > { %v4809_v49 = vpop.f32.mrf.mxu0  ;;  %v4852_v63 = vpop.f32.mrf.mxu1 }
 0x327   : > { %v4810_v55 = vadd.f32 %v4809_v49, %v4600_v20  ;;  %v4853_v10 = vadd.f32 %v4852_v63, %v4608_v8  ;;  %v7084_v49 = vld [vmem:[%s8602_s8 + $0x1a0] ss:$8 sps:$4 sm:$0xff]   ;;  %v7102_v63 = vld [vmem:[%s8605_s11 + $0x18] sm:$0xff]  }
 0x328   : > { %v4811_v53 = vpop.f32.mrf.mxu0  ;;  %v4854_v34 = vpop.f32.mrf.mxu1 }
 0x329   : > { %v4812_v21 = vadd.f32 %v4811_v53, %v4596_v52  ;;  %v8411_v1 = vadd.f32 %v4854_v34, %v4604_v33  ;;  %v7087_v52 = vld [vmem:[%s8602_s8 + $0x190] ss:$8 sps:$4 sm:$0xff]   ;;  %v7092_v53 = vld [vmem:[%s8602_s8 + $0x184] ss:$8 sps:$4 sm:$0xff]  }
 0x32a   : > { %v4813_v29 = vpop.f32.mrf.mxu0  ;;  %v4856_v9 = vpop.f32.mrf.mxu1  ;;  %v7100_v33 = vld [vmem:[%s8605_s11 + $0x20] sm:$0xff]   ;;  %v7104_v34 = vld [vmem:[%s8605_s11 + $0x10] sm:$0xff]  }
 0x32b   : > { %v4814_v54 = vadd.f32 %v4813_v29, %v4600_v20  ;;  %v4981_v60 = vpack.c.bf16 %v4812_v21, %v4808_v56  ;;  %v4983_v5 = vpack.c.bf16 %v8411_v1, %v8409_v0  ;;  %v4857_v14 = vadd.f32 %v4856_v9, %v4608_v8  ;;  %v7089_v20 = vld [vmem:[%s8602_s8 + $0x194] ss:$8 sps:$4 sm:$0xff]   ;;  %v7090_v21 = vld [vmem:[%s8602_s8 + $0x180] ss:$8 sps:$4 sm:$0xff]  }
 0x32c   : > { %v7093_v29 = vld [vmem:[%s8605_s11 + $0x78] sm:$0xff]   ;;  %v7096_v56 = vld [vmem:[%s8605_s11 + $0x30] sm:$0xff]   ;;  %v7105_v1 = vld [vmem:[%s8605_s11 + $0x48] sm:$0xff]  }
 0x32d   : > { %v4982_v59 = vpack.c.bf16 %v4814_v54, %v4810_v55  ;;  %v4984_v16 = vpack.c.bf16 %v4857_v14, %v4853_v10  ;;  %v7094_v55 = vld [vmem:[%s8605_s11 + $0x38] sm:$0xff]   ;;  %v7095_v54 = vld [vmem:[%s8605_s11 + $0x70] sm:$0xff]   ;;  %6434 = vmatprep.subr.bf16.mxu0 %v7093_v29 }
 0x32e   : > { %v7103_v0 = vld [vmem:[%s8605_s11 + $0x50] sm:$0xff]  }
 0x32f   : > { %5541 = vmatprep.mubr.bf16.mxu0 %v4982_v59  ;;  %v7097_v59 = vld [vmem:[%s8605_s11 + $0x68] sm:$0xff]  }
 0x330   : > { %5542 = vmatmul.mubr.bf16.vlgmr.msra.gmra.mxu0 %v4981_v60  ;;  %v7098_v60 = vld [vmem:[%s8605_s11 + $0x28] sm:$0xff]  }
 0x331   : > { %6435 = vmatpush3.bf16.msra.mxu0 %v7094_v55 }
 0x332   : > { %6436 = vmatprep.subr.bf16.mxu0 %v7095_v54 }
 0x335   : > { %6437 = vmatpush3.bf16.msra.mxu0 %v7096_v56 }
 0x336   : > { %6438 = vmatprep.subr.bf16.mxu0 %v7097_v59 }
 0x339   : > { %6439 = vmatpush3.bf16.msra.mxu0 %v7098_v60 }
 0x33a   : > { %6440 = vmatprep.subr.bf16.mxu0 %v7099_v61 }
 0x33d   : > { %6441 = vmatpush3.bf16.msra.mxu0 %v7100_v33 }
 0x33e   : > { %6442 = vmatprep.subr.bf16.mxu0 %v7101_v62 }
 0x341   : > { %6443 = vmatpush3.bf16.msra.mxu0 %v7102_v63 }
 0x342   : > { %6444 = vmatprep.subr.bf16.mxu0 %v7103_v0 }
 0x344   : > { %v4972_v7 = vpop.f32.mrf.mxu0 }
 0x345   : > { %v4973_v13 = vadd.f32 %v6183_v6, %v4972_v7  ;;  %6445 = vmatpush3.bf16.msra.mxu0 %v7104_v34 }
 0x346   : > { %v6734_v12 = vpop.f32.mrf.mxu0  ;;  %6446 = vmatprep.subr.bf16.mxu0 %v7105_v1 }
 0x347   : > { %v4979_v15 = vmax.f32 %v4973_v13, 0.0 }
 0x348   : > { %v4975_v48 = vpop.f32.mrf.mxu0 }
 0x349   : > { %v4976_v39 = vadd.f32 %v6183_v6, %v4975_v48  ;;  %6447 = vmatpush3.bf16.msra.mxu0 %v7106_v4  ;;  %v7108_v6 = vld [vmem:[%s8605_s11] sm:$0xff]  }
 0x34a   : > { %v6735_v45 = vpop.f32.mrf.mxu0 }
 0x34b   : > { %v4980_v57 = vmax.f32 %v4976_v39, 0.0  ;;  %v5595_v45 = vld [vmem:[%s8604_s10] sm:$0x3] }
 0x34d   : > { %v5049_v58 = vpack.c.bf16 %v4980_v57, %v4979_v15 }
 0x34f   : > { %5179 = vmatmul.mubr.bf16.vlgmr.msra.gmra.mxu1 %v5049_v58  ;;  %v5604_v58 = vrot.slane %v5595_v45, %v4599_v44 }
 0x350   : > { %5553 = vmatpush1.bf16.msra.mxu1 %v7045_v50  ;;  %5584 = vmatprep.mubr.bf16.mxu1 %v4984_v16 }
 0x351   : > { %5554 = vmatprep.subr.bf16.mxu1 %v7050_v17 }
 0x354   : > { %5555 = vmatpush1.bf16.msra.mxu1 %v7048_v18 }
 0x355   : > { %5556 = vmatprep.subr.bf16.mxu1 %v7053_v51  ;;  %v5600_v51 = vrot.slane %v5595_v45, %v4595_v38 }
 0x358   : > { %5557 = vmatpush1.bf16.msra.mxu1 %v7051_v19 }
 0x359   : > { %5558 = vmatprep.subr.bf16.mxu1 %v7056_v22 }
 0x35c   : > { %5559 = vmatpush1.bf16.msra.mxu1 %v7054_v23 }
 0x35d   : > { %5560 = vmatprep.subr.bf16.mxu1 %v7059_v24 }
 0x360   : > { %5561 = vmatpush1.bf16.msra.mxu1 %v7057_v25 }
 0x361   : > { %5562 = vmatprep.subr.bf16.mxu1 %v7062_v26 }
 0x364   : > { %5563 = vmatpush1.bf16.msra.mxu1 %v7060_v27 }
 0x365   : > { %5564 = vmatprep.subr.bf16.mxu1 %v7065_v28 }
 0x368   : > { %5565 = vmatpush1.bf16.msra.mxu1 %v7063_v30 }
 0x369   : > { %5566 = vmatprep.subr.bf16.mxu1 %v7068_v31 }
 0x36c   : > { %5567 = vmatpush1.bf16.msra.mxu1 %v7066_v32 }
 0x36d   : > { %5568 = vmatprep.subr.bf16.mxu1 %v7071_v2 }
 0x370   : > { %5569 = vmatpush2.bf16.msra.mxu1 %v7069_v35 }
 0x371   : > { %5570 = vmatprep.subr.bf16.mxu1 %v7074_v36 }
 0x374   : > { %5571 = vmatpush2.bf16.msra.mxu1 %v7072_v37 }
 0x375   : > { %5572 = vmatprep.subr.bf16.mxu1 %v7077_v3 }
 0x378   : > { %5573 = vmatpush2.bf16.msra.mxu1 %v7075_v11 }
 0x379   : > { %5574 = vmatprep.subr.bf16.mxu1 %v7080_v40 }
 0x37c   : > { %5575 = vmatpush2.bf16.msra.mxu1 %v7078_v41 }
 0x37d   : > { %5576 = vmatprep.subr.bf16.mxu1 %v7083_v42 }
 0x380   : > { %5577 = vmatpush2.bf16.msra.mxu1 %v7081_v46 }
 0x381   : > { %5578 = vmatprep.subr.bf16.mxu1 %v7086_v47 }
 0x384   : > { %5579 = vmatpush2.bf16.msra.mxu1 %v7084_v49 }
 0x385   : > { %5580 = vmatprep.subr.bf16.mxu1 %v7089_v20 }
 0x388   : > { %5581 = vmatpush2.bf16.msra.mxu1 %v7087_v52 }
 0x389   : > { %5582 = vmatprep.subr.bf16.mxu1 %v7092_v53 }
 0x38c   : > { %5583 = vmatpush2.bf16.msra.mxu1 %v7090_v21 }
 0x38f   : > { %5585 = vmatmul.mubr.bf16.vlgmr.msra.gmra.mxu1 %v4983_v5  ;;  %v7107_v5 = vld [vmem:[%s8605_s11 + $0x40] sm:$0xff]  }
 0x390   : > { %6448 = vmatprep.subr.bf16.mxu0 %v7107_v5 }
 0x391   : > { %6449 = vmatpush3.bf16.msra.mxu0 %v7108_v6 }
 0x3f0   : > { %v5543_v9 = vpop.f32.mrf.mxu0 }
 0x3f2   : > { %v5545_v13 = vpop.f32.mrf.mxu0 }
 0x3f4   : > { %v5547_v10 = vpop.f32.mrf.mxu0 }
 0x3f6   : > { %v5549_v17 = vpop.f32.mrf.mxu0 }
 0x40f   : > { %v5180_v7 = vpop.f32.mrf.mxu1 }
 0x410   : > { %v5544_v15 = vadd.f32 %v5543_v9, %v5180_v7 }
 0x411   : > { %v5182_v8 = vpop.f32.mrf.mxu1 }
 0x412   : > { %v5546_v39 = vadd.f32 %v5545_v13, %v5182_v8 }
 0x413   : > { %v5184_v12 = vpop.f32.mrf.mxu1 }
 0x414   : > { %v5548_v50 = vadd.f32 %v5547_v10, %v5184_v12 }
 0x415   : > { %v5186_v48 = vpop.f32.mrf.mxu1 }
 0x416   : > { %v5550_v22 = vadd.f32 %v5549_v17, %v5186_v48 }
 0x44f   : > { %v5586_v14 = vpop.f32.mrf.mxu1 }
 0x450   : > { %v5587_v18 = vadd.f32 %v5586_v14, %v5544_v15 }
 0x451   : > { %v5588_v57 = vpop.f32.mrf.mxu1 }
 0x452   : > { %v5589_v16 = vadd.f32 %v5588_v57, %v5546_v39  ;;  %v5607_v28 = vadd.f32 %v5600_v51, %v5587_v18 }
 0x453   : > { %v5590_v19 = vpop.f32.mrf.mxu1 }
 0x454   : > { %v5591_v23 = vadd.f32 %v5590_v19, %v5548_v50  ;;  %v5608_v25 = vadd.f32 %v5604_v58, %v5589_v16  ;;  %v5611_v35 = vmax.f32 %v5607_v28, 0.0 }
 0x455   : > { %v5592_v24 = vpop.f32.mrf.mxu1 }
 0x456   : > { %v5609_v26 = vadd.f32 %v5600_v51, %v5591_v23  ;;  %v5593_v27 = vadd.f32 %v5592_v24, %v5550_v22  ;;  %v5612_v32 = vmax.f32 %v5608_v25, 0.0 }
 0x458   : > { %v5610_v30 = vadd.f32 %v5604_v58, %v5593_v27  ;;  %v5613_v31 = vmax.f32 %v5609_v26, 0.0 }
 0x45a   : > { %v5614_v2 = vmax.f32 %v5610_v30, 0.0  ;;  %v5615_v44 = vpack.c.bf16 %v5613_v31, %v5611_v35 }
 0x45c   : > { %v5616_v36 = vpack.c.bf16 %v5614_v2, %v5612_v32 }
 0x45e   : > { %5784 = vmatprep.mubr.bf16.mxu0 %v5616_v36 }
 0x45f   : > { %5785 = vmatmul.mubr.bf16.vlgmr.msra.gmra.mxu0 %v5615_v44 }
 0x51f   : > { %v6450_v37 = vpop.f32.mrf.mxu0 }
 0x521   : > { %v6451_v38 = vpop.f32.mrf.mxu0 }
 0x522   : > { %v6452_v3 = vadd.f32 %v6451_v38, %v6450_v37 }
 0x523   : > { %v6453_v11 = vpop.f32.mrf.mxu0 }
 0x524   : > { %v5787_v40 = vadd.f32 %v6452_v3, %v6273_v43 }
 0x525   : > { %v6454_v41 = vpop.f32.mrf.mxu0 }
 0x526   : > { %5793 = vst [vmem:[%s8607_s13] sm:$0xff] %v5787_v40  ;;  %v6455_v42 = vadd.f32 %v6454_v41, %v6453_v11 }
 0x528   : > { %v5790_v46 = vadd.f32 %v6455_v42, %v6273_v43 }
 0x52a   : > { %5794 = vst [vmem:[%s8607_s13 + $0x8] sm:$0xff] %v5790_v46 }
 0x52b PF: > { %s23_s29 = sadd.s32 1, %s7147_s29   ;;  %s8608_s25 = smov %s7135_s26 }
 0x52c   : > { %p20_p11 = scmp.ge.s32.totalorder %s23_s29, 4   ;;  %s8609_s26 = smov %s7258_s16 }
 0x52d   : > { %s8610_s27 = smov %s7143_s28  ;;  %s8611_s28 = smov %s8613_s30 }
 0x52e   :  { %22 = sbr.rel (!%p20_p11) target bundleno = 3 (0x3), region = 159 }

</bundles_post_ra>
